<compile_context>
chip_gen: v6e
topology: v6e:2x2x1
jax: 0.10.0
libtpu: 0.0.40
codegen_flags: <defaults>
</compile_context>

<pallas_src>
import functools

import numpy as np
import jax
import jax.numpy as jnp
from jax import lax
from jax.experimental import pallas as pl
from jax.experimental.pallas import tpu as pltpu

LANE = 128                       # lane width: pad channel dims to multiples of this


def _detect_vmem_bytes():
    try:
        info = pltpu.get_tpu_info()
        cap = getattr(info, "vmem_capacity_bytes", None)
        if cap:
            return int(cap)
    except Exception:
        pass
    return 128 * 1024 * 1024     # v5e/v6e default


_PHYS_VMEM = _detect_vmem_bytes()
# Half of physical VMEM: 64 MiB on v5e/v6e (128 MiB physical), 32 MiB on v7x (64 MiB).
VMEM_LIMIT_BYTES = min(_PHYS_VMEM // 2, 96 * 1024 * 1024)
ROW_TILE_CAP = 1024 if VMEM_LIMIT_BYTES >= 64 * 1024 * 1024 else 512
CONV2_BAND_CAP = 32              # output-row band for the 3x3 conv


# ------------------------------ small helpers ------------------------------- #

def _ceil_to(x, m):
    return (x + m - 1) // m * m


def _pick_band(n, cap):
    """Largest divisor of n that is <= cap (always >= 1, never exceeds VMEM)."""
    for d in range(min(cap, n), 0, -1):
        if n % d == 0:
            return d
    return n


def _pad_last(a, target):
    pad = target - a.shape[-1]
    if pad == 0:
        return a
    return jnp.pad(a, [(0, 0)] * (a.ndim - 1) + [(0, pad)])


def _pad_2d(w, rows, cols):
    return jnp.pad(w, ((0, rows - w.shape[0]), (0, cols - w.shape[1])))


def _nbytes(a):
    return a.size * a.dtype.itemsize


# ----------------------------- Pallas kernels ------------------------------ #

def _mm_bn_kernel(x_ref, w_ref, scale_ref, bias_ref, o_ref, *, relu):
    # 1x1 conv == channel matmul (bf16 in, f32 acc), fused with folded
    # BatchNorm (+ optional ReLU) in f32.
    y = jnp.dot(x_ref[...], w_ref[...], preferred_element_type=jnp.float32)
    y = y * scale_ref[...] + bias_ref[...]
    if relu:
        y = jnp.maximum(y, 0.0)
    o_ref[...] = y.astype(o_ref.dtype)


def _mm_bn_proj_add_kernel(h_ref, x_ref, w3_ref, s3_ref, b3_ref,
                           wsc_ref, ssc_ref, bsc_ref, o_ref):
    # conv3 (1x1) + BN3 + projection shortcut (1x1 conv + BN) + add, fused.
    y = jnp.dot(h_ref[...], w3_ref[...], preferred_element_type=jnp.float32)
    y = y * s3_ref[...] + b3_ref[...]
    r = jnp.dot(x_ref[...], wsc_ref[...], preferred_element_type=jnp.float32)
    y = y + r * ssc_ref[...] + bsc_ref[...]
    o_ref[...] = y.astype(o_ref.dtype)


def _mm_bn_res_add_kernel(h_ref, res_ref, w3_ref, s3_ref, b3_ref, o_ref):
    # conv3 (1x1) + BN3 + identity shortcut add, fused (add in f32).
    y = jnp.dot(h_ref[...], w3_ref[...], preferred_element_type=jnp.float32)
    y = y * s3_ref[...] + b3_ref[...] + res_ref[...].astype(jnp.float32)
    o_ref[...] = y.astype(o_ref.dtype)


def _conv3x3_bn_relu_kernel(ph_ref, w_ref, scale_ref, bias_ref, o_ref, *,
                            stride, tb, wo, cm):
    # 3x3 conv (stride-aware) + folded BN + ReLU for one band of output rows of
    # one image.  The phase-split padded image is resident in VMEM across the
    # band axis; the 9 taps are consumed as accumulating MXU matmuls so at most
    # one (tb*wo, cm) tap is live at a time (no 9x concat buffer).
    r0 = pl.multiple_of(pl.program_id(1) * tb, tb)
    acc = jnp.zeros((tb * wo, o_ref.shape[-1]), jnp.float32)
    for dy in range(3):
        for dx in range(3):
            p = (dy % stride) * stride + (dx % stride)       # phase plane
            tap = ph_ref[0, p,
                         pl.ds(r0 + dy // stride, tb),
                         pl.ds(dx // stride, wo), :]          # (tb, wo, cm)
            acc = acc + jnp.dot(tap.reshape(tb * wo, cm), w_ref[3 * dy + dx],
                                preferred_element_type=jnp.float32)
    y = jnp.maximum(acc * scale_ref[...] + bias_ref[...], 0.0)
    o_ref[...] = y.reshape(o_ref.shape).astype(o_ref.dtype)


# ------------------------------ pallas wrappers ----------------------------- #

def _row_call(kernel, row_args, const_args, cout, out_dtype, *, flops,
              tile_cap=None):
    """Row-tiled pallas_call: row_args are tiled over M (padded to a multiple
    of the tile -> never falls back to a whole-activation block), const_args
    (weights, folded BN scale/bias) keep a constant block index so they stay
    resident."""
    tile_cap = ROW_TILE_CAP if tile_cap is None else tile_cap
    m = row_args[0].shape[0]
    tm = min(tile_cap, _ceil_to(m, 16))      # multiple of 16: legal bf16/f32 tile
    mpad = _ceil_to(m, tm)
    if mpad != m:
        row_args = [jnp.pad(a, ((0, mpad - m), (0, 0))) for a in row_args]
    # TODO(synk): single-buffer the constant-index operands
    # (pipeline_mode=pl.Buffered(1)) once verified on the target jax version;
    # they are double-buffered by default, wasting VMEM at large channel counts.
    in_specs = (
        [pl.BlockSpec((tm, a.shape[1]), lambda i: (i, 0)) for a in row_args]
        + [pl.BlockSpec(a.shape, lambda i, nd=a.ndim: (0,) * nd)
           for a in const_args])
    bytes_accessed = (sum(_nbytes(a) for a in row_args)
                      + sum(_nbytes(a) for a in const_args)
                      + mpad * cout * np.dtype(out_dtype).itemsize)
    out = pl.pallas_call(
        kernel,
        out_shape=jax.ShapeDtypeStruct((mpad, cout), out_dtype),
        grid=(mpad // tm,),
        in_specs=in_specs,
        out_specs=pl.BlockSpec((tm, cout), lambda i: (i, 0)),
        compiler_params=pltpu.CompilerParams(
            dimension_semantics=("parallel",),
            vmem_limit_bytes=VMEM_LIMIT_BYTES),
        cost_estimate=pl.CostEstimate(flops=flops, transcendentals=0,
                                      bytes_accessed=bytes_accessed),
    )(*row_args, *const_args)
    return out[:m] if mpad != m else out


def matmul_bn(x2d, w, scale, bias, *, relu):
    m, k = x2d.shape
    c = w.shape[1]
    return _row_call(functools.partial(_mm_bn_kernel, relu=relu),
                     [x2d], [w, scale, bias], c, jnp.bfloat16,
                     flops=2 * m * k * c)


def matmul_bn_proj_add(h2d, w3, s3, b3, xs2d, wsc, ssc, bsc):
    m, k3 = h2d.shape
    ksc = xs2d.shape[1]
    c = w3.shape[1]
    return _row_call(_mm_bn_proj_add_kernel,
                     [h2d, xs2d], [w3, s3, b3, wsc, ssc, bsc], c, jnp.float32,
                     flops=2 * m * c * (k3 + ksc))


def matmul_bn_res_add(h2d, res2d, w3, s3, b3):
    m, k3 = h2d.shape
    c = w3.shape[1]
    return _row_call(_mm_bn_res_add_kernel,
                     [h2d, res2d], [w3, s3, b3], c, jnp.float32,
                     flops=2 * m * k3 * c)


def conv3x3_bn_relu(x_nhwc, w_taps, scale, bias, *, stride):
    """3x3 conv (pad 1, given stride) + folded BN + ReLU on a bf16 NHWC tensor.

    Glue does only zero-padding and a phase (space-to-depth) split so the
    kernel can address stride-s taps with contiguous slices; no 9x im2col
    tensor is ever written to HBM, and stride-2 outputs are computed directly.
    """
    n, h, w, c = x_nhwc.shape
    coutp = w_taps.shape[-1]
    ho = (h - 1) // stride + 1
    wo = (w - 1) // stride + 1
    hp = _ceil_to(h + 2, stride)
    wp = _ceil_to(w + 2, stride)
    xp = jnp.pad(x_nhwc, ((0, 0), (1, hp - h - 1), (1, wp - w - 1), (0, 0)))
    hps, wps = hp // stride, wp // stride
    # phases[n, py*stride+px, i, j, :] = xp[n, stride*i+py, stride*j+px, :]
    # TODO(synk): for stride=2 this space-to-depth transpose materializes a
    # padded copy of h1 in HBM; handle the stride inside the kernel instead.
    phases = (xp.reshape(n, hps, stride, wps, stride, c)
                .transpose(0, 2, 4, 1, 3, 5)
                .reshape(n, stride * stride, hps, wps, c))

    tb = _pick_band(ho, CONV2_BAND_CAP)         # band of output rows per step
    flops = 2 * n * ho * wo * (9 * c) * coutp
    bytes_accessed = (_nbytes(phases) + _nbytes(w_taps) + _nbytes(scale)
                      + _nbytes(bias)
                      + n * ho * wo * coutp * x_nhwc.dtype.itemsize)

    kernel = functools.partial(_conv3x3_bn_relu_kernel,
                               stride=stride, tb=tb, wo=wo, cm=c)
    return pl.pallas_call(
        kernel,
        out_shape=jax.ShapeDtypeStruct((n, ho, wo, coutp), x_nhwc.dtype),
        grid=(n, ho // tb),
        in_specs=[
            # Whole phase-split image: constant block index along the band axis
            # keeps it resident in VMEM (DMA only when the image changes);
            # bf16 halves its footprint.
            # TODO(synk): for very large feature maps on v7x (64 MiB VMEM),
            # switch to a banded block with a 2-row halo instead of the full image.
            pl.BlockSpec((1, stride * stride, hps, wps, c),
                         lambda ni, bi: (ni, 0, 0, 0, 0)),
            pl.BlockSpec(w_taps.shape, lambda ni, bi: (0, 0, 0)),
            pl.BlockSpec(scale.shape, lambda ni, bi: (0, 0)),
            pl.BlockSpec(bias.shape, lambda ni, bi: (0, 0)),
        ],
        out_specs=pl.BlockSpec((1, tb, wo, coutp),
                               lambda ni, bi: (ni, bi, 0, 0)),
        compiler_params=pltpu.CompilerParams(
            # Both axes are fully independent (no accumulator): let megacore
            # (v7x 2 TCs) shard the band axis too.
            dimension_semantics=("parallel", "parallel"),
            vmem_limit_bytes=VMEM_LIMIT_BYTES),
        cost_estimate=pl.CostEstimate(flops=flops, transcendentals=0,
                                      bytes_accessed=bytes_accessed),
    )(phases, w_taps, scale, bias)


# ------------------------------- module glue -------------------------------- #

def fold_bn(bn, cpad, eps=1e-5):
    gamma, beta, mean, var = bn
    scale = gamma / jnp.sqrt(var + eps)
    bias = beta - mean * scale
    return (_pad_last(scale.reshape(1, -1), cpad).astype(jnp.float32),
            _pad_last(bias.reshape(1, -1), cpad).astype(jnp.float32))


def residual_bottleneck_forward(x_nchw, params, *, downsample):
    x = jnp.transpose(x_nchw, (0, 2, 3, 1)).astype(jnp.float32)  # NCHW -> NHWC
    n, h, w, cin = x.shape
    s = 2 if downsample else 1
    cout = params['w3'].shape[0]
    cm = cout // 4
    has_proj = downsample or (cin != cout)
    if not has_proj:
        assert cin == cout and s == 1, "identity shortcut needs cin==cout, stride 1"

    cinp = _ceil_to(cin, LANE)
    cmp_ = _ceil_to(cm, LANE)
    coutp = _ceil_to(cout, LANE)

    # bf16 activations/weights (half HBM/VMEM traffic, native MXU path);
    # accumulation, BN scale/bias, ReLU and the residual add stay in f32.
    x_pad = _pad_last(x, cinp).astype(jnp.bfloat16)              # lane-dense input
    x2d = x_pad.reshape(n * h * w, cinp)

    # conv1 (1x1) + bn1 + relu   (row-tiled matmul kernel)
    sc1, b1 = fold_bn(params['bn1'], cmp_)
    w1 = _pad_2d(jnp.transpose(params['w1'][:, :, 0, 0]),
                 cinp, cmp_).astype(jnp.bfloat16)
    # TODO(synk): fuse conv1 into the conv2 producer (compute the h1 band +
    # halo in-kernel from x tiles) to remove this full-res HBM intermediate.
    h1 = matmul_bn(x2d, w1, sc1, b1, relu=True).reshape(n, h, w, cmp_)

    # conv2 (3x3, stride s, pad 1) + bn2 + relu   (stride-aware, halo in-kernel)
    sc2, b2 = fold_bn(params['bn2'], cmp_)
    w2 = jnp.transpose(params['w2'], (2, 3, 1, 0)).reshape(9, cm, cm)
    w2 = jnp.pad(w2, ((0, 0), (0, cmp_ - cm),
                      (0, cmp_ - cm))).astype(jnp.bfloat16)      # (9, cmp, cmp)
    h2 = conv3x3_bn_relu(h1, w2, sc2, b2, stride=s)              # (n, ho, wo, cmp) bf16
    ho, wo = h2.shape[1], h2.shape[2]
    h2d = h2.reshape(n * ho * wo, cmp_)

    # conv3 (1x1) + bn3 + shortcut, all fused into one row-tiled kernel
    sc3, b3 = fold_bn(params['bn3'], coutp)
    w3 = _pad_2d(jnp.transpose(params['w3'][:, :, 0, 0]),
                 cmp_, coutp).astype(jnp.bfloat16)
    if has_proj:
        # TODO(synk): handle the stride-2 shortcut slice inside the kernel
        # (strided pl.ds on H/W) instead of materializing xs2d in HBM.
        xs2d = x_pad[:, ::s, ::s, :].reshape(n * ho * wo, cinp)
        scs, bs = fold_bn(params['bn_sc'], coutp)
        wsc = _pad_2d(jnp.transpose(params['w_sc'][:, :, 0, 0]),
                      cinp, coutp).astype(jnp.bfloat16)
        out2d = matmul_bn_proj_add(h2d, w3, sc3, b3, xs2d, wsc, scs, bs)
    else:
        res2d = x_pad.reshape(n * ho * wo, coutp)                # cinp == coutp
        out2d = matmul_bn_res_add(h2d, res2d, w3, sc3, b3)

    out = out2d.reshape(n, ho, wo, coutp)[..., :cout]            # f32
    return jnp.transpose(out, (0, 3, 1, 2))                      # NHWC -> NCHW


# ------------------------- pure-JAX reference (check) ------------------------ #

def reference_forward(x_nchw, params, *, downsample, eps=1e-5,
                      compute_dtype=jnp.float32):
    s = 2 if downsample else 1

    def conv(x, w, stride, pad):
        return lax.conv_general_dilated(
            x.astype(compute_dtype), w.astype(compute_dtype),
            (stride, stride), [(pad, pad), (pad, pad)],
            dimension_numbers=('NCHW', 'OIHW', 'NCHW'),
            preferred_element_type=jnp.float32)

    def bn(x, p):
        gamma, beta, mean, var = p
        inv = gamma / jnp.sqrt(var + eps)
        return (x * inv[None, :, None, None]
                + (beta - mean * inv)[None, :, None, None])

    h = jax.nn.relu(bn(conv(x_nchw, params['w1'], 1, 0), params['bn1']))
    h = jax.nn.relu(bn(conv(h, params['w2'], s, 1), params['bn2']))
    h = bn(conv(h, params['w3'], 1, 0), params['bn3'])
    cin = x_nchw.shape[1]
    cout = params['w3'].shape[0]
    if downsample or cin != cout:
        sc = bn(conv(x_nchw, params['w_sc'], s, 0), params['bn_sc'])
    else:
        sc = x_nchw.astype(compute_dtype).astype(jnp.float32)
    return h + sc


# --------------------------------- params ----------------------------------- #

def init_params(key, cin, cout, *, need_shortcut):
    cm = cout // 4
    ks = jax.random.split(key, 8)

    def bn_p(k, c):
        k1, k2, k3, k4 = jax.random.split(k, 4)
        gamma = 1.0 + 0.1 * jax.random.normal(k1, (c,), jnp.float32)
        beta = 0.1 * jax.random.normal(k2, (c,), jnp.float32)
        mean = 0.1 * jax.random.normal(k3, (c,), jnp.float32)
        var = 0.5 + jnp.abs(jax.random.normal(k4, (c,), jnp.float32))
        return (gamma, beta, mean, var)

    p = {
        'w1': 0.2 * jax.random.normal(ks[0], (cm, cin, 1, 1), jnp.float32),
        'bn1': bn_p(ks[1], cm),
        'w2': 0.2 * jax.random.normal(ks[2], (cm, cm, 3, 3), jnp.float32),
        'bn2': bn_p(ks[3], cm),
        'w3': 0.2 * jax.random.normal(ks[4], (cout, cm, 1, 1), jnp.float32),
        'bn3': bn_p(ks[5], cout),
    }
    if need_shortcut:
        p['w_sc'] = 0.2 * jax.random.normal(ks[6], (cout, cin, 1, 1), jnp.float32)
        p['bn_sc'] = bn_p(ks[7], cout)
    return p


# ----------------------------------- main ------------------------------------ #

if __name__ == "__main__":
    key = jax.random.PRNGKey(0)
    kx1, kx2, kp0, kp1, kp2 = jax.random.split(key, 5)

    N, H, W = 2, 16, 16
    cases = [
        # (Cin, Cout, downsample, param_key, x_key)
        (8, 16, False, kp0, kx1),    # projection shortcut (Cin != Cout)
        (8, 16, True,  kp1, kx1),    # downsample: stride-2 conv2 + stride-2 shortcut
        (16, 16, False, kp2, kx2),   # identity shortcut path
    ]
    for cin, cout_, downsample, kp, kx in cases:
        x = jax.random.normal(kx, (N, cin, H, W), jnp.float32)
        need_sc = downsample or cin != cout_
        params = init_params(kp, cin, cout_, need_shortcut=need_sc)

        fwd = jax.jit(functools.partial(residual_bottleneck_forward,
                                        downsample=downsample))
        out = jax.block_until_ready(fwd(x, params))

        ref_f32 = reference_forward(x, params, downsample=downsample)
        ref_bf16 = reference_forward(x, params, downsample=downsample,
                                     compute_dtype=jnp.bfloat16)
        assert out.shape == ref_f32.shape, (out.shape, ref_f32.shape)
        # Strict check vs a bf16-matched reference (same rounding points),
        # loose sanity check vs the pure-f32 reference (bf16 matmul inputs).
        err_m = float(jnp.max(jnp.abs(out - ref_bf16)))
        assert jnp.allclose(out, ref_bf16, atol=3e-2, rtol=3e-2), err_m
        err_f = float(jnp.max(jnp.abs(out - ref_f32)))
        assert jnp.allclose(out, ref_f32, atol=1.5e-1, rtol=1.5e-1), err_f

    print("KERNEL_OK")
</pallas_src>

<mosaic_0001>
module attributes {stable_mosaic.version = 11 : i64} {
  func.func @_mm_bn_kernel(%arg0: i32, %arg1: memref<512x128xbf16, #tpu.memory_space<vmem>>, %arg2: memref<128x128xbf16, #tpu.memory_space<vmem>>, %arg3: memref<1x128xf32, #tpu.memory_space<vmem>>, %arg4: memref<1x128xf32, #tpu.memory_space<vmem>>, %arg5: memref<512x128xbf16, #tpu.memory_space<vmem>>) attributes {dimension_semantics = [#tpu.dimension_semantics<parallel>], iteration_bounds = array<i64: 1>, scalar_prefetch = 0 : i64, scratch_operands = 0 : i64, tpu.core_type = #tpu.core_type<tc>, window_params = [{transform_indices = @transform_0, window_bounds = array<i64: 512, 128>}, {pipeline_mode = #tpu.pipeline_mode<synchronous>, transform_indices = @transform_1, window_bounds = array<i64: 128, 128>}, {pipeline_mode = #tpu.pipeline_mode<synchronous>, transform_indices = @transform_2, window_bounds = array<i64: 1, 128>}, {pipeline_mode = #tpu.pipeline_mode<synchronous>, transform_indices = @transform_3, window_bounds = array<i64: 1, 128>}, {transform_indices = @transform_4, window_bounds = array<i64: 512, 128>}]} {
    %c0 = arith.constant 0 : index
    %c0_0 = arith.constant 0 : index
    %0 = vector.load %arg1[%c0, %c0_0] : memref<512x128xbf16, #tpu.memory_space<vmem>>, vector<512x128xbf16>
    %c0_1 = arith.constant 0 : index
    %c0_2 = arith.constant 0 : index
    %1 = vector.load %arg2[%c0_1, %c0_2] : memref<128x128xbf16, #tpu.memory_space<vmem>>, vector<128x128xbf16>
    %cst = arith.constant dense<0.000000e+00> : vector<512x128xf32>
    %2 = tpu.matmul %0, %1, %cst {dimension_numbers = #tpu.dot_dimension_numbers<[1], [0], [0], [1], [0, 0, 1, 1], [], []>} : vector<512x128xbf16>, vector<128x128xbf16>, vector<512x128xf32> -> vector<512x128xf32>
    %c0_3 = arith.constant 0 : index
    %c0_4 = arith.constant 0 : index
    %3 = vector.load %arg3[%c0_3, %c0_4] : memref<1x128xf32, #tpu.memory_space<vmem>>, vector<1x128xf32>
    %4 = vector.broadcast %3 : vector<1x128xf32> to vector<512x128xf32>
    %5 = arith.mulf %2, %4 : vector<512x128xf32>
    %c0_5 = arith.constant 0 : index
    %c0_6 = arith.constant 0 : index
    %6 = vector.load %arg4[%c0_5, %c0_6] : memref<1x128xf32, #tpu.memory_space<vmem>>, vector<1x128xf32>
    %7 = vector.broadcast %6 : vector<1x128xf32> to vector<512x128xf32>
    %8 = arith.addf %5, %7 : vector<512x128xf32>
    %cst_7 = arith.constant 0.000000e+00 : f32
    %9 = vector.broadcast %cst_7 : f32 to vector<512x128xf32>
    %10 = arith.maximumf %8, %9 : vector<512x128xf32>
    %11 = arith.truncf %10 : vector<512x128xf32> to vector<512x128xbf16>
    %c0_8 = arith.constant 0 : index
    %c0_9 = arith.constant 0 : index
    %12 = vector.load %arg5[%c0_8, %c0_9] : memref<512x128xbf16, #tpu.memory_space<vmem>>, vector<512x128xbf16>
    tpu.vector_store %arg5[%c0_8, %c0_9], %11 {strides = array<i32>} : memref<512x128xbf16, #tpu.memory_space<vmem>>, vector<512x128xbf16>,
    return
  }
  func.func @transform_0(%arg0: i32) -> (i32, i32) {
    %c0_i32 = arith.constant 0 : i32
    %c0_i32_0 = arith.constant 0 : i32
    return %arg0, %c0_i32 : i32, i32
  }
  func.func @transform_1(%arg0: i32) -> (i32, i32) {
    %c0_i32 = arith.constant 0 : i32
    %c0_i32_0 = arith.constant 0 : i32
    %c0_i32_1 = arith.constant 0 : i32
    return %c0_i32, %c0_i32_0 : i32, i32
  }
  func.func @transform_2(%arg0: i32) -> (i32, i32) {
    %c0_i32 = arith.constant 0 : i32
    %c0_i32_0 = arith.constant 0 : i32
    %c0_i32_1 = arith.constant 0 : i32
    return %c0_i32, %c0_i32_0 : i32, i32
  }
  func.func @transform_3(%arg0: i32) -> (i32, i32) {
    %c0_i32 = arith.constant 0 : i32
    %c0_i32_0 = arith.constant 0 : i32
    %c0_i32_1 = arith.constant 0 : i32
    return %c0_i32, %c0_i32_0 : i32, i32
  }
  func.func @transform_4(%arg0: i32) -> (i32, i32) {
    %c0_i32 = arith.constant 0 : i32
    %c0_i32_0 = arith.constant 0 : i32
    return %arg0, %c0_i32 : i32, i32
  }
}

module attributes {stable_mosaic.version = 11 : i64} {
  func.func @_conv3x3_bn_relu_kernel(%arg0: i32, %arg1: i32, %arg2: memref<1x1x18x18x128xbf16, #tpu.memory_space<vmem>>, %arg3: memref<9x128x128xbf16, #tpu.memory_space<vmem>>, %arg4: memref<1x128xf32, #tpu.memory_space<vmem>>, %arg5: memref<1x128xf32, #tpu.memory_space<vmem>>, %arg6: memref<1x16x16x128xbf16, #tpu.memory_space<vmem>>) attributes {dimension_semantics = [#tpu.dimension_semantics<parallel>, #tpu.dimension_semantics<parallel>], iteration_bounds = array<i64: 2, 1>, scalar_prefetch = 0 : i64, scratch_operands = 0 : i64, tpu.core_type = #tpu.core_type<tc>, window_params = [{transform_indices = @transform_0, window_bounds = array<i64: 1, 1, 18, 18, 128>}, {pipeline_mode = #tpu.pipeline_mode<synchronous>, transform_indices = @transform_1, window_bounds = array<i64: 9, 128, 128>}, {pipeline_mode = #tpu.pipeline_mode<synchronous>, transform_indices = @transform_2, window_bounds = array<i64: 1, 128>}, {pipeline_mode = #tpu.pipeline_mode<synchronous>, transform_indices = @transform_3, window_bounds = array<i64: 1, 128>}, {transform_indices = @transform_4, window_bounds = array<i64: 1, 16, 16, 128>}]} {
    %c16_i32 = arith.constant 16 : i32
    %0 = arith.muli %arg1, %c16_i32 : i32
    %1 = tpu.assume_multiple %0, 16 : i32
    %cst = arith.constant 0.000000e+00 : f32
    %2 = vector.broadcast %cst : f32 to vector<256x128xf32>
    %c0_i32 = arith.constant 0 : i32
    %3 = arith.addi %1, %c0_i32 : i32
    %c0 = arith.constant 0 : index
    %c0_0 = arith.constant 0 : index
    %4 = arith.index_cast %3 : i32 to index
    %c0_1 = arith.constant 0 : index
    %c0_2 = arith.constant 0 : index
    %5 = vector.load %arg2[%c0, %c0_0, %4, %c0_1, %c0_2] : memref<1x1x18x18x128xbf16, #tpu.memory_space<vmem>>, vector<1x1x16x16x128xbf16>
    %6 = vector.shape_cast %5 : vector<1x1x16x16x128xbf16> to vector<16x16x128xbf16>
    %7 = vector.shape_cast %6 : vector<16x16x128xbf16> to vector<256x128xbf16>
    %c0_3 = arith.constant 0 : index
    %c0_4 = arith.constant 0 : index
    %c0_5 = arith.constant 0 : index
    %8 = vector.load %arg3[%c0_3, %c0_4, %c0_5] : memref<9x128x128xbf16, #tpu.memory_space<vmem>>, vector<1x128x128xbf16>
    %9 = vector.shape_cast %8 : vector<1x128x128xbf16> to vector<128x128xbf16>
    %cst_6 = arith.constant dense<0.000000e+00> : vector<256x128xf32>
    %10 = tpu.matmul %7, %9, %cst_6 {dimension_numbers = #tpu.dot_dimension_numbers<[1], [0], [0], [1], [0, 0, 1, 1], [], []>} : vector<256x128xbf16>, vector<128x128xbf16>, vector<256x128xf32> -> vector<256x128xf32>
    %11 = arith.addf %2, %10 : vector<256x128xf32>
    %c0_i32_7 = arith.constant 0 : i32
    %12 = arith.addi %1, %c0_i32_7 : i32
    %c0_8 = arith.constant 0 : index
    %c0_9 = arith.constant 0 : index
    %13 = arith.index_cast %12 : i32 to index
    %c1 = arith.constant 1 : index
    %c0_10 = arith.constant 0 : index
    %14 = vector.load %arg2[%c0_8, %c0_9, %13, %c1, %c0_10] : memref<1x1x18x18x128xbf16, #tpu.memory_space<vmem>>, vector<1x1x16x16x128xbf16>
    %15 = vector.shape_cast %14 : vector<1x1x16x16x128xbf16> to vector<16x16x128xbf16>
    %16 = vector.shape_cast %15 : vector<16x16x128xbf16> to vector<256x128xbf16>
    %c1_11 = arith.constant 1 : index
    %c0_12 = arith.constant 0 : index
    %c0_13 = arith.constant 0 : index
    %17 = vector.load %arg3[%c1_11, %c0_12, %c0_13] : memref<9x128x128xbf16, #tpu.memory_space<vmem>>, vector<1x128x128xbf16>
    %18 = vector.shape_cast %17 : vector<1x128x128xbf16> to vector<128x128xbf16>
    %cst_14 = arith.constant dense<0.000000e+00> : vector<256x128xf32>
    %19 = tpu.matmul %16, %18, %cst_14 {dimension_numbers = #tpu.dot_dimension_numbers<[1], [0], [0], [1], [0, 0, 1, 1], [], []>} : vector<256x128xbf16>, vector<128x128xbf16>, vector<256x128xf32> -> vector<256x128xf32>
    %20 = arith.addf %11, %19 : vector<256x128xf32>
    %c0_i32_15 = arith.constant 0 : i32
    %21 = arith.addi %1, %c0_i32_15 : i32
    %c0_16 = arith.constant 0 : index
    %c0_17 = arith.constant 0 : index
    %22 = arith.index_cast %21 : i32 to index
    %c2 = arith.constant 2 : index
    %c0_18 = arith.constant 0 : index
    %23 = vector.load %arg2[%c0_16, %c0_17, %22, %c2, %c0_18] : memref<1x1x18x18x128xbf16, #tpu.memory_space<vmem>>, vector<1x1x16x16x128xbf16>
    %24 = vector.shape_cast %23 : vector<1x1x16x16x128xbf16> to vector<16x16x128xbf16>
    %25 = vector.shape_cast %24 : vector<16x16x128xbf16> to vector<256x128xbf16>
    %c2_19 = arith.constant 2 : index
    %c0_20 = arith.constant 0 : index
    %c0_21 = arith.constant 0 : index
    %26 = vector.load %arg3[%c2_19, %c0_20, %c0_21] : memref<9x128x128xbf16, #tpu.memory_space<vmem>>, vector<1x128x128xbf16>
    %27 = vector.shape_cast %26 : vector<1x128x128xbf16> to vector<128x128xbf16>
    %cst_22 = arith.constant dense<0.000000e+00> : vector<256x128xf32>
    %28 = tpu.matmul %25, %27, %cst_22 {dimension_numbers = #tpu.dot_dimension_numbers<[1], [0], [0], [1], [0, 0, 1, 1], [], []>} : vector<256x128xbf16>, vector<128x128xbf16>, vector<256x128xf32> -> vector<256x128xf32>
    %29 = arith.addf %20, %28 : vector<256x128xf32>
    %c1_i32 = arith.constant 1 : i32
    %30 = arith.addi %1, %c1_i32 : i32
    %c0_23 = arith.constant 0 : index
    %c0_24 = arith.constant 0 : index
    %31 = arith.index_cast %30 : i32 to index
    %c0_25 = arith.constant 0 : index
    %c0_26 = arith.constant 0 : index
    %32 = vector.load %arg2[%c0_23, %c0_24, %31, %c0_25, %c0_26] : memref<1x1x18x18x128xbf16, #tpu.memory_space<vmem>>, vector<1x1x16x16x128xbf16>
    %33 = vector.shape_cast %32 : vector<1x1x16x16x128xbf16> to vector<16x16x128xbf16>
    %34 = vector.shape_cast %33 : vector<16x16x128xbf16> to vector<256x128xbf16>
    %c3 = arith.constant 3 : index
    %c0_27 = arith.constant 0 : index
    %c0_28 = arith.constant 0 : index
    %35 = vector.load %arg3[%c3, %c0_27, %c0_28] : memref<9x128x128xbf16, #tpu.memory_space<vmem>>, vector<1x128x128xbf16>
    %36 = vector.shape_cast %35 : vector<1x128x128xbf16> to vector<128x128xbf16>
    %cst_29 = arith.constant dense<0.000000e+00> : vector<256x128xf32>
    %37 = tpu.matmul %34, %36, %cst_29 {dimension_numbers = #tpu.dot_dimension_numbers<[1], [0], [0], [1], [0, 0, 1, 1], [], []>} : vector<256x128xbf16>, vector<128x128xbf16>, vector<256x128xf32> -> vector<256x128xf32>
    %38 = arith.addf %29, %37 : vector<256x128xf32>
    %c1_i32_30 = arith.constant 1 : i32
    %39 = arith.addi %1, %c1_i32_30 : i32
    %c0_31 = arith.constant 0 : index
    %c0_32 = arith.constant 0 : index
    %40 = arith.index_cast %39 : i32 to index
    %c1_33 = arith.constant 1 : index
    %c0_34 = arith.constant 0 : index
    %41 = vector.load %arg2[%c0_31, %c0_32, %40, %c1_33, %c0_34] : memref<1x1x18x18x128xbf16, #tpu.memory_space<vmem>>, vector<1x1x16x16x128xbf16>
    %42 = vector.shape_cast %41 : vector<1x1x16x16x128xbf16> to vector<16x16x128xbf16>
    %43 = vector.shape_cast %42 : vector<16x16x128xbf16> to vector<256x128xbf16>
    %c4 = arith.constant 4 : index
    %c0_35 = arith.constant 0 : index
    %c0_36 = arith.constant 0 : index
    %44 = vector.load %arg3[%c4, %c0_35, %c0_36] : memref<9x128x128xbf16, #tpu.memory_space<vmem>>, vector<1x128x128xbf16>
    %45 = vector.shape_cast %44 : vector<1x128x128xbf16> to vector<128x128xbf16>
    %cst_37 = arith.constant dense<0.000000e+00> : vector<256x128xf32>
    %46 = tpu.matmul %43, %45, %cst_37 {dimension_numbers = #tpu.dot_dimension_numbers<[1], [0], [0], [1], [0, 0, 1, 1], [], []>} : vector<256x128xbf16>, vector<128x128xbf16>, vector<256x128xf32> -> vector<256x128xf32>
    %47 = arith.addf %38, %46 : vector<256x128xf32>
    %c1_i32_38 = arith.constant 1 : i32
    %48 = arith.addi %1, %c1_i32_38 : i32
    %c0_39 = arith.constant 0 : index
    %c0_40 = arith.constant 0 : index
    %49 = arith.index_cast %48 : i32 to index
    %c2_41 = arith.constant 2 : index
    %c0_42 = arith.constant 0 : index
    %50 = vector.load %arg2[%c0_39, %c0_40, %49, %c2_41, %c0_42] : memref<1x1x18x18x128xbf16, #tpu.memory_space<vmem>>, vector<1x1x16x16x128xbf16>
    %51 = vector.shape_cast %50 : vector<1x1x16x16x128xbf16> to vector<16x16x128xbf16>
    %52 = vector.shape_cast %51 : vector<16x16x128xbf16> to vector<256x128xbf16>
    %c5 = arith.constant 5 : index
    %c0_43 = arith.constant 0 : index
    %c0_44 = arith.constant 0 : index
    %53 = vector.load %arg3[%c5, %c0_43, %c0_44] : memref<9x128x128xbf16, #tpu.memory_space<vmem>>, vector<1x128x128xbf16>
    %54 = vector.shape_cast %53 : vector<1x128x128xbf16> to vector<128x128xbf16>
    %cst_45 = arith.constant dense<0.000000e+00> : vector<256x128xf32>
    %55 = tpu.matmul %52, %54, %cst_45 {dimension_numbers = #tpu.dot_dimension_numbers<[1], [0], [0], [1], [0, 0, 1, 1], [], []>} : vector<256x128xbf16>, vector<128x128xbf16>, vector<256x128xf32> -> vector<256x128xf32>
    %56 = arith.addf %47, %55 : vector<256x128xf32>
    %c2_i32 = arith.constant 2 : i32
    %57 = arith.addi %1, %c2_i32 : i32
    %c0_46 = arith.constant 0 : index
    %c0_47 = arith.constant 0 : index
    %58 = arith.index_cast %57 : i32 to index
    %c0_48 = arith.constant 0 : index
    %c0_49 = arith.constant 0 : index
    %59 = vector.load %arg2[%c0_46, %c0_47, %58, %c0_48, %c0_49] : memref<1x1x18x18x128xbf16, #tpu.memory_space<vmem>>, vector<1x1x16x16x128xbf16>
    %60 = vector.shape_cast %59 : vector<1x1x16x16x128xbf16> to vector<16x16x128xbf16>
    %61 = vector.shape_cast %60 : vector<16x16x128xbf16> to vector<256x128xbf16>
    %c6 = arith.constant 6 : index
    %c0_50 = arith.constant 0 : index
    %c0_51 = arith.constant 0 : index
    %62 = vector.load %arg3[%c6, %c0_50, %c0_51] : memref<9x128x128xbf16, #tpu.memory_space<vmem>>, vector<1x128x128xbf16>
    %63 = vector.shape_cast %62 : vector<1x128x128xbf16> to vector<128x128xbf16>
    %cst_52 = arith.constant dense<0.000000e+00> : vector<256x128xf32>
    %64 = tpu.matmul %61, %63, %cst_52 {dimension_numbers = #tpu.dot_dimension_numbers<[1], [0], [0], [1], [0, 0, 1, 1], [], []>} : vector<256x128xbf16>, vector<128x128xbf16>, vector<256x128xf32> -> vector<256x128xf32>
    %65 = arith.addf %56, %64 : vector<256x128xf32>
    %c2_i32_53 = arith.constant 2 : i32
    %66 = arith.addi %1, %c2_i32_53 : i32
    %c0_54 = arith.constant 0 : index
    %c0_55 = arith.constant 0 : index
    %67 = arith.index_cast %66 : i32 to index
    %c1_56 = arith.constant 1 : index
    %c0_57 = arith.constant 0 : index
    %68 = vector.load %arg2[%c0_54, %c0_55, %67, %c1_56, %c0_57] : memref<1x1x18x18x128xbf16, #tpu.memory_space<vmem>>, vector<1x1x16x16x128xbf16>
    %69 = vector.shape_cast %68 : vector<1x1x16x16x128xbf16> to vector<16x16x128xbf16>
    %70 = vector.shape_cast %69 : vector<16x16x128xbf16> to vector<256x128xbf16>
    %c7 = arith.constant 7 : index
    %c0_58 = arith.constant 0 : index
    %c0_59 = arith.constant 0 : index
    %71 = vector.load %arg3[%c7, %c0_58, %c0_59] : memref<9x128x128xbf16, #tpu.memory_space<vmem>>, vector<1x128x128xbf16>
    %72 = vector.shape_cast %71 : vector<1x128x128xbf16> to vector<128x128xbf16>
    %cst_60 = arith.constant dense<0.000000e+00> : vector<256x128xf32>
    %73 = tpu.matmul %70, %72, %cst_60 {dimension_numbers = #tpu.dot_dimension_numbers<[1], [0], [0], [1], [0, 0, 1, 1], [], []>} : vector<256x128xbf16>, vector<128x128xbf16>, vector<256x128xf32> -> vector<256x128xf32>
    %74 = arith.addf %65, %73 : vector<256x128xf32>
    %c2_i32_61 = arith.constant 2 : i32
    %75 = arith.addi %1, %c2_i32_61 : i32
    %c0_62 = arith.constant 0 : index
    %c0_63 = arith.constant 0 : index
    %76 = arith.index_cast %75 : i32 to index
    %c2_64 = arith.constant 2 : index
    %c0_65 = arith.constant 0 : index
    %77 = vector.load %arg2[%c0_62, %c0_63, %76, %c2_64, %c0_65] : memref<1x1x18x18x128xbf16, #tpu.memory_space<vmem>>, vector<1x1x16x16x128xbf16>
    %78 = vector.shape_cast %77 : vector<1x1x16x16x128xbf16> to vector<16x16x128xbf16>
    %79 = vector.shape_cast %78 : vector<16x16x128xbf16> to vector<256x128xbf16>
    %c8 = arith.constant 8 : index
    %c0_66 = arith.constant 0 : index
    %c0_67 = arith.constant 0 : index
    %80 = vector.load %arg3[%c8, %c0_66, %c0_67] : memref<9x128x128xbf16, #tpu.memory_space<vmem>>, vector<1x128x128xbf16>
    %81 = vector.shape_cast %80 : vector<1x128x128xbf16> to vector<128x128xbf16>
    %cst_68 = arith.constant dense<0.000000e+00> : vector<256x128xf32>
    %82 = tpu.matmul %79, %81, %cst_68 {dimension_numbers = #tpu.dot_dimension_numbers<[1], [0], [0], [1], [0, 0, 1, 1], [], []>} : vector<256x128xbf16>, vector<128x128xbf16>, vector<256x128xf32> -> vector<256x128xf32>
    %83 = arith.addf %74, %82 : vector<256x128xf32>
    %c0_69 = arith.constant 0 : index
    %c0_70 = arith.constant 0 : index
    %84 = vector.load %arg4[%c0_69, %c0_70] : memref<1x128xf32, #tpu.memory_space<vmem>>, vector<1x128xf32>
    %85 = vector.broadcast %84 : vector<1x128xf32> to vector<256x128xf32>
    %86 = arith.mulf %83, %85 : vector<256x128xf32>
    %c0_71 = arith.constant 0 : index
    %c0_72 = arith.constant 0 : index
    %87 = vector.load %arg5[%c0_71, %c0_72] : memref<1x128xf32, #tpu.memory_space<vmem>>, vector<1x128xf32>
    %88 = vector.broadcast %87 : vector<1x128xf32> to vector<256x128xf32>
    %89 = arith.addf %86, %88 : vector<256x128xf32>
    %cst_73 = arith.constant 0.000000e+00 : f32
    %90 = vector.broadcast %cst_73 : f32 to vector<256x128xf32>
    %91 = arith.maximumf %89, %90 : vector<256x128xf32>
    %92 = vector.shape_cast %91 : vector<256x128xf32> to vector<1x16x16x128xf32>
    %93 = arith.truncf %92 : vector<1x16x16x128xf32> to vector<1x16x16x128xbf16>
    %c0_74 = arith.constant 0 : index
    %c0_75 = arith.constant 0 : index
    %c0_76 = arith.constant 0 : index
    %c0_77 = arith.constant 0 : index
    %94 = vector.load %arg6[%c0_74, %c0_75, %c0_76, %c0_77] : memref<1x16x16x128xbf16, #tpu.memory_space<vmem>>, vector<1x16x16x128xbf16>
    tpu.vector_store %arg6[%c0_74, %c0_75, %c0_76, %c0_77], %93 {strides = array<i32>} : memref<1x16x16x128xbf16, #tpu.memory_space<vmem>>, vector<1x16x16x128xbf16>,
    return
  }
  func.func @transform_0(%arg0: i32, %arg1: i32) -> (i32, i32, i32, i32, i32) {
    %c0_i32 = arith.constant 0 : i32
    %c0_i32_0 = arith.constant 0 : i32
    %c0_i32_1 = arith.constant 0 : i32
    %c0_i32_2 = arith.constant 0 : i32
    %c0_i32_3 = arith.constant 0 : i32
    return %arg0, %c0_i32, %c0_i32_0, %c0_i32_1, %c0_i32_2 : i32, i32, i32, i32, i32
  }
  func.func @transform_1(%arg0: i32, %arg1: i32) -> (i32, i32, i32) {
    %c0_i32 = arith.constant 0 : i32
    %c0_i32_0 = arith.constant 0 : i32
    %c0_i32_1 = arith.constant 0 : i32
    %c0_i32_2 = arith.constant 0 : i32
    return %c0_i32, %c0_i32_0, %c0_i32_1 : i32, i32, i32
  }
  func.func @transform_2(%arg0: i32, %arg1: i32) -> (i32, i32) {
    %c0_i32 = arith.constant 0 : i32
    %c0_i32_0 = arith.constant 0 : i32
    %c0_i32_1 = arith.constant 0 : i32
    return %c0_i32, %c0_i32_0 : i32, i32
  }
  func.func @transform_3(%arg0: i32, %arg1: i32) -> (i32, i32) {
    %c0_i32 = arith.constant 0 : i32
    %c0_i32_0 = arith.constant 0 : i32
    %c0_i32_1 = arith.constant 0 : i32
    return %c0_i32, %c0_i32_0 : i32, i32
  }
  func.func @transform_4(%arg0: i32, %arg1: i32) -> (i32, i32, i32, i32) {
    %c0_i32 = arith.constant 0 : i32
    %c0_i32_0 = arith.constant 0 : i32
    %c0_i32_1 = arith.constant 0 : i32
    return %arg0, %arg1, %c0_i32, %c0_i32_0 : i32, i32, i32, i32
  }
}

module attributes {stable_mosaic.version = 11 : i64} {
  func.func @_mm_bn_proj_add_kernel(%arg0: i32, %arg1: memref<512x128xbf16, #tpu.memory_space<vmem>>, %arg2: memref<512x128xbf16, #tpu.memory_space<vmem>>, %arg3: memref<128x128xbf16, #tpu.memory_space<vmem>>, %arg4: memref<1x128xf32, #tpu.memory_space<vmem>>, %arg5: memref<1x128xf32, #tpu.memory_space<vmem>>, %arg6: memref<128x128xbf16, #tpu.memory_space<vmem>>, %arg7: memref<1x128xf32, #tpu.memory_space<vmem>>, %arg8: memref<1x128xf32, #tpu.memory_space<vmem>>, %arg9: memref<512x128xf32, #tpu.memory_space<vmem>>) attributes {dimension_semantics = [#tpu.dimension_semantics<parallel>], iteration_bounds = array<i64: 1>, scalar_prefetch = 0 : i64, scratch_operands = 0 : i64, tpu.core_type = #tpu.core_type<tc>, window_params = [{transform_indices = @transform_0, window_bounds = array<i64: 512, 128>}, {transform_indices = @transform_1, window_bounds = array<i64: 512, 128>}, {pipeline_mode = #tpu.pipeline_mode<synchronous>, transform_indices = @transform_2, window_bounds = array<i64: 128, 128>}, {pipeline_mode = #tpu.pipeline_mode<synchronous>, transform_indices = @transform_3, window_bounds = array<i64: 1, 128>}, {pipeline_mode = #tpu.pipeline_mode<synchronous>, transform_indices = @transform_4, window_bounds = array<i64: 1, 128>}, {pipeline_mode = #tpu.pipeline_mode<synchronous>, transform_indices = @transform_5, window_bounds = array<i64: 128, 128>}, {pipeline_mode = #tpu.pipeline_mode<synchronous>, transform_indices = @transform_6, window_bounds = array<i64: 1, 128>}, {pipeline_mode = #tpu.pipeline_mode<synchronous>, transform_indices = @transform_7, window_bounds = array<i64: 1, 128>}, {transform_indices = @transform_8, window_bounds = array<i64: 512, 128>}]} {
    %c0 = arith.constant 0 : index
    %c0_0 = arith.constant 0 : index
    %0 = vector.load %arg1[%c0, %c0_0] : memref<512x128xbf16, #tpu.memory_space<vmem>>, vector<512x128xbf16>
    %c0_1 = arith.constant 0 : index
    %c0_2 = arith.constant 0 : index
    %1 = vector.load %arg3[%c0_1, %c0_2] : memref<128x128xbf16, #tpu.memory_space<vmem>>, vector<128x128xbf16>
    %cst = arith.constant dense<0.000000e+00> : vector<512x128xf32>
    %2 = tpu.matmul %0, %1, %cst {dimension_numbers = #tpu.dot_dimension_numbers<[1], [0], [0], [1], [0, 0, 1, 1], [], []>} : vector<512x128xbf16>, vector<128x128xbf16>, vector<512x128xf32> -> vector<512x128xf32>
    %c0_3 = arith.constant 0 : index
    %c0_4 = arith.constant 0 : index
    %3 = vector.load %arg4[%c0_3, %c0_4] : memref<1x128xf32, #tpu.memory_space<vmem>>, vector<1x128xf32>
    %4 = vector.broadcast %3 : vector<1x128xf32> to vector<512x128xf32>
    %5 = arith.mulf %2, %4 : vector<512x128xf32>
    %c0_5 = arith.constant 0 : index
    %c0_6 = arith.constant 0 : index
    %6 = vector.load %arg5[%c0_5, %c0_6] : memref<1x128xf32, #tpu.memory_space<vmem>>, vector<1x128xf32>
    %7 = vector.broadcast %6 : vector<1x128xf32> to vector<512x128xf32>
    %8 = arith.addf %5, %7 : vector<512x128xf32>
    %c0_7 = arith.constant 0 : index
    %c0_8 = arith.constant 0 : index
    %9 = vector.load %arg2[%c0_7, %c0_8] : memref<512x128xbf16, #tpu.memory_space<vmem>>, vector<512x128xbf16>
    %c0_9 = arith.constant 0 : index
    %c0_10 = arith.constant 0 : index
    %10 = vector.load %arg6[%c0_9, %c0_10] : memref<128x128xbf16, #tpu.memory_space<vmem>>, vector<128x128xbf16>
    %cst_11 = arith.constant dense<0.000000e+00> : vector<512x128xf32>
    %11 = tpu.matmul %9, %10, %cst_11 {dimension_numbers = #tpu.dot_dimension_numbers<[1], [0], [0], [1], [0, 0, 1, 1], [], []>} : vector<512x128xbf16>, vector<128x128xbf16>, vector<512x128xf32> -> vector<512x128xf32>
    %c0_12 = arith.constant 0 : index
    %c0_13 = arith.constant 0 : index
    %12 = vector.load %arg7[%c0_12, %c0_13] : memref<1x128xf32, #tpu.memory_space<vmem>>, vector<1x128xf32>
    %13 = vector.broadcast %12 : vector<1x128xf32> to vector<512x128xf32>
    %14 = arith.mulf %11, %13 : vector<512x128xf32>
    %15 = arith.addf %8, %14 : vector<512x128xf32>
    %c0_14 = arith.constant 0 : index
    %c0_15 = arith.constant 0 : index
    %16 = vector.load %arg8[%c0_14, %c0_15] : memref<1x128xf32, #tpu.memory_space<vmem>>, vector<1x128xf32>
    %17 = vector.broadcast %16 : vector<1x128xf32> to vector<512x128xf32>
    %18 = arith.addf %15, %17 : vector<512x128xf32>
    %c0_16 = arith.constant 0 : index
    %c0_17 = arith.constant 0 : index
    %19 = vector.load %arg9[%c0_16, %c0_17] : memref<512x128xf32, #tpu.memory_space<vmem>>, vector<512x128xf32>
    tpu.vector_store %arg9[%c0_16, %c0_17], %18 {strides = array<i32>} : memref<512x128xf32, #tpu.memory_space<vmem>>, vector<512x128xf32>,
    return
  }
  func.func @transform_0(%arg0: i32) -> (i32, i32) {
    %c0_i32 = arith.constant 0 : i32
    %c0_i32_0 = arith.constant 0 : i32
    return %arg0, %c0_i32 : i32, i32
  }
  func.func @transform_1(%arg0: i32) -> (i32, i32) {
    %c0_i32 = arith.constant 0 : i32
    %c0_i32_0 = arith.constant 0 : i32
    return %arg0, %c0_i32 : i32, i32
  }
  func.func @transform_2(%arg0: i32) -> (i32, i32) {
    %c0_i32 = arith.constant 0 : i32
    %c0_i32_0 = arith.constant 0 : i32
    %c0_i32_1 = arith.constant 0 : i32
    return %c0_i32, %c0_i32_0 : i32, i32
  }
  func.func @transform_3(%arg0: i32) -> (i32, i32) {
    %c0_i32 = arith.constant 0 : i32
    %c0_i32_0 = arith.constant 0 : i32
    %c0_i32_1 = arith.constant 0 : i32
    return %c0_i32, %c0_i32_0 : i32, i32
  }
  func.func @transform_4(%arg0: i32) -> (i32, i32) {
    %c0_i32 = arith.constant 0 : i32
    %c0_i32_0 = arith.constant 0 : i32
    %c0_i32_1 = arith.constant 0 : i32
    return %c0_i32, %c0_i32_0 : i32, i32
  }
  func.func @transform_5(%arg0: i32) -> (i32, i32) {
    %c0_i32 = arith.constant 0 : i32
    %c0_i32_0 = arith.constant 0 : i32
    %c0_i32_1 = arith.constant 0 : i32
    return %c0_i32, %c0_i32_0 : i32, i32
  }
  func.func @transform_6(%arg0: i32) -> (i32, i32) {
    %c0_i32 = arith.constant 0 : i32
    %c0_i32_0 = arith.constant 0 : i32
    %c0_i32_1 = arith.constant 0 : i32
    return %c0_i32, %c0_i32_0 : i32, i32
  }
  func.func @transform_7(%arg0: i32) -> (i32, i32) {
    %c0_i32 = arith.constant 0 : i32
    %c0_i32_0 = arith.constant 0 : i32
    %c0_i32_1 = arith.constant 0 : i32
    return %c0_i32, %c0_i32_0 : i32, i32
  }
  func.func @transform_8(%arg0: i32) -> (i32, i32) {
    %c0_i32 = arith.constant 0 : i32
    %c0_i32_0 = arith.constant 0 : i32
    return %arg0, %c0_i32 : i32, i32
  }
}

</mosaic_0001>

<bundles_post_ra>
// kernel: residual_bottleneck_forward.3
= control target key start
LH: loop header
LB: loop body
LE: loop exit
PB: predicated region body
PF: predicated region fallthrough
CT: control target
= control target key end

     0   :  { %s2073_s1 = inlined_call_operand.vmem [shape: bf16[128,128], index: 1, kind: input, shape index: {}]   ;;  %s2074_s0 = inlined_call_operand.vmem [shape: bf16[512,128], index: 0, kind: input, shape index: {}]   ;;  %s2075_s2 = inlined_call_operand.vmem [shape: f32[1,128], index: 2, kind: input, shape index: {}]   ;;  %s2076_s3 = inlined_call_operand.vmem [shape: f32[1,128], index: 3, kind: input, shape index: {}]   ;;  %s2077_s4 = inlined_call_operand.vmem [shape: bf16[512,128], index: 4, kind: output, shape index: {}]  }
   0x1   :  { %v1654_v0 = vld [vmem:[%s2073_s1 + $0x38] sm:$0xff]   ;;  %v1655_v1 = vld [vmem:[%s2073_s1 + $0x30] sm:$0xff]   ;;  %v1656_v2 = vld [vmem:[%s2073_s1 + $0x28] sm:$0xff]  }
   0x2   :  { %1558 = vmatprep.subr.bf16.mxu0 %v1654_v0  ;;  %1638 = vmatprep.subr.bf16.mxu1 %v1654_v0  ;;  %v1657_v3 = vld [vmem:[%s2073_s1 + $0x20] sm:$0xff]   ;;  %v1658_v6 = vld [vmem:[%s2073_s1 + $0x18] sm:$0xff]   ;;  %v1659_v7 = vld [vmem:[%s2073_s1 + $0x10] sm:$0xff]  }
   0x3   :  { %1559 = vmatpush3.bf16.msra.mxu0 %v1654_v0  ;;  %1646 = vmatpush3.bf16.msra.mxu1 %v1654_v0  ;;  %v1662_v4 = vld [vmem:[%s2074_s0] sm:$0xff]   ;;  %v1660_v8 = vld [vmem:[%s2073_s1 + $0x8] sm:$0xff]   ;;  %v1666_v12 = vld [vmem:[%s2074_s0 + $0x10] sm:$0xff]  }
   0x4   :  { %1560 = vmatprep.subr.bf16.mxu0 %v1655_v1  ;;  %1639 = vmatprep.subr.bf16.mxu1 %v1655_v1  ;;  %v1663_v5 = vld [vmem:[%s2074_s0 + $0x80] sm:$0xff]   ;;  %v1664_v10 = vld [vmem:[%s2074_s0 + $0x8] sm:$0xff]   ;;  %v1667_v13 = vld [vmem:[%s2074_s0 + $0x90] sm:$0xff]  }
   0x5   :  { %1574 = vmatprep.mubr.bf16.mxu0 %v1662_v4  ;;  %1606 = vmatprep.mubr.bf16.mxu1 %v1663_v5  ;;  %v1661_v9 = vld [vmem:[%s2073_s1] sm:$0xff]   ;;  %v1665_v11 = vld [vmem:[%s2074_s0 + $0x88] sm:$0xff]   ;;  %v1668_v14 = vld [vmem:[%s2074_s0 + $0x18] sm:$0xff]  }
   0x6   :  { %v1669_v15 = vld [vmem:[%s2074_s0 + $0x98] sm:$0xff]   ;;  %v1670_v16 = vld [vmem:[%s2074_s0 + $0x20] sm:$0xff]   ;;  %v1672_v18 = vld [vmem:[%s2074_s0 + $0x28] sm:$0xff]  }
   0x7   :  { %1561 = vmatpush3.bf16.msra.mxu0 %v1655_v1  ;;  %1647 = vmatpush3.bf16.msra.mxu1 %v1655_v1  ;;  %v1671_v17 = vld [vmem:[%s2074_s0 + $0xa0] sm:$0xff]   ;;  %v1673_v19 = vld [vmem:[%s2074_s0 + $0xa8] sm:$0xff]   ;;  %v1674_v20 = vld [vmem:[%s2074_s0 + $0x30] sm:$0xff]  }
   0x8   :  { %1562 = vmatprep.subr.bf16.mxu0 %v1656_v2  ;;  %1640 = vmatprep.subr.bf16.mxu1 %v1656_v2  ;;  %v1675_v21 = vld [vmem:[%s2074_s0 + $0xb0] sm:$0xff]   ;;  %v1676_v22 = vld [vmem:[%s2074_s0 + $0x38] sm:$0xff]   ;;  %v1678_v24 = vld [vmem:[%s2074_s0 + $0x40] sm:$0xff]  }
   0x9   :  { %v1677_v23 = vld [vmem:[%s2074_s0 + $0xb8] sm:$0xff]   ;;  %v1679_v25 = vld [vmem:[%s2074_s0 + $0xc0] sm:$0xff]   ;;  %v1680_v26 = vld [vmem:[%s2074_s0 + $0x48] sm:$0xff]  }
   0xa   :  { %v1681_v27 = vld [vmem:[%s2074_s0 + $0xc8] sm:$0xff]   ;;  %v1682_v28 = vld [vmem:[%s2074_s0 + $0x50] sm:$0xff]   ;;  %v1684_v30 = vld [vmem:[%s2074_s0 + $0x58] sm:$0xff]  }
   0xb   :  { %1563 = vmatpush3.bf16.msra.mxu0 %v1656_v2  ;;  %1648 = vmatpush3.bf16.msra.mxu1 %v1656_v2  ;;  %v1683_v29 = vld [vmem:[%s2074_s0 + $0xd0] sm:$0xff]   ;;  %v1685_v31 = vld [vmem:[%s2074_s0 + $0xd8] sm:$0xff]   ;;  %v1686_v32 = vld [vmem:[%s2074_s0 + $0x60] sm:$0xff]  }
   0xc   :  { %1564 = vmatprep.subr.bf16.mxu0 %v1657_v3  ;;  %1641 = vmatprep.subr.bf16.mxu1 %v1657_v3  ;;  %v1687_v33 = vld [vmem:[%s2074_s0 + $0xe0] sm:$0xff]   ;;  %v1688_v34 = vld [vmem:[%s2074_s0 + $0x68] sm:$0xff]   ;;  %v1690_v36 = vld [vmem:[%s2074_s0 + $0x70] sm:$0xff]  }
   0xd   :  { %v1689_v35 = vld [vmem:[%s2074_s0 + $0xe8] sm:$0xff]   ;;  %v1691_v37 = vld [vmem:[%s2074_s0 + $0xf0] sm:$0xff]   ;;  %v1692_v38 = vld [vmem:[%s2074_s0 + $0x78] sm:$0xff]  }
   0xe   :  { %v1693_v39 = vld [vmem:[%s2074_s0 + $0xf8] sm:$0xff]   ;;  %v1842_v40 = vld [vmem:[%s2075_s2] ss:$0 sm:$0xff] }
   0xf   :  { %1565 = vmatpush3.bf16.msra.mxu0 %v1657_v3  ;;  %1649 = vmatpush3.bf16.msra.mxu1 %v1657_v3  ;;  %v1849_v45 = vld [vmem:[%s2076_s3] ss:$0 sm:$0xff] }
  0x10   :  { %1566 = vmatprep.subr.bf16.mxu0 %v1658_v6  ;;  %1642 = vmatprep.subr.bf16.mxu1 %v1658_v6 }
  0x13   :  { %1567 = vmatpush3.bf16.msra.mxu0 %v1658_v6  ;;  %1650 = vmatpush3.bf16.msra.mxu1 %v1658_v6 }
  0x14   :  { %1568 = vmatprep.subr.bf16.mxu0 %v1659_v7  ;;  %1643 = vmatprep.subr.bf16.mxu1 %v1659_v7 }
  0x17   :  { %1569 = vmatpush3.bf16.msra.mxu0 %v1659_v7  ;;  %1651 = vmatpush3.bf16.msra.mxu1 %v1659_v7 }
  0x18   :  { %1570 = vmatprep.subr.bf16.mxu0 %v1660_v8  ;;  %1644 = vmatprep.subr.bf16.mxu1 %v1660_v8 }
  0x1b   :  { %1571 = vmatpush3.bf16.msra.mxu0 %v1660_v8  ;;  %1652 = vmatpush3.bf16.msra.mxu1 %v1660_v8 }
  0x1c   :  { %1572 = vmatprep.subr.bf16.mxu0 %v1661_v9  ;;  %1645 = vmatprep.subr.bf16.mxu1 %v1661_v9 }
  0x1f   :  { %1573 = vmatpush3.bf16.msra.mxu0 %v1661_v9  ;;  %1653 = vmatpush3.bf16.msra.mxu1 %v1661_v9 }
  0x22   :  { %1575 = vmatmul.mubr.bf16.vlgmr.msra.gmra.mxu0 %v1664_v10  ;;  %1607 = vmatmul.mubr.bf16.vlgmr.msra.gmra.mxu1 %v1665_v11 }
  0x23   :  { %1578 = vmatprep.mubr.bf16.mxu0 %v1666_v12  ;;  %1610 = vmatprep.mubr.bf16.mxu1 %v1667_v13 }
  0x2a   :  { %1579 = vmatmul.mubr.bf16.gmra.mxu0 %v1668_v14  ;;  %1611 = vmatmul.mubr.bf16.gmra.mxu1 %v1669_v15 }
  0x2b   :  { %1582 = vmatprep.mubr.bf16.mxu0 %v1670_v16  ;;  %1614 = vmatprep.mubr.bf16.mxu1 %v1671_v17 }
  0x32   :  { %1583 = vmatmul.mubr.bf16.gmra.mxu0 %v1672_v18  ;;  %1615 = vmatmul.mubr.bf16.gmra.mxu1 %v1673_v19 }
  0x33   :  { %1586 = vmatprep.mubr.bf16.mxu0 %v1674_v20  ;;  %1618 = vmatprep.mubr.bf16.mxu1 %v1675_v21 }
  0x3a   :  { %1587 = vmatmul.mubr.bf16.gmra.mxu0 %v1676_v22  ;;  %1619 = vmatmul.mubr.bf16.gmra.mxu1 %v1677_v23 }
  0x3b   :  { %1590 = vmatprep.mubr.bf16.mxu0 %v1678_v24  ;;  %1622 = vmatprep.mubr.bf16.mxu1 %v1679_v25 }
  0x42   :  { %1591 = vmatmul.mubr.bf16.gmra.mxu0 %v1680_v26  ;;  %1623 = vmatmul.mubr.bf16.gmra.mxu1 %v1681_v27 }
  0x43   :  { %1594 = vmatprep.mubr.bf16.mxu0 %v1682_v28  ;;  %1626 = vmatprep.mubr.bf16.mxu1 %v1683_v29 }
  0x4a   :  { %1595 = vmatmul.mubr.bf16.gmra.mxu0 %v1684_v30  ;;  %1627 = vmatmul.mubr.bf16.gmra.mxu1 %v1685_v31 }
  0x4b   :  { %1598 = vmatprep.mubr.bf16.mxu0 %v1686_v32  ;;  %1630 = vmatprep.mubr.bf16.mxu1 %v1687_v33 }
  0x52   :  { %1599 = vmatmul.mubr.bf16.gmra.mxu0 %v1688_v34  ;;  %1631 = vmatmul.mubr.bf16.gmra.mxu1 %v1689_v35 }
  0x53   :  { %1602 = vmatprep.mubr.bf16.mxu0 %v1690_v36  ;;  %1634 = vmatprep.mubr.bf16.mxu1 %v1691_v37 }
  0x5a   :  { %1603 = vmatmul.mubr.bf16.gmra.mxu0 %v1692_v38  ;;  %1635 = vmatmul.mubr.bf16.gmra.mxu1 %v1693_v39 }
  0xe2   :  { %v1576_v41 = vpop.f32.mrf.mxu0  ;;  %v1608_v42 = vpop.f32.mrf.mxu1 }
  0xe3   :  { %v636_v43 = vmul.f32 %v1576_v41, %v1842_v40  ;;  %v668_v44 = vmul.f32 %v1608_v42, %v1842_v40 }
  0xe4   :  { %v372_v46 = vpop.f32.mrf.mxu0  ;;  %v500_v47 = vpop.f32.mrf.mxu1 }
  0xe5   :  { %v634_v48 = vmul.f32 %v1842_v40, %v372_v46  ;;  %v666_v49 = vmul.f32 %v1842_v40, %v500_v47  ;;  %v707_v52 = vadd.f32 %v1849_v45, %v636_v43  ;;  %v739_v53 = vadd.f32 %v1849_v45, %v668_v44 }
  0xe6   :  { %v1577_v50 = vpop.f32.mrf.mxu0  ;;  %v1609_v51 = vpop.f32.mrf.mxu1 }
  0xe7   :  { %v637_v54 = vmul.f32 %v1577_v50, %v1842_v40  ;;  %v669_v55 = vmul.f32 %v1609_v51, %v1842_v40  ;;  %v705_v58 = vadd.f32 %v1849_v45, %v634_v48  ;;  %v737_v59 = vadd.f32 %v1849_v45, %v666_v49 }
  0xe8   :  { %v375_v56 = vpop.f32.mrf.mxu0  ;;  %v503_v57 = vpop.f32.mrf.mxu1  ;;  %v771_v2 = vmax.f32 %v707_v52, 0.0  ;;  %v803_v3 = vmax.f32 %v739_v53, 0.0 }
  0xe9   :  { %v635_v60 = vmul.f32 %v1842_v40, %v375_v56  ;;  %v667_v61 = vmul.f32 %v1842_v40, %v503_v57  ;;  %v708_v62 = vadd.f32 %v1849_v45, %v637_v54  ;;  %v740_v63 = vadd.f32 %v1849_v45, %v669_v55 }
  0xea   :  { %v1580_v0 = vpop.f32.mrf.mxu0  ;;  %v1612_v1 = vpop.f32.mrf.mxu1  ;;  %v769_v12 = vmax.f32 %v705_v58, 0.0  ;;  %v801_v13 = vmax.f32 %v737_v59, 0.0 }
  0xeb   :  { %v706_v4 = vadd.f32 %v1849_v45, %v635_v60  ;;  %v738_v5 = vadd.f32 %v1849_v45, %v667_v61  ;;  %v772_v6 = vmax.f32 %v708_v62, 0.0  ;;  %v804_v7 = vmax.f32 %v740_v63, 0.0 }
  0xec   :  { %v640_v8 = vmul.f32 %v1580_v0, %v1842_v40  ;;  %v672_v9 = vmul.f32 %v1612_v1, %v1842_v40  ;;  %v388_v10 = vpop.f32.mrf.mxu0  ;;  %v516_v11 = vpop.f32.mrf.mxu1 }
  0xed   :  { %v770_v14 = vmax.f32 %v706_v4, 0.0  ;;  %v802_v15 = vmax.f32 %v738_v5, 0.0  ;;  %v1335_v16 = vpack.c.bf16 %v772_v6, %v771_v2  ;;  %v1415_v17 = vpack.c.bf16 %v804_v7, %v803_v3 }
  0xee   :  { %v638_v18 = vmul.f32 %v1842_v40, %v388_v10  ;;  %v670_v19 = vmul.f32 %v1842_v40, %v516_v11  ;;  %v1581_v20 = vpop.f32.mrf.mxu0  ;;  %v1613_v21 = vpop.f32.mrf.mxu1  ;;  %v711_v24 = vadd.f32 %v1849_v45, %v640_v8  ;;  %v743_v25 = vadd.f32 %v1849_v45, %v672_v9 }
  0xef   :  { %v1330_v22 = vpack.c.bf16 %v770_v14, %v769_v12  ;;  %v1410_v23 = vpack.c.bf16 %v802_v15, %v801_v13  ;;  %1487 = vst [vmem:[%s2077_s4 + $0x8] sm:$0xff] %v1335_v16   ;;  %1503 = vst [vmem:[%s2077_s4 + $0x88] sm:$0xff] %v1415_v17   ;;  %v641_v26 = vmul.f32 %v1581_v20, %v1842_v40 }
  0xf0   :  { %v673_v27 = vmul.f32 %v1613_v21, %v1842_v40  ;;  %v391_v28 = vpop.f32.mrf.mxu0  ;;  %v519_v29 = vpop.f32.mrf.mxu1  ;;  %v709_v30 = vadd.f32 %v1849_v45, %v638_v18  ;;  %v741_v31 = vadd.f32 %v1849_v45, %v670_v19  ;;  %v775_v43 = vmax.f32 %v711_v24, 0.0 }
  0xf1   :  { %1331 = vst [vmem:[%s2077_s4] sm:$0xff] %v1330_v22   ;;  %1502 = vst [vmem:[%s2077_s4 + $0x80] sm:$0xff] %v1410_v23   ;;  %v639_v32 = vmul.f32 %v1842_v40, %v391_v28  ;;  %v671_v33 = vmul.f32 %v1842_v40, %v519_v29  ;;  %v712_v34 = vadd.f32 %v1849_v45, %v641_v26  ;;  %v807_v44 = vmax.f32 %v743_v25, 0.0 }
  0xf2   :  { %v744_v35 = vadd.f32 %v1849_v45, %v673_v27  ;;  %v1584_v36 = vpop.f32.mrf.mxu0  ;;  %v1616_v37 = vpop.f32.mrf.mxu1  ;;  %v773_v50 = vmax.f32 %v709_v30, 0.0  ;;  %v805_v51 = vmax.f32 %v741_v31, 0.0 }
  0xf3   :  { %v710_v38 = vadd.f32 %v1849_v45, %v639_v32  ;;  %v742_v39 = vadd.f32 %v1849_v45, %v671_v33  ;;  %v644_v41 = vmul.f32 %v1584_v36, %v1842_v40  ;;  %v676_v42 = vmul.f32 %v1616_v37, %v1842_v40 }
  0xf4   :  { %v776_v46 = vmax.f32 %v712_v34, 0.0  ;;  %v808_v47 = vmax.f32 %v744_v35, 0.0  ;;  %v404_v48 = vpop.f32.mrf.mxu0  ;;  %v532_v49 = vpop.f32.mrf.mxu1 }
  0xf5   :  { %v774_v52 = vmax.f32 %v710_v38, 0.0  ;;  %v806_v53 = vmax.f32 %v742_v39, 0.0  ;;  %v642_v56 = vmul.f32 %v1842_v40, %v404_v48  ;;  %v674_v57 = vmul.f32 %v1842_v40, %v532_v49 }
  0xf6   :  { %v1345_v54 = vpack.c.bf16 %v776_v46, %v775_v43  ;;  %v1425_v55 = vpack.c.bf16 %v808_v47, %v807_v44  ;;  %v1585_v58 = vpop.f32.mrf.mxu0  ;;  %v1617_v59 = vpop.f32.mrf.mxu1  ;;  %v715_v62 = vadd.f32 %v1849_v45, %v644_v41  ;;  %v747_v63 = vadd.f32 %v1849_v45, %v676_v42 }
  0xf7   :  { %v1340_v60 = vpack.c.bf16 %v774_v52, %v773_v50  ;;  %v1420_v61 = vpack.c.bf16 %v806_v53, %v805_v51  ;;  %v645_v0 = vmul.f32 %v1585_v58, %v1842_v40  ;;  %v677_v1 = vmul.f32 %v1617_v59, %v1842_v40 }
  0xf8   :  { %1489 = vst [vmem:[%s2077_s4 + $0x18] sm:$0xff] %v1345_v54   ;;  %1505 = vst [vmem:[%s2077_s4 + $0x98] sm:$0xff] %v1425_v55   ;;  %v407_v2 = vpop.f32.mrf.mxu0  ;;  %v535_v3 = vpop.f32.mrf.mxu1  ;;  %v713_v4 = vadd.f32 %v1849_v45, %v642_v56  ;;  %v745_v5 = vadd.f32 %v1849_v45, %v674_v57  ;;  %v779_v12 = vmax.f32 %v715_v62, 0.0  ;;  %v811_v13 = vmax.f32 %v747_v63, 0.0 }
  0xf9   :  { %1488 = vst [vmem:[%s2077_s4 + $0x10] sm:$0xff] %v1340_v60   ;;  %1504 = vst [vmem:[%s2077_s4 + $0x90] sm:$0xff] %v1420_v61   ;;  %v643_v6 = vmul.f32 %v1842_v40, %v407_v2  ;;  %v675_v7 = vmul.f32 %v1842_v40, %v535_v3  ;;  %v716_v8 = vadd.f32 %v1849_v45, %v645_v0 }
  0xfa   :  { %v748_v9 = vadd.f32 %v1849_v45, %v677_v1  ;;  %v1588_v10 = vpop.f32.mrf.mxu0  ;;  %v1620_v11 = vpop.f32.mrf.mxu1  ;;  %v777_v22 = vmax.f32 %v713_v4, 0.0  ;;  %v809_v23 = vmax.f32 %v745_v5, 0.0 }
  0xfb   :  { %v714_v14 = vadd.f32 %v1849_v45, %v643_v6  ;;  %v746_v15 = vadd.f32 %v1849_v45, %v675_v7  ;;  %v780_v16 = vmax.f32 %v716_v8, 0.0  ;;  %v648_v18 = vmul.f32 %v1588_v10, %v1842_v40 }
  0xfc   :  { %v812_v17 = vmax.f32 %v748_v9, 0.0  ;;  %v680_v19 = vmul.f32 %v1620_v11, %v1842_v40  ;;  %v420_v20 = vpop.f32.mrf.mxu0  ;;  %v548_v21 = vpop.f32.mrf.mxu1 }
  0xfd   :  { %v778_v24 = vmax.f32 %v714_v14, 0.0  ;;  %v810_v25 = vmax.f32 %v746_v15, 0.0  ;;  %v1355_v26 = vpack.c.bf16 %v780_v16, %v779_v12  ;;  %v646_v28 = vmul.f32 %v1842_v40, %v420_v20 }
  0xfe   :  { %v1435_v27 = vpack.c.bf16 %v812_v17, %v811_v13  ;;  %v678_v29 = vmul.f32 %v1842_v40, %v548_v21  ;;  %v1589_v30 = vpop.f32.mrf.mxu0  ;;  %v1621_v31 = vpop.f32.mrf.mxu1  ;;  %v719_v34 = vadd.f32 %v1849_v45, %v648_v18  ;;  %v751_v35 = vadd.f32 %v1849_v45, %v680_v19 }
  0xff   :  { %v1350_v32 = vpack.c.bf16 %v778_v24, %v777_v22  ;;  %v1430_v33 = vpack.c.bf16 %v810_v25, %v809_v23  ;;  %1491 = vst [vmem:[%s2077_s4 + $0x28] sm:$0xff] %v1355_v26   ;;  %v649_v36 = vmul.f32 %v1589_v30, %v1842_v40  ;;  %v681_v37 = vmul.f32 %v1621_v31, %v1842_v40 }
 0x100   :  { %1507 = vst [vmem:[%s2077_s4 + $0xa8] sm:$0xff] %v1435_v27   ;;  %v423_v38 = vpop.f32.mrf.mxu0  ;;  %v551_v39 = vpop.f32.mrf.mxu1  ;;  %v717_v41 = vadd.f32 %v1849_v45, %v646_v28  ;;  %v749_v42 = vadd.f32 %v1849_v45, %v678_v29  ;;  %v783_v54 = vmax.f32 %v719_v34, 0.0  ;;  %v815_v55 = vmax.f32 %v751_v35, 0.0 }
 0x101   :  { %1490 = vst [vmem:[%s2077_s4 + $0x20] sm:$0xff] %v1350_v32   ;;  %1506 = vst [vmem:[%s2077_s4 + $0xa0] sm:$0xff] %v1430_v33   ;;  %v647_v43 = vmul.f32 %v1842_v40, %v423_v38  ;;  %v679_v44 = vmul.f32 %v1842_v40, %v551_v39  ;;  %v720_v46 = vadd.f32 %v1849_v45, %v649_v36 }
 0x102   :  { %v752_v47 = vadd.f32 %v1849_v45, %v681_v37  ;;  %v1592_v48 = vpop.f32.mrf.mxu0  ;;  %v1624_v49 = vpop.f32.mrf.mxu1  ;;  %v781_v60 = vmax.f32 %v717_v41, 0.0  ;;  %v813_v61 = vmax.f32 %v749_v42, 0.0 }
 0x103   :  { %v718_v50 = vadd.f32 %v1849_v45, %v647_v43  ;;  %v750_v51 = vadd.f32 %v1849_v45, %v679_v44  ;;  %v652_v52 = vmul.f32 %v1592_v48, %v1842_v40  ;;  %v684_v53 = vmul.f32 %v1624_v49, %v1842_v40 }
 0x104   :  { %v784_v56 = vmax.f32 %v720_v46, 0.0  ;;  %v816_v57 = vmax.f32 %v752_v47, 0.0  ;;  %v436_v58 = vpop.f32.mrf.mxu0  ;;  %v564_v59 = vpop.f32.mrf.mxu1 }
 0x105   :  { %v782_v62 = vmax.f32 %v718_v50, 0.0  ;;  %v814_v63 = vmax.f32 %v750_v51, 0.0  ;;  %v650_v2 = vmul.f32 %v1842_v40, %v436_v58  ;;  %v682_v3 = vmul.f32 %v1842_v40, %v564_v59 }
 0x106   :  { %v1365_v0 = vpack.c.bf16 %v784_v56, %v783_v54  ;;  %v1445_v1 = vpack.c.bf16 %v816_v57, %v815_v55  ;;  %v1593_v4 = vpop.f32.mrf.mxu0  ;;  %v1625_v5 = vpop.f32.mrf.mxu1  ;;  %v723_v8 = vadd.f32 %v1849_v45, %v652_v52  ;;  %v755_v9 = vadd.f32 %v1849_v45, %v684_v53 }
 0x107   :  { %v1360_v6 = vpack.c.bf16 %v782_v62, %v781_v60  ;;  %v1440_v7 = vpack.c.bf16 %v814_v63, %v813_v61  ;;  %v653_v10 = vmul.f32 %v1593_v4, %v1842_v40  ;;  %v685_v11 = vmul.f32 %v1625_v5, %v1842_v40 }
 0x108   :  { %1493 = vst [vmem:[%s2077_s4 + $0x38] sm:$0xff] %v1365_v0   ;;  %1509 = vst [vmem:[%s2077_s4 + $0xb8] sm:$0xff] %v1445_v1   ;;  %v439_v12 = vpop.f32.mrf.mxu0  ;;  %v567_v13 = vpop.f32.mrf.mxu1  ;;  %v721_v14 = vadd.f32 %v1849_v45, %v650_v2  ;;  %v753_v15 = vadd.f32 %v1849_v45, %v682_v3  ;;  %v787_v22 = vmax.f32 %v723_v8, 0.0  ;;  %v819_v23 = vmax.f32 %v755_v9, 0.0 }
 0x109   :  { %1492 = vst [vmem:[%s2077_s4 + $0x30] sm:$0xff] %v1360_v6   ;;  %1508 = vst [vmem:[%s2077_s4 + $0xb0] sm:$0xff] %v1440_v7   ;;  %v651_v16 = vmul.f32 %v1842_v40, %v439_v12  ;;  %v683_v17 = vmul.f32 %v1842_v40, %v567_v13  ;;  %v724_v18 = vadd.f32 %v1849_v45, %v653_v10 }
 0x10a   :  { %v756_v19 = vadd.f32 %v1849_v45, %v685_v11  ;;  %v1596_v20 = vpop.f32.mrf.mxu0  ;;  %v1628_v21 = vpop.f32.mrf.mxu1  ;;  %v785_v32 = vmax.f32 %v721_v14, 0.0  ;;  %v817_v33 = vmax.f32 %v753_v15, 0.0 }
 0x10b   :  { %v722_v24 = vadd.f32 %v1849_v45, %v651_v16  ;;  %v754_v25 = vadd.f32 %v1849_v45, %v683_v17  ;;  %v788_v26 = vmax.f32 %v724_v18, 0.0  ;;  %v656_v28 = vmul.f32 %v1596_v20, %v1842_v40 }
 0x10c   :  { %v820_v27 = vmax.f32 %v756_v19, 0.0  ;;  %v688_v29 = vmul.f32 %v1628_v21, %v1842_v40  ;;  %v452_v30 = vpop.f32.mrf.mxu0  ;;  %v580_v31 = vpop.f32.mrf.mxu1 }
 0x10d   :  { %v786_v34 = vmax.f32 %v722_v24, 0.0  ;;  %v818_v35 = vmax.f32 %v754_v25, 0.0  ;;  %v1375_v36 = vpack.c.bf16 %v788_v26, %v787_v22  ;;  %v654_v38 = vmul.f32 %v1842_v40, %v452_v30 }
 0x10e   :  { %v1455_v37 = vpack.c.bf16 %v820_v27, %v819_v23  ;;  %v686_v39 = vmul.f32 %v1842_v40, %v580_v31  ;;  %v1597_v41 = vpop.f32.mrf.mxu0  ;;  %v1629_v42 = vpop.f32.mrf.mxu1  ;;  %v727_v46 = vadd.f32 %v1849_v45, %v656_v28  ;;  %v759_v47 = vadd.f32 %v1849_v45, %v688_v29 }
 0x10f   :  { %v1370_v43 = vpack.c.bf16 %v786_v34, %v785_v32  ;;  %v1450_v44 = vpack.c.bf16 %v818_v35, %v817_v33  ;;  %1495 = vst [vmem:[%s2077_s4 + $0x48] sm:$0xff] %v1375_v36   ;;  %v657_v48 = vmul.f32 %v1597_v41, %v1842_v40  ;;  %v689_v49 = vmul.f32 %v1629_v42, %v1842_v40 }
 0x110   :  { %1511 = vst [vmem:[%s2077_s4 + $0xc8] sm:$0xff] %v1455_v37   ;;  %v455_v50 = vpop.f32.mrf.mxu0  ;;  %v583_v51 = vpop.f32.mrf.mxu1  ;;  %v725_v52 = vadd.f32 %v1849_v45, %v654_v38  ;;  %v757_v53 = vadd.f32 %v1849_v45, %v686_v39  ;;  %v791_v0 = vmax.f32 %v727_v46, 0.0  ;;  %v823_v1 = vmax.f32 %v759_v47, 0.0 }
 0x111   :  { %1494 = vst [vmem:[%s2077_s4 + $0x40] sm:$0xff] %v1370_v43   ;;  %1510 = vst [vmem:[%s2077_s4 + $0xc0] sm:$0xff] %v1450_v44   ;;  %v655_v54 = vmul.f32 %v1842_v40, %v455_v50  ;;  %v687_v55 = vmul.f32 %v1842_v40, %v583_v51  ;;  %v728_v56 = vadd.f32 %v1849_v45, %v657_v48 }
 0x112   :  { %v760_v57 = vadd.f32 %v1849_v45, %v689_v49  ;;  %v1600_v58 = vpop.f32.mrf.mxu0  ;;  %v1632_v59 = vpop.f32.mrf.mxu1  ;;  %v789_v6 = vmax.f32 %v725_v52, 0.0  ;;  %v821_v7 = vmax.f32 %v757_v53, 0.0 }
 0x113   :  { %v726_v60 = vadd.f32 %v1849_v45, %v655_v54  ;;  %v758_v61 = vadd.f32 %v1849_v45, %v687_v55  ;;  %v660_v62 = vmul.f32 %v1600_v58, %v1842_v40  ;;  %v692_v63 = vmul.f32 %v1632_v59, %v1842_v40 }
 0x114   :  { %v792_v2 = vmax.f32 %v728_v56, 0.0  ;;  %v824_v3 = vmax.f32 %v760_v57, 0.0  ;;  %v468_v4 = vpop.f32.mrf.mxu0  ;;  %v596_v5 = vpop.f32.mrf.mxu1 }
 0x115   :  { %v790_v8 = vmax.f32 %v726_v60, 0.0  ;;  %v822_v9 = vmax.f32 %v758_v61, 0.0  ;;  %v658_v12 = vmul.f32 %v1842_v40, %v468_v4  ;;  %v690_v13 = vmul.f32 %v1842_v40, %v596_v5 }
 0x116   :  { %v1385_v10 = vpack.c.bf16 %v792_v2, %v791_v0  ;;  %v1465_v11 = vpack.c.bf16 %v824_v3, %v823_v1  ;;  %v1601_v14 = vpop.f32.mrf.mxu0  ;;  %v1633_v15 = vpop.f32.mrf.mxu1  ;;  %v731_v18 = vadd.f32 %v1849_v45, %v660_v62  ;;  %v763_v19 = vadd.f32 %v1849_v45, %v692_v63 }
 0x117   :  { %v1380_v16 = vpack.c.bf16 %v790_v8, %v789_v6  ;;  %v1460_v17 = vpack.c.bf16 %v822_v9, %v821_v7  ;;  %v661_v20 = vmul.f32 %v1601_v14, %v1842_v40  ;;  %v693_v21 = vmul.f32 %v1633_v15, %v1842_v40 }
 0x118   :  { %1497 = vst [vmem:[%s2077_s4 + $0x58] sm:$0xff] %v1385_v10   ;;  %1513 = vst [vmem:[%s2077_s4 + $0xd8] sm:$0xff] %v1465_v11   ;;  %v471_v22 = vpop.f32.mrf.mxu0  ;;  %v599_v23 = vpop.f32.mrf.mxu1  ;;  %v729_v24 = vadd.f32 %v1849_v45, %v658_v12  ;;  %v761_v25 = vadd.f32 %v1849_v45, %v690_v13  ;;  %v795_v32 = vmax.f32 %v731_v18, 0.0  ;;  %v827_v33 = vmax.f32 %v763_v19, 0.0 }
 0x119   :  { %1496 = vst [vmem:[%s2077_s4 + $0x50] sm:$0xff] %v1380_v16   ;;  %1512 = vst [vmem:[%s2077_s4 + $0xd0] sm:$0xff] %v1460_v17   ;;  %v659_v26 = vmul.f32 %v1842_v40, %v471_v22  ;;  %v691_v27 = vmul.f32 %v1842_v40, %v599_v23  ;;  %v732_v28 = vadd.f32 %v1849_v45, %v661_v20 }
 0x11a   :  { %v764_v29 = vadd.f32 %v1849_v45, %v693_v21  ;;  %v1604_v30 = vpop.f32.mrf.mxu0  ;;  %v1636_v31 = vpop.f32.mrf.mxu1  ;;  %v793_v43 = vmax.f32 %v729_v24, 0.0  ;;  %v825_v44 = vmax.f32 %v761_v25, 0.0 }
 0x11b   :  { %v730_v34 = vadd.f32 %v1849_v45, %v659_v26  ;;  %v762_v35 = vadd.f32 %v1849_v45, %v691_v27  ;;  %v796_v36 = vmax.f32 %v732_v28, 0.0  ;;  %v664_v38 = vmul.f32 %v1604_v30, %v1842_v40 }
 0x11c   :  { %v828_v37 = vmax.f32 %v764_v29, 0.0  ;;  %v696_v39 = vmul.f32 %v1636_v31, %v1842_v40  ;;  %v484_v41 = vpop.f32.mrf.mxu0  ;;  %v612_v42 = vpop.f32.mrf.mxu1 }
 0x11d   :  { %v794_v46 = vmax.f32 %v730_v34, 0.0  ;;  %v826_v47 = vmax.f32 %v762_v35, 0.0  ;;  %v1395_v48 = vpack.c.bf16 %v796_v36, %v795_v32  ;;  %v662_v50 = vmul.f32 %v1842_v40, %v484_v41 }
 0x11e   :  { %v1475_v49 = vpack.c.bf16 %v828_v37, %v827_v33  ;;  %v694_v51 = vmul.f32 %v1842_v40, %v612_v42  ;;  %v1605_v52 = vpop.f32.mrf.mxu0  ;;  %v1637_v53 = vpop.f32.mrf.mxu1  ;;  %v735_v56 = vadd.f32 %v1849_v45, %v664_v38  ;;  %v767_v57 = vadd.f32 %v1849_v45, %v696_v39 }
 0x11f   :  { %v1390_v54 = vpack.c.bf16 %v794_v46, %v793_v43  ;;  %v1470_v55 = vpack.c.bf16 %v826_v47, %v825_v44  ;;  %1499 = vst [vmem:[%s2077_s4 + $0x68] sm:$0xff] %v1395_v48   ;;  %v665_v58 = vmul.f32 %v1605_v52, %v1842_v40  ;;  %v697_v59 = vmul.f32 %v1637_v53, %v1842_v40 }
 0x120   :  { %1515 = vst [vmem:[%s2077_s4 + $0xe8] sm:$0xff] %v1475_v49   ;;  %v487_v60 = vpop.f32.mrf.mxu0  ;;  %v615_v61 = vpop.f32.mrf.mxu1  ;;  %v733_v62 = vadd.f32 %v1849_v45, %v662_v50  ;;  %v765_v63 = vadd.f32 %v1849_v45, %v694_v51  ;;  %v799_v6 = vmax.f32 %v735_v56, 0.0  ;;  %v831_v7 = vmax.f32 %v767_v57, 0.0 }
 0x121   :  { %1498 = vst [vmem:[%s2077_s4 + $0x60] sm:$0xff] %v1390_v54   ;;  %1514 = vst [vmem:[%s2077_s4 + $0xe0] sm:$0xff] %v1470_v55   ;;  %v663_v0 = vmul.f32 %v1842_v40, %v487_v60  ;;  %v695_v1 = vmul.f32 %v1842_v40, %v615_v61  ;;  %v736_v2 = vadd.f32 %v1849_v45, %v665_v58 }
 0x122   :  { %v768_v3 = vadd.f32 %v1849_v45, %v697_v59  ;;  %v797_v10 = vmax.f32 %v733_v62, 0.0  ;;  %v829_v11 = vmax.f32 %v765_v63, 0.0 }
 0x123   :  { %v734_v4 = vadd.f32 %v1849_v45, %v663_v0  ;;  %v766_v5 = vadd.f32 %v1849_v45, %v695_v1  ;;  %v800_v8 = vmax.f32 %v736_v2, 0.0 }
 0x124   :  { %v832_v9 = vmax.f32 %v768_v3, 0.0 }
 0x125   :  { %v798_v12 = vmax.f32 %v734_v4, 0.0  ;;  %v830_v13 = vmax.f32 %v766_v5, 0.0  ;;  %v1405_v14 = vpack.c.bf16 %v800_v8, %v799_v6 }
 0x126   :  { %v1485_v15 = vpack.c.bf16 %v832_v9, %v831_v7 }
 0x127   :  { %v1400_v16 = vpack.c.bf16 %v798_v12, %v797_v10  ;;  %v1480_v40 = vpack.c.bf16 %v830_v13, %v829_v11  ;;  %1501 = vst [vmem:[%s2077_s4 + $0x78] sm:$0xff] %v1405_v14  }
 0x128   :  { %1517 = vst [vmem:[%s2077_s4 + $0xf8] sm:$0xff] %v1485_v15  }
 0x129   :  { %1500 = vst [vmem:[%s2077_s4 + $0x70] sm:$0xff] %v1400_v16   ;;  %1516 = vst [vmem:[%s2077_s4 + $0xf0] sm:$0xff] %v1480_v40  }

// kernel: residual_bottleneck_forward.5
= control target key start
LH: loop header
LB: loop body
LE: loop exit
PB: predicated region body
PF: predicated region fallthrough
CT: control target
= control target key end

     0   :  { %s2821_s2 = inlined_call_operand.vmem [shape: bf16[128,128], index: 2, kind: input, shape index: {}]   ;;  %s2822_s5 = inlined_call_operand.vmem [shape: bf16[128,128], index: 5, kind: input, shape index: {}]   ;;  %s2823_s0 = inlined_call_operand.vmem [shape: bf16[512,128], index: 0, kind: input, shape index: {}]   ;;  %s2824_s1 = inlined_call_operand.vmem [shape: bf16[512,128], index: 1, kind: input, shape index: {}]   ;;  %s2825_s3 = inlined_call_operand.vmem [shape: f32[1,128], index: 3, kind: input, shape index: {}]   ;;  %s2826_s6 = inlined_call_operand.vmem [shape: f32[1,128], index: 6, kind: input, shape index: {}]   ;;  %s2827_s4 = inlined_call_operand.vmem [shape: f32[1,128], index: 4, kind: input, shape index: {}]   ;;  %s2828_s7 = inlined_call_operand.vmem [shape: f32[1,128], index: 7, kind: input, shape index: {}]   ;;  %s2829_s8 = inlined_call_operand.vmem [shape: f32[512,128], index: 8, kind: output, shape index: {}]  }
   0x1   :  { %v1988_v0 = vld [vmem:[%s2821_s2 + $0x38] sm:$0xff]   ;;  %v1990_v2 = vld [vmem:[%s2821_s2 + $0x30] sm:$0xff]   ;;  %v1992_v4 = vld [vmem:[%s2821_s2 + $0x28] sm:$0xff]  }
   0x2   :  { %v1989_v1 = vld [vmem:[%s2822_s5 + $0x38] sm:$0xff]   ;;  %1828 = vmatprep.subr.bf16.mxu0 %v1988_v0  ;;  %v1991_v3 = vld [vmem:[%s2822_s5 + $0x30] sm:$0xff]   ;;  %v1993_v5 = vld [vmem:[%s2822_s5 + $0x28] sm:$0xff]  }
   0x3   :  { %1908 = vmatprep.subr.bf16.mxu1 %v1989_v1  ;;  %1829 = vmatpush3.bf16.msra.mxu0 %v1988_v0  ;;  %v1994_v6 = vld [vmem:[%s2821_s2 + $0x20] sm:$0xff]   ;;  %v1996_v8 = vld [vmem:[%s2821_s2 + $0x18] sm:$0xff]   ;;  %v1998_v10 = vld [vmem:[%s2821_s2 + $0x10] sm:$0xff]  }
   0x4   :  { %1909 = vmatpush3.bf16.msra.mxu1 %v1989_v1  ;;  %1830 = vmatprep.subr.bf16.mxu0 %v1990_v2  ;;  %v1995_v7 = vld [vmem:[%s2822_s5 + $0x20] sm:$0xff]   ;;  %v1997_v9 = vld [vmem:[%s2822_s5 + $0x18] sm:$0xff]   ;;  %v1999_v11 = vld [vmem:[%s2822_s5 + $0x10] sm:$0xff]  }
   0x5   :  { %1910 = vmatprep.subr.bf16.mxu1 %v1991_v3  ;;  %v2004_v12 = vld [vmem:[%s2823_s0] sm:$0xff]   ;;  %v2000_v14 = vld [vmem:[%s2821_s2 + $0x8] sm:$0xff]   ;;  %v2008_v20 = vld [vmem:[%s2823_s0 + $0x10] sm:$0xff]  }
   0x6   :  { %v2005_v13 = vld [vmem:[%s2824_s1] sm:$0xff]   ;;  %1844 = vmatprep.mubr.bf16.mxu0 %v2004_v12  ;;  %v2001_v15 = vld [vmem:[%s2822_s5 + $0x8] sm:$0xff]   ;;  %v2009_v21 = vld [vmem:[%s2824_s1 + $0x10] sm:$0xff]  }
   0x7   :  { %1831 = vmatpush3.bf16.msra.mxu0 %v1990_v2  ;;  %1924 = vmatprep.mubr.bf16.mxu1 %v2005_v13  ;;  %v2002_v16 = vld [vmem:[%s2821_s2] sm:$0xff]   ;;  %v2006_v18 = vld [vmem:[%s2823_s0 + $0x8] sm:$0xff]   ;;  %v2010_v22 = vld [vmem:[%s2823_s0 + $0x18] sm:$0xff]  }
   0x8   :  { %1911 = vmatpush3.bf16.msra.mxu1 %v1991_v3  ;;  %1832 = vmatprep.subr.bf16.mxu0 %v1992_v4  ;;  %v2003_v17 = vld [vmem:[%s2822_s5] sm:$0xff]   ;;  %v2007_v19 = vld [vmem:[%s2824_s1 + $0x8] sm:$0xff]   ;;  %v2011_v23 = vld [vmem:[%s2824_s1 + $0x18] sm:$0xff]  }
   0x9   :  { %1912 = vmatprep.subr.bf16.mxu1 %v1993_v5  ;;  %v2012_v24 = vld [vmem:[%s2823_s0 + $0x20] sm:$0xff]   ;;  %v2014_v26 = vld [vmem:[%s2823_s0 + $0x28] sm:$0xff]   ;;  %v2016_v28 = vld [vmem:[%s2823_s0 + $0x30] sm:$0xff]  }
   0xa   :  { %v2013_v25 = vld [vmem:[%s2824_s1 + $0x20] sm:$0xff]   ;;  %v2015_v27 = vld [vmem:[%s2824_s1 + $0x28] sm:$0xff]   ;;  %v2017_v29 = vld [vmem:[%s2824_s1 + $0x30] sm:$0xff]  }
   0xb   :  { %1833 = vmatpush3.bf16.msra.mxu0 %v1992_v4  ;;  %v2018_v30 = vld [vmem:[%s2823_s0 + $0x38] sm:$0xff]   ;;  %v2020_v32 = vld [vmem:[%s2823_s0 + $0x40] sm:$0xff]   ;;  %v2022_v34 = vld [vmem:[%s2823_s0 + $0x48] sm:$0xff]  }
   0xc   :  { %1913 = vmatpush3.bf16.msra.mxu1 %v1993_v5  ;;  %1834 = vmatprep.subr.bf16.mxu0 %v1994_v6  ;;  %v2019_v31 = vld [vmem:[%s2824_s1 + $0x38] sm:$0xff]   ;;  %v2021_v33 = vld [vmem:[%s2824_s1 + $0x40] sm:$0xff]   ;;  %v2023_v35 = vld [vmem:[%s2824_s1 + $0x48] sm:$0xff]  }
   0xd   :  { %1914 = vmatprep.subr.bf16.mxu1 %v1995_v7  ;;  %v2024_v36 = vld [vmem:[%s2823_s0 + $0x50] sm:$0xff]   ;;  %v2026_v38 = vld [vmem:[%s2823_s0 + $0x58] sm:$0xff]   ;;  %v2028_v40 = vld [vmem:[%s2823_s0 + $0x60] sm:$0xff]  }
   0xe   :  { %v2025_v37 = vld [vmem:[%s2824_s1 + $0x50] sm:$0xff]   ;;  %v2027_v39 = vld [vmem:[%s2824_s1 + $0x58] sm:$0xff]   ;;  %v2029_v41 = vld [vmem:[%s2824_s1 + $0x60] sm:$0xff]  }
   0xf   :  { %1835 = vmatpush3.bf16.msra.mxu0 %v1994_v6  ;;  %v2030_v42 = vld [vmem:[%s2823_s0 + $0x68] sm:$0xff]   ;;  %v2032_v44 = vld [vmem:[%s2823_s0 + $0x70] sm:$0xff]   ;;  %v2034_v46 = vld [vmem:[%s2823_s0 + $0x78] sm:$0xff]  }
  0x10   :  { %1915 = vmatpush3.bf16.msra.mxu1 %v1995_v7  ;;  %1836 = vmatprep.subr.bf16.mxu0 %v1996_v8  ;;  %v2031_v43 = vld [vmem:[%s2824_s1 + $0x68] sm:$0xff]   ;;  %v2033_v45 = vld [vmem:[%s2824_s1 + $0x70] sm:$0xff]   ;;  %v2035_v47 = vld [vmem:[%s2824_s1 + $0x78] sm:$0xff]  }
  0x11   :  { %1916 = vmatprep.subr.bf16.mxu1 %v1997_v9  ;;  %v2036_v48 = vld [vmem:[%s2823_s0 + $0x80] sm:$0xff]   ;;  %v2038_v50 = vld [vmem:[%s2823_s0 + $0x88] sm:$0xff]   ;;  %v2040_v52 = vld [vmem:[%s2823_s0 + $0x90] sm:$0xff]  }
  0x12   :  { %v2037_v49 = vld [vmem:[%s2824_s1 + $0x80] sm:$0xff]   ;;  %v2039_v51 = vld [vmem:[%s2824_s1 + $0x88] sm:$0xff]   ;;  %v2041_v53 = vld [vmem:[%s2824_s1 + $0x90] sm:$0xff]  }
  0x13   :  { %1837 = vmatpush3.bf16.msra.mxu0 %v1996_v8  ;;  %v2042_v54 = vld [vmem:[%s2823_s0 + $0x98] sm:$0xff]   ;;  %v2044_v56 = vld [vmem:[%s2823_s0 + $0xa0] sm:$0xff]   ;;  %v2046_v58 = vld [vmem:[%s2823_s0 + $0xa8] sm:$0xff]  }
  0x14   :  { %1917 = vmatpush3.bf16.msra.mxu1 %v1997_v9  ;;  %1838 = vmatprep.subr.bf16.mxu0 %v1998_v10  ;;  %v2043_v55 = vld [vmem:[%s2824_s1 + $0x98] sm:$0xff]   ;;  %v2045_v57 = vld [vmem:[%s2824_s1 + $0xa0] sm:$0xff]   ;;  %v2047_v59 = vld [vmem:[%s2824_s1 + $0xa8] sm:$0xff]  }
  0x15   :  { %1918 = vmatprep.subr.bf16.mxu1 %v1999_v11  ;;  %v2048_v60 = vld [vmem:[%s2823_s0 + $0xb0] sm:$0xff]   ;;  %v2050_v62 = vld [vmem:[%s2823_s0 + $0xb8] sm:$0xff]   ;;  %v2052_v0 = vld [vmem:[%s2823_s0 + $0xc0] sm:$0xff]  }
  0x16   :  { %v2049_v61 = vld [vmem:[%s2824_s1 + $0xb0] sm:$0xff]   ;;  %v2051_v63 = vld [vmem:[%s2824_s1 + $0xb8] sm:$0xff]   ;;  %v2053_v1 = vld [vmem:[%s2824_s1 + $0xc0] sm:$0xff]  }
  0x17   :  { %1839 = vmatpush3.bf16.msra.mxu0 %v1998_v10  ;;  %v2054_v2 = vld [vmem:[%s2823_s0 + $0xc8] sm:$0xff]   ;;  %v2056_v4 = vld [vmem:[%s2823_s0 + $0xd0] sm:$0xff]   ;;  %v2058_v6 = vld [vmem:[%s2823_s0 + $0xd8] sm:$0xff]  }
  0x18   :  { %1919 = vmatpush3.bf16.msra.mxu1 %v1999_v11  ;;  %1840 = vmatprep.subr.bf16.mxu0 %v2000_v14  ;;  %v2055_v3 = vld [vmem:[%s2824_s1 + $0xc8] sm:$0xff]   ;;  %v2057_v5 = vld [vmem:[%s2824_s1 + $0xd0] sm:$0xff]   ;;  %v2059_v7 = vld [vmem:[%s2824_s1 + $0xd8] sm:$0xff]  }
  0x19   :  { %1920 = vmatprep.subr.bf16.mxu1 %v2001_v15  ;;  %v2060_v8 = vld [vmem:[%s2823_s0 + $0xe0] sm:$0xff]   ;;  %v2062_v10 = vld [vmem:[%s2823_s0 + $0xe8] sm:$0xff]   ;;  %v2064_v12 = vld [vmem:[%s2823_s0 + $0xf0] sm:$0xff]  }
  0x1a   :  { %v2061_v9 = vld [vmem:[%s2824_s1 + $0xe0] sm:$0xff]   ;;  %v2063_v11 = vld [vmem:[%s2824_s1 + $0xe8] sm:$0xff]   ;;  %v2065_v13 = vld [vmem:[%s2824_s1 + $0xf0] sm:$0xff]  }
  0x1b   :  { %1841 = vmatpush3.bf16.msra.mxu0 %v2000_v14  ;;  %v2066_v14 = vld [vmem:[%s2823_s0 + $0xf8] sm:$0xff]  }
  0x1c   :  { %1921 = vmatpush3.bf16.msra.mxu1 %v2001_v15  ;;  %1842 = vmatprep.subr.bf16.mxu0 %v2002_v16  ;;  %v2067_v15 = vld [vmem:[%s2824_s1 + $0xf8] sm:$0xff]  }
  0x1d   :  { %1922 = vmatprep.subr.bf16.mxu1 %v2003_v17 }
  0x1f   :  { %1843 = vmatpush3.bf16.msra.mxu0 %v2002_v16  ;;  %v2356_v16 = vld [vmem:[%s2825_s3] ss:$0 sm:$0xff] }
  0x20   :  { %1923 = vmatpush3.bf16.msra.mxu1 %v2003_v17  ;;  %v2361_v17 = vld [vmem:[%s2826_s6] ss:$0 sm:$0xff] }
  0x22   :  { %1845 = vmatmul.mubr.bf16.vlgmr.msra.gmra.mxu0 %v2006_v18 }
  0x23   :  { %1925 = vmatmul.mubr.bf16.vlgmr.msra.gmra.mxu1 %v2007_v19  ;;  %1848 = vmatprep.mubr.bf16.mxu0 %v2008_v20  ;;  %v2366_v19 = vld [vmem:[%s2827_s4] ss:$0 sm:$0xff] }
  0x24   :  { %1928 = vmatprep.mubr.bf16.mxu1 %v2009_v21 }
  0x2a   :  { %1849 = vmatmul.mubr.bf16.gmra.mxu0 %v2010_v22 }
  0x2b   :  { %1929 = vmatmul.mubr.bf16.gmra.mxu1 %v2011_v23  ;;  %1852 = vmatprep.mubr.bf16.mxu0 %v2012_v24 }
  0x2c   :  { %1932 = vmatprep.mubr.bf16.mxu1 %v2013_v25 }
  0x32   :  { %1853 = vmatmul.mubr.bf16.gmra.mxu0 %v2014_v26 }
  0x33   :  { %1933 = vmatmul.mubr.bf16.gmra.mxu1 %v2015_v27  ;;  %1856 = vmatprep.mubr.bf16.mxu0 %v2016_v28  ;;  %v2375_v27 = vld [vmem:[%s2828_s7] ss:$0 sm:$0xff] }
  0x34   :  { %1936 = vmatprep.mubr.bf16.mxu1 %v2017_v29 }
  0x3a   :  { %1857 = vmatmul.mubr.bf16.gmra.mxu0 %v2018_v30 }
  0x3b   :  { %1937 = vmatmul.mubr.bf16.gmra.mxu1 %v2019_v31  ;;  %1860 = vmatprep.mubr.bf16.mxu0 %v2020_v32 }
  0x3c   :  { %1940 = vmatprep.mubr.bf16.mxu1 %v2021_v33 }
  0x42   :  { %1861 = vmatmul.mubr.bf16.gmra.mxu0 %v2022_v34 }
  0x43   :  { %1941 = vmatmul.mubr.bf16.gmra.mxu1 %v2023_v35  ;;  %1864 = vmatprep.mubr.bf16.mxu0 %v2024_v36 }
  0x44   :  { %1944 = vmatprep.mubr.bf16.mxu1 %v2025_v37 }
  0x4a   :  { %1865 = vmatmul.mubr.bf16.gmra.mxu0 %v2026_v38 }
  0x4b   :  { %1945 = vmatmul.mubr.bf16.gmra.mxu1 %v2027_v39  ;;  %1868 = vmatprep.mubr.bf16.mxu0 %v2028_v40 }
  0x4c   :  { %1948 = vmatprep.mubr.bf16.mxu1 %v2029_v41 }
  0x52   :  { %1869 = vmatmul.mubr.bf16.gmra.mxu0 %v2030_v42 }
  0x53   :  { %1949 = vmatmul.mubr.bf16.gmra.mxu1 %v2031_v43  ;;  %1872 = vmatprep.mubr.bf16.mxu0 %v2032_v44 }
  0x54   :  { %1952 = vmatprep.mubr.bf16.mxu1 %v2033_v45 }
  0x5a   :  { %1873 = vmatmul.mubr.bf16.gmra.mxu0 %v2034_v46 }
  0x5b   :  { %1953 = vmatmul.mubr.bf16.gmra.mxu1 %v2035_v47  ;;  %1876 = vmatprep.mubr.bf16.mxu0 %v2036_v48 }
  0x5c   :  { %1956 = vmatprep.mubr.bf16.mxu1 %v2037_v49 }
  0x62   :  { %1877 = vmatmul.mubr.bf16.gmra.mxu0 %v2038_v50 }
  0x63   :  { %1957 = vmatmul.mubr.bf16.gmra.mxu1 %v2039_v51  ;;  %1880 = vmatprep.mubr.bf16.mxu0 %v2040_v52 }
  0x64   :  { %1960 = vmatprep.mubr.bf16.mxu1 %v2041_v53 }
  0x6a   :  { %1881 = vmatmul.mubr.bf16.gmra.mxu0 %v2042_v54 }
  0x6b   :  { %1961 = vmatmul.mubr.bf16.gmra.mxu1 %v2043_v55  ;;  %1884 = vmatprep.mubr.bf16.mxu0 %v2044_v56 }
  0x6c   :  { %1964 = vmatprep.mubr.bf16.mxu1 %v2045_v57 }
  0x72   :  { %1885 = vmatmul.mubr.bf16.gmra.mxu0 %v2046_v58 }
  0x73   :  { %1965 = vmatmul.mubr.bf16.gmra.mxu1 %v2047_v59  ;;  %1888 = vmatprep.mubr.bf16.mxu0 %v2048_v60 }
  0x74   :  { %1968 = vmatprep.mubr.bf16.mxu1 %v2049_v61 }
  0x7a   :  { %1889 = vmatmul.mubr.bf16.gmra.mxu0 %v2050_v62 }
  0x7b   :  { %1969 = vmatmul.mubr.bf16.gmra.mxu1 %v2051_v63  ;;  %1892 = vmatprep.mubr.bf16.mxu0 %v2052_v0 }
  0x7c   :  { %1972 = vmatprep.mubr.bf16.mxu1 %v2053_v1 }
  0x82   :  { %1893 = vmatmul.mubr.bf16.gmra.mxu0 %v2054_v2 }
  0x83   :  { %1973 = vmatmul.mubr.bf16.gmra.mxu1 %v2055_v3  ;;  %1896 = vmatprep.mubr.bf16.mxu0 %v2056_v4 }
  0x84   :  { %1976 = vmatprep.mubr.bf16.mxu1 %v2057_v5 }
  0x8a   :  { %1897 = vmatmul.mubr.bf16.gmra.mxu0 %v2058_v6 }
  0x8b   :  { %1977 = vmatmul.mubr.bf16.gmra.mxu1 %v2059_v7  ;;  %1900 = vmatprep.mubr.bf16.mxu0 %v2060_v8 }
  0x8c   :  { %1980 = vmatprep.mubr.bf16.mxu1 %v2061_v9 }
  0x92   :  { %1901 = vmatmul.mubr.bf16.gmra.mxu0 %v2062_v10 }
  0x93   :  { %1981 = vmatmul.mubr.bf16.gmra.mxu1 %v2063_v11  ;;  %1904 = vmatprep.mubr.bf16.mxu0 %v2064_v12 }
  0x94   :  { %1984 = vmatprep.mubr.bf16.mxu1 %v2065_v13 }
  0x9a   :  { %1905 = vmatmul.mubr.bf16.gmra.mxu0 %v2066_v14 }
  0x9b   :  { %1985 = vmatmul.mubr.bf16.gmra.mxu1 %v2067_v15 }
  0xe2   :  { %v1846_v18 = vpop.f32.mrf.mxu0 }
  0xe3   :  { %v648_v20 = vmul.f32 %v1846_v18, %v2356_v16  ;;  %v1926_v21 = vpop.f32.mrf.mxu1 }
  0xe4   :  { %v1399_v22 = vmul.f32 %v1926_v21, %v2361_v17  ;;  %v384_v23 = vpop.f32.mrf.mxu0 }
  0xe5   :  { %v719_v24 = vadd.f32 %v2366_v19, %v648_v20  ;;  %v646_v25 = vmul.f32 %v2356_v16, %v384_v23  ;;  %v1135_v26 = vpop.f32.mrf.mxu1 }
  0xe6   :  { %v1847_v28 = vpop.f32.mrf.mxu0  ;;  %v1397_v31 = vmul.f32 %v2361_v17, %v1135_v26 }
  0xe7   :  { %v1463_v29 = vadd.f32 %v1399_v22, %v719_v24  ;;  %v717_v30 = vadd.f32 %v2366_v19, %v646_v25  ;;  %v649_v32 = vmul.f32 %v1847_v28, %v2356_v16  ;;  %v1927_v33 = vpop.f32.mrf.mxu1 }
  0xe8   :  { %v1400_v34 = vmul.f32 %v1927_v33, %v2361_v17  ;;  %v387_v35 = vpop.f32.mrf.mxu0 }
  0xe9   :  { %v1534_v36 = vadd.f32 %v2375_v27, %v1463_v29  ;;  %v1461_v37 = vadd.f32 %v1397_v31, %v717_v30  ;;  %v720_v38 = vadd.f32 %v2366_v19, %v649_v32  ;;  %v647_v39 = vmul.f32 %v2356_v16, %v387_v35  ;;  %v1138_v40 = vpop.f32.mrf.mxu1 }
  0xea   :  { %v1398_v41 = vmul.f32 %v2361_v17, %v1138_v40  ;;  %v1850_v42 = vpop.f32.mrf.mxu0 }
  0xeb   :  { %1598 = vst [vmem:[%s2829_s8 + $0x10] sm:$0xff] %v1534_v36  ;;  %v1532_v43 = vadd.f32 %v2375_v27, %v1461_v37  ;;  %v1464_v44 = vadd.f32 %v1400_v34, %v720_v38  ;;  %v718_v45 = vadd.f32 %v2366_v19, %v647_v39  ;;  %v652_v46 = vmul.f32 %v1850_v42, %v2356_v16  ;;  %v1930_v47 = vpop.f32.mrf.mxu1 }
  0xec   :  { %v1403_v48 = vmul.f32 %v1930_v47, %v2361_v17  ;;  %v400_v49 = vpop.f32.mrf.mxu0 }
  0xed   :  { %1596 = vst [vmem:[%s2829_s8] sm:$0xff] %v1532_v43  ;;  %v1535_v50 = vadd.f32 %v2375_v27, %v1464_v44  ;;  %v1462_v51 = vadd.f32 %v1398_v41, %v718_v45  ;;  %v723_v52 = vadd.f32 %v2366_v19, %v652_v46  ;;  %v650_v53 = vmul.f32 %v2356_v16, %v400_v49  ;;  %v1151_v54 = vpop.f32.mrf.mxu1 }
  0xee   :  { %v1401_v55 = vmul.f32 %v2361_v17, %v1151_v54  ;;  %v1851_v56 = vpop.f32.mrf.mxu0 }
  0xef   :  { %1599 = vst [vmem:[%s2829_s8 + $0x18] sm:$0xff] %v1535_v50  ;;  %v1533_v57 = vadd.f32 %v2375_v27, %v1462_v51  ;;  %v1467_v58 = vadd.f32 %v1403_v48, %v723_v52  ;;  %v721_v59 = vadd.f32 %v2366_v19, %v650_v53  ;;  %v653_v60 = vmul.f32 %v1851_v56, %v2356_v16  ;;  %v1931_v61 = vpop.f32.mrf.mxu1 }
  0xf0   :  { %v1404_v62 = vmul.f32 %v1931_v61, %v2361_v17  ;;  %v403_v63 = vpop.f32.mrf.mxu0 }
  0xf1   :  { %1597 = vst [vmem:[%s2829_s8 + $0x8] sm:$0xff] %v1533_v57  ;;  %v1538_v0 = vadd.f32 %v2375_v27, %v1467_v58  ;;  %v1465_v1 = vadd.f32 %v1401_v55, %v721_v59  ;;  %v724_v2 = vadd.f32 %v2366_v19, %v653_v60  ;;  %v651_v3 = vmul.f32 %v2356_v16, %v403_v63  ;;  %v1154_v4 = vpop.f32.mrf.mxu1 }
  0xf2   :  { %v1402_v5 = vmul.f32 %v2361_v17, %v1154_v4  ;;  %v1854_v6 = vpop.f32.mrf.mxu0 }
  0xf3   :  { %1602 = vst [vmem:[%s2829_s8 + $0x30] sm:$0xff] %v1538_v0  ;;  %v1536_v7 = vadd.f32 %v2375_v27, %v1465_v1  ;;  %v1468_v8 = vadd.f32 %v1404_v62, %v724_v2  ;;  %v722_v9 = vadd.f32 %v2366_v19, %v651_v3  ;;  %v656_v10 = vmul.f32 %v1854_v6, %v2356_v16  ;;  %v1934_v11 = vpop.f32.mrf.mxu1 }
  0xf4   :  { %v1407_v12 = vmul.f32 %v1934_v11, %v2361_v17  ;;  %v416_v13 = vpop.f32.mrf.mxu0 }
  0xf5   :  { %1600 = vst [vmem:[%s2829_s8 + $0x20] sm:$0xff] %v1536_v7  ;;  %v1539_v14 = vadd.f32 %v2375_v27, %v1468_v8  ;;  %v1466_v15 = vadd.f32 %v1402_v5, %v722_v9  ;;  %v727_v18 = vadd.f32 %v2366_v19, %v656_v10  ;;  %v654_v20 = vmul.f32 %v2356_v16, %v416_v13  ;;  %v1167_v21 = vpop.f32.mrf.mxu1 }
  0xf6   :  { %v1405_v22 = vmul.f32 %v2361_v17, %v1167_v21  ;;  %v1855_v23 = vpop.f32.mrf.mxu0 }
  0xf7   :  { %1603 = vst [vmem:[%s2829_s8 + $0x38] sm:$0xff] %v1539_v14  ;;  %v1537_v24 = vadd.f32 %v2375_v27, %v1466_v15  ;;  %v1471_v25 = vadd.f32 %v1407_v12, %v727_v18  ;;  %v725_v26 = vadd.f32 %v2366_v19, %v654_v20  ;;  %v657_v28 = vmul.f32 %v1855_v23, %v2356_v16  ;;  %v1935_v29 = vpop.f32.mrf.mxu1 }
  0xf8   :  { %v1408_v30 = vmul.f32 %v1935_v29, %v2361_v17  ;;  %v419_v31 = vpop.f32.mrf.mxu0 }
  0xf9   :  { %1601 = vst [vmem:[%s2829_s8 + $0x28] sm:$0xff] %v1537_v24  ;;  %v1542_v32 = vadd.f32 %v2375_v27, %v1471_v25  ;;  %v1469_v33 = vadd.f32 %v1405_v22, %v725_v26  ;;  %v728_v34 = vadd.f32 %v2366_v19, %v657_v28  ;;  %v655_v35 = vmul.f32 %v2356_v16, %v419_v31  ;;  %v1170_v36 = vpop.f32.mrf.mxu1 }
  0xfa   :  { %v1406_v37 = vmul.f32 %v2361_v17, %v1170_v36  ;;  %v1858_v38 = vpop.f32.mrf.mxu0 }
  0xfb   :  { %1606 = vst [vmem:[%s2829_s8 + $0x50] sm:$0xff] %v1542_v32  ;;  %v1540_v39 = vadd.f32 %v2375_v27, %v1469_v33  ;;  %v1472_v40 = vadd.f32 %v1408_v30, %v728_v34  ;;  %v726_v41 = vadd.f32 %v2366_v19, %v655_v35  ;;  %v660_v42 = vmul.f32 %v1858_v38, %v2356_v16  ;;  %v1938_v43 = vpop.f32.mrf.mxu1 }
  0xfc   :  { %v1411_v44 = vmul.f32 %v1938_v43, %v2361_v17  ;;  %v432_v45 = vpop.f32.mrf.mxu0 }
  0xfd   :  { %1604 = vst [vmem:[%s2829_s8 + $0x40] sm:$0xff] %v1540_v39  ;;  %v1543_v46 = vadd.f32 %v2375_v27, %v1472_v40  ;;  %v1470_v47 = vadd.f32 %v1406_v37, %v726_v41  ;;  %v731_v48 = vadd.f32 %v2366_v19, %v660_v42  ;;  %v658_v49 = vmul.f32 %v2356_v16, %v432_v45  ;;  %v1183_v50 = vpop.f32.mrf.mxu1 }
  0xfe   :  { %v1409_v51 = vmul.f32 %v2361_v17, %v1183_v50  ;;  %v1859_v52 = vpop.f32.mrf.mxu0 }
  0xff   :  { %1607 = vst [vmem:[%s2829_s8 + $0x58] sm:$0xff] %v1543_v46  ;;  %v1541_v53 = vadd.f32 %v2375_v27, %v1470_v47  ;;  %v1475_v54 = vadd.f32 %v1411_v44, %v731_v48  ;;  %v729_v55 = vadd.f32 %v2366_v19, %v658_v49  ;;  %v661_v56 = vmul.f32 %v1859_v52, %v2356_v16  ;;  %v1939_v57 = vpop.f32.mrf.mxu1 }
 0x100   :  { %v1412_v58 = vmul.f32 %v1939_v57, %v2361_v17  ;;  %v435_v59 = vpop.f32.mrf.mxu0 }
 0x101   :  { %1605 = vst [vmem:[%s2829_s8 + $0x48] sm:$0xff] %v1541_v53  ;;  %v1546_v60 = vadd.f32 %v2375_v27, %v1475_v54  ;;  %v1473_v61 = vadd.f32 %v1409_v51, %v729_v55  ;;  %v732_v62 = vadd.f32 %v2366_v19, %v661_v56  ;;  %v659_v63 = vmul.f32 %v2356_v16, %v435_v59  ;;  %v1186_v0 = vpop.f32.mrf.mxu1 }
 0x102   :  { %v1410_v1 = vmul.f32 %v2361_v17, %v1186_v0  ;;  %v1862_v2 = vpop.f32.mrf.mxu0 }
 0x103   :  { %1610 = vst [vmem:[%s2829_s8 + $0x70] sm:$0xff] %v1546_v60  ;;  %v1544_v3 = vadd.f32 %v2375_v27, %v1473_v61  ;;  %v1476_v4 = vadd.f32 %v1412_v58, %v732_v62  ;;  %v730_v5 = vadd.f32 %v2366_v19, %v659_v63  ;;  %v664_v6 = vmul.f32 %v1862_v2, %v2356_v16  ;;  %v1942_v7 = vpop.f32.mrf.mxu1 }
 0x104   :  { %v1415_v8 = vmul.f32 %v1942_v7, %v2361_v17  ;;  %v448_v9 = vpop.f32.mrf.mxu0 }
 0x105   :  { %1608 = vst [vmem:[%s2829_s8 + $0x60] sm:$0xff] %v1544_v3  ;;  %v1547_v10 = vadd.f32 %v2375_v27, %v1476_v4  ;;  %v1474_v11 = vadd.f32 %v1410_v1, %v730_v5  ;;  %v735_v12 = vadd.f32 %v2366_v19, %v664_v6  ;;  %v662_v13 = vmul.f32 %v2356_v16, %v448_v9  ;;  %v1199_v14 = vpop.f32.mrf.mxu1 }
 0x106   :  { %v1413_v15 = vmul.f32 %v2361_v17, %v1199_v14  ;;  %v1863_v18 = vpop.f32.mrf.mxu0 }
 0x107   :  { %1611 = vst [vmem:[%s2829_s8 + $0x78] sm:$0xff] %v1547_v10  ;;  %v1545_v20 = vadd.f32 %v2375_v27, %v1474_v11  ;;  %v1479_v21 = vadd.f32 %v1415_v8, %v735_v12  ;;  %v733_v22 = vadd.f32 %v2366_v19, %v662_v13  ;;  %v665_v23 = vmul.f32 %v1863_v18, %v2356_v16  ;;  %v1943_v24 = vpop.f32.mrf.mxu1 }
 0x108   :  { %v1416_v25 = vmul.f32 %v1943_v24, %v2361_v17  ;;  %v451_v26 = vpop.f32.mrf.mxu0 }
 0x109   :  { %1609 = vst [vmem:[%s2829_s8 + $0x68] sm:$0xff] %v1545_v20  ;;  %v1550_v28 = vadd.f32 %v2375_v27, %v1479_v21  ;;  %v1477_v29 = vadd.f32 %v1413_v15, %v733_v22  ;;  %v736_v30 = vadd.f32 %v2366_v19, %v665_v23  ;;  %v663_v31 = vmul.f32 %v2356_v16, %v451_v26  ;;  %v1202_v32 = vpop.f32.mrf.mxu1 }
 0x10a   :  { %v1414_v33 = vmul.f32 %v2361_v17, %v1202_v32  ;;  %v1866_v34 = vpop.f32.mrf.mxu0 }
 0x10b   :  { %1614 = vst [vmem:[%s2829_s8 + $0x90] sm:$0xff] %v1550_v28  ;;  %v1548_v35 = vadd.f32 %v2375_v27, %v1477_v29  ;;  %v1480_v36 = vadd.f32 %v1416_v25, %v736_v30  ;;  %v734_v37 = vadd.f32 %v2366_v19, %v663_v31  ;;  %v668_v38 = vmul.f32 %v1866_v34, %v2356_v16  ;;  %v1946_v39 = vpop.f32.mrf.mxu1 }
 0x10c   :  { %v1419_v40 = vmul.f32 %v1946_v39, %v2361_v17  ;;  %v464_v41 = vpop.f32.mrf.mxu0 }
 0x10d   :  { %1612 = vst [vmem:[%s2829_s8 + $0x80] sm:$0xff] %v1548_v35  ;;  %v1551_v42 = vadd.f32 %v2375_v27, %v1480_v36  ;;  %v1478_v43 = vadd.f32 %v1414_v33, %v734_v37  ;;  %v739_v44 = vadd.f32 %v2366_v19, %v668_v38  ;;  %v666_v45 = vmul.f32 %v2356_v16, %v464_v41  ;;  %v1215_v46 = vpop.f32.mrf.mxu1 }
 0x10e   :  { %v1417_v47 = vmul.f32 %v2361_v17, %v1215_v46  ;;  %v1867_v48 = vpop.f32.mrf.mxu0 }
 0x10f   :  { %1615 = vst [vmem:[%s2829_s8 + $0x98] sm:$0xff] %v1551_v42  ;;  %v1549_v49 = vadd.f32 %v2375_v27, %v1478_v43  ;;  %v1483_v50 = vadd.f32 %v1419_v40, %v739_v44  ;;  %v737_v51 = vadd.f32 %v2366_v19, %v666_v45  ;;  %v669_v52 = vmul.f32 %v1867_v48, %v2356_v16  ;;  %v1947_v53 = vpop.f32.mrf.mxu1 }
 0x110   :  { %v1420_v54 = vmul.f32 %v1947_v53, %v2361_v17  ;;  %v467_v55 = vpop.f32.mrf.mxu0 }
 0x111   :  { %1613 = vst [vmem:[%s2829_s8 + $0x88] sm:$0xff] %v1549_v49  ;;  %v1554_v56 = vadd.f32 %v2375_v27, %v1483_v50  ;;  %v1481_v57 = vadd.f32 %v1417_v47, %v737_v51  ;;  %v740_v58 = vadd.f32 %v2366_v19, %v669_v52  ;;  %v667_v59 = vmul.f32 %v2356_v16, %v467_v55  ;;  %v1218_v60 = vpop.f32.mrf.mxu1 }
 0x112   :  { %v1418_v61 = vmul.f32 %v2361_v17, %v1218_v60  ;;  %v1870_v62 = vpop.f32.mrf.mxu0 }
 0x113   :  { %1618 = vst [vmem:[%s2829_s8 + $0xb0] sm:$0xff] %v1554_v56  ;;  %v1552_v63 = vadd.f32 %v2375_v27, %v1481_v57  ;;  %v1484_v0 = vadd.f32 %v1420_v54, %v740_v58  ;;  %v738_v1 = vadd.f32 %v2366_v19, %v667_v59  ;;  %v672_v2 = vmul.f32 %v1870_v62, %v2356_v16  ;;  %v1950_v3 = vpop.f32.mrf.mxu1 }
 0x114   :  { %v1423_v4 = vmul.f32 %v1950_v3, %v2361_v17  ;;  %v480_v5 = vpop.f32.mrf.mxu0 }
 0x115   :  { %1616 = vst [vmem:[%s2829_s8 + $0xa0] sm:$0xff] %v1552_v63  ;;  %v1555_v6 = vadd.f32 %v2375_v27, %v1484_v0  ;;  %v1482_v7 = vadd.f32 %v1418_v61, %v738_v1  ;;  %v743_v8 = vadd.f32 %v2366_v19, %v672_v2  ;;  %v670_v9 = vmul.f32 %v2356_v16, %v480_v5  ;;  %v1231_v10 = vpop.f32.mrf.mxu1 }
 0x116   :  { %v1421_v11 = vmul.f32 %v2361_v17, %v1231_v10  ;;  %v1871_v12 = vpop.f32.mrf.mxu0 }
 0x117   :  { %1619 = vst [vmem:[%s2829_s8 + $0xb8] sm:$0xff] %v1555_v6  ;;  %v1553_v13 = vadd.f32 %v2375_v27, %v1482_v7  ;;  %v1487_v14 = vadd.f32 %v1423_v4, %v743_v8  ;;  %v741_v15 = vadd.f32 %v2366_v19, %v670_v9  ;;  %v673_v18 = vmul.f32 %v1871_v12, %v2356_v16  ;;  %v1951_v20 = vpop.f32.mrf.mxu1 }
 0x118   :  { %v1424_v21 = vmul.f32 %v1951_v20, %v2361_v17  ;;  %v483_v22 = vpop.f32.mrf.mxu0 }
 0x119   :  { %1617 = vst [vmem:[%s2829_s8 + $0xa8] sm:$0xff] %v1553_v13  ;;  %v1558_v23 = vadd.f32 %v2375_v27, %v1487_v14  ;;  %v1485_v24 = vadd.f32 %v1421_v11, %v741_v15  ;;  %v744_v25 = vadd.f32 %v2366_v19, %v673_v18  ;;  %v671_v26 = vmul.f32 %v2356_v16, %v483_v22  ;;  %v1234_v28 = vpop.f32.mrf.mxu1 }
 0x11a   :  { %v1422_v29 = vmul.f32 %v2361_v17, %v1234_v28  ;;  %v1874_v30 = vpop.f32.mrf.mxu0 }
 0x11b   :  { %1622 = vst [vmem:[%s2829_s8 + $0xd0] sm:$0xff] %v1558_v23  ;;  %v1556_v31 = vadd.f32 %v2375_v27, %v1485_v24  ;;  %v1488_v32 = vadd.f32 %v1424_v21, %v744_v25  ;;  %v742_v33 = vadd.f32 %v2366_v19, %v671_v26  ;;  %v676_v34 = vmul.f32 %v1874_v30, %v2356_v16  ;;  %v1954_v35 = vpop.f32.mrf.mxu1 }
 0x11c   :  { %v1427_v36 = vmul.f32 %v1954_v35, %v2361_v17  ;;  %v496_v37 = vpop.f32.mrf.mxu0 }
 0x11d   :  { %1620 = vst [vmem:[%s2829_s8 + $0xc0] sm:$0xff] %v1556_v31  ;;  %v1559_v38 = vadd.f32 %v2375_v27, %v1488_v32  ;;  %v1486_v39 = vadd.f32 %v1422_v29, %v742_v33  ;;  %v747_v40 = vadd.f32 %v2366_v19, %v676_v34  ;;  %v674_v41 = vmul.f32 %v2356_v16, %v496_v37  ;;  %v1247_v42 = vpop.f32.mrf.mxu1 }
 0x11e   :  { %v1425_v43 = vmul.f32 %v2361_v17, %v1247_v42  ;;  %v1875_v44 = vpop.f32.mrf.mxu0 }
 0x11f   :  { %1623 = vst [vmem:[%s2829_s8 + $0xd8] sm:$0xff] %v1559_v38  ;;  %v1557_v45 = vadd.f32 %v2375_v27, %v1486_v39  ;;  %v1491_v46 = vadd.f32 %v1427_v36, %v747_v40  ;;  %v745_v47 = vadd.f32 %v2366_v19, %v674_v41  ;;  %v677_v48 = vmul.f32 %v1875_v44, %v2356_v16  ;;  %v1955_v49 = vpop.f32.mrf.mxu1 }
 0x120   :  { %v1428_v50 = vmul.f32 %v1955_v49, %v2361_v17  ;;  %v499_v51 = vpop.f32.mrf.mxu0 }
 0x121   :  { %1621 = vst [vmem:[%s2829_s8 + $0xc8] sm:$0xff] %v1557_v45  ;;  %v1562_v52 = vadd.f32 %v2375_v27, %v1491_v46  ;;  %v1489_v53 = vadd.f32 %v1425_v43, %v745_v47  ;;  %v748_v54 = vadd.f32 %v2366_v19, %v677_v48  ;;  %v675_v55 = vmul.f32 %v2356_v16, %v499_v51  ;;  %v1250_v56 = vpop.f32.mrf.mxu1 }
 0x122   :  { %v1426_v57 = vmul.f32 %v2361_v17, %v1250_v56  ;;  %v1878_v58 = vpop.f32.mrf.mxu0 }
 0x123   :  { %1626 = vst [vmem:[%s2829_s8 + $0xf0] sm:$0xff] %v1562_v52  ;;  %v1560_v59 = vadd.f32 %v2375_v27, %v1489_v53  ;;  %v1492_v60 = vadd.f32 %v1428_v50, %v748_v54  ;;  %v746_v61 = vadd.f32 %v2366_v19, %v675_v55  ;;  %v680_v62 = vmul.f32 %v1878_v58, %v2356_v16  ;;  %v1958_v63 = vpop.f32.mrf.mxu1 }
 0x124   :  { %v1431_v0 = vmul.f32 %v1958_v63, %v2361_v17  ;;  %v512_v1 = vpop.f32.mrf.mxu0 }
 0x125   :  { %1624 = vst [vmem:[%s2829_s8 + $0xe0] sm:$0xff] %v1560_v59  ;;  %v1563_v2 = vadd.f32 %v2375_v27, %v1492_v60  ;;  %v1490_v3 = vadd.f32 %v1426_v57, %v746_v61  ;;  %v751_v4 = vadd.f32 %v2366_v19, %v680_v62  ;;  %v678_v5 = vmul.f32 %v2356_v16, %v512_v1  ;;  %v1263_v6 = vpop.f32.mrf.mxu1 }
 0x126   :  { %v1429_v7 = vmul.f32 %v2361_v17, %v1263_v6  ;;  %v1879_v8 = vpop.f32.mrf.mxu0 }
 0x127   :  { %1627 = vst [vmem:[%s2829_s8 + $0xf8] sm:$0xff] %v1563_v2  ;;  %v1561_v9 = vadd.f32 %v2375_v27, %v1490_v3  ;;  %v1495_v10 = vadd.f32 %v1431_v0, %v751_v4  ;;  %v749_v11 = vadd.f32 %v2366_v19, %v678_v5  ;;  %v681_v12 = vmul.f32 %v1879_v8, %v2356_v16  ;;  %v1959_v13 = vpop.f32.mrf.mxu1 }
 0x128   :  { %v1432_v14 = vmul.f32 %v1959_v13, %v2361_v17  ;;  %v515_v15 = vpop.f32.mrf.mxu0 }
 0x129   :  { %1625 = vst [vmem:[%s2829_s8 + $0xe8] sm:$0xff] %v1561_v9  ;;  %v1566_v18 = vadd.f32 %v2375_v27, %v1495_v10  ;;  %v1493_v20 = vadd.f32 %v1429_v7, %v749_v11  ;;  %v752_v21 = vadd.f32 %v2366_v19, %v681_v12  ;;  %v679_v22 = vmul.f32 %v2356_v16, %v515_v15  ;;  %v1266_v23 = vpop.f32.mrf.mxu1 }
 0x12a   :  { %v1430_v24 = vmul.f32 %v2361_v17, %v1266_v23  ;;  %v1882_v25 = vpop.f32.mrf.mxu0 }
 0x12b   :  { %1630 = vst [vmem:[%s2829_s8 + $0x110] sm:$0xff] %v1566_v18  ;;  %v1564_v26 = vadd.f32 %v2375_v27, %v1493_v20  ;;  %v1496_v28 = vadd.f32 %v1432_v14, %v752_v21  ;;  %v750_v29 = vadd.f32 %v2366_v19, %v679_v22  ;;  %v684_v30 = vmul.f32 %v1882_v25, %v2356_v16  ;;  %v1962_v31 = vpop.f32.mrf.mxu1 }
 0x12c   :  { %v1435_v32 = vmul.f32 %v1962_v31, %v2361_v17  ;;  %v528_v33 = vpop.f32.mrf.mxu0 }
 0x12d   :  { %1628 = vst [vmem:[%s2829_s8 + $0x100] sm:$0xff] %v1564_v26  ;;  %v1567_v34 = vadd.f32 %v2375_v27, %v1496_v28  ;;  %v1494_v35 = vadd.f32 %v1430_v24, %v750_v29  ;;  %v755_v36 = vadd.f32 %v2366_v19, %v684_v30  ;;  %v682_v37 = vmul.f32 %v2356_v16, %v528_v33  ;;  %v1279_v38 = vpop.f32.mrf.mxu1 }
 0x12e   :  { %v1433_v39 = vmul.f32 %v2361_v17, %v1279_v38  ;;  %v1883_v40 = vpop.f32.mrf.mxu0 }
 0x12f   :  { %1631 = vst [vmem:[%s2829_s8 + $0x118] sm:$0xff] %v1567_v34  ;;  %v1565_v41 = vadd.f32 %v2375_v27, %v1494_v35  ;;  %v1499_v42 = vadd.f32 %v1435_v32, %v755_v36  ;;  %v753_v43 = vadd.f32 %v2366_v19, %v682_v37  ;;  %v685_v44 = vmul.f32 %v1883_v40, %v2356_v16  ;;  %v1963_v45 = vpop.f32.mrf.mxu1 }
 0x130   :  { %v1436_v46 = vmul.f32 %v1963_v45, %v2361_v17  ;;  %v531_v47 = vpop.f32.mrf.mxu0 }
 0x131   :  { %1629 = vst [vmem:[%s2829_s8 + $0x108] sm:$0xff] %v1565_v41  ;;  %v1570_v48 = vadd.f32 %v2375_v27, %v1499_v42  ;;  %v1497_v49 = vadd.f32 %v1433_v39, %v753_v43  ;;  %v756_v50 = vadd.f32 %v2366_v19, %v685_v44  ;;  %v683_v51 = vmul.f32 %v2356_v16, %v531_v47  ;;  %v1282_v52 = vpop.f32.mrf.mxu1 }
 0x132   :  { %v1434_v53 = vmul.f32 %v2361_v17, %v1282_v52  ;;  %v1886_v54 = vpop.f32.mrf.mxu0 }
 0x133   :  { %1634 = vst [vmem:[%s2829_s8 + $0x130] sm:$0xff] %v1570_v48  ;;  %v1568_v55 = vadd.f32 %v2375_v27, %v1497_v49  ;;  %v1500_v56 = vadd.f32 %v1436_v46, %v756_v50  ;;  %v754_v57 = vadd.f32 %v2366_v19, %v683_v51  ;;  %v688_v58 = vmul.f32 %v1886_v54, %v2356_v16  ;;  %v1966_v59 = vpop.f32.mrf.mxu1 }
 0x134   :  { %v1439_v60 = vmul.f32 %v1966_v59, %v2361_v17  ;;  %v544_v61 = vpop.f32.mrf.mxu0 }
 0x135   :  { %1632 = vst [vmem:[%s2829_s8 + $0x120] sm:$0xff] %v1568_v55  ;;  %v1571_v62 = vadd.f32 %v2375_v27, %v1500_v56  ;;  %v1498_v63 = vadd.f32 %v1434_v53, %v754_v57  ;;  %v759_v0 = vadd.f32 %v2366_v19, %v688_v58  ;;  %v686_v1 = vmul.f32 %v2356_v16, %v544_v61  ;;  %v1295_v2 = vpop.f32.mrf.mxu1 }
 0x136   :  { %v1437_v3 = vmul.f32 %v2361_v17, %v1295_v2  ;;  %v1887_v4 = vpop.f32.mrf.mxu0 }
 0x137   :  { %1635 = vst [vmem:[%s2829_s8 + $0x138] sm:$0xff] %v1571_v62  ;;  %v1569_v5 = vadd.f32 %v2375_v27, %v1498_v63  ;;  %v1503_v6 = vadd.f32 %v1439_v60, %v759_v0  ;;  %v757_v7 = vadd.f32 %v2366_v19, %v686_v1  ;;  %v689_v8 = vmul.f32 %v1887_v4, %v2356_v16  ;;  %v1967_v9 = vpop.f32.mrf.mxu1 }
 0x138   :  { %v1440_v10 = vmul.f32 %v1967_v9, %v2361_v17  ;;  %v547_v11 = vpop.f32.mrf.mxu0 }
 0x139   :  { %1633 = vst [vmem:[%s2829_s8 + $0x128] sm:$0xff] %v1569_v5  ;;  %v1574_v12 = vadd.f32 %v2375_v27, %v1503_v6  ;;  %v1501_v13 = vadd.f32 %v1437_v3, %v757_v7  ;;  %v760_v14 = vadd.f32 %v2366_v19, %v689_v8  ;;  %v687_v15 = vmul.f32 %v2356_v16, %v547_v11  ;;  %v1298_v18 = vpop.f32.mrf.mxu1 }
 0x13a   :  { %v1438_v20 = vmul.f32 %v2361_v17, %v1298_v18  ;;  %v1890_v21 = vpop.f32.mrf.mxu0 }
 0x13b   :  { %1638 = vst [vmem:[%s2829_s8 + $0x150] sm:$0xff] %v1574_v12  ;;  %v1572_v22 = vadd.f32 %v2375_v27, %v1501_v13  ;;  %v1504_v23 = vadd.f32 %v1440_v10, %v760_v14  ;;  %v758_v24 = vadd.f32 %v2366_v19, %v687_v15  ;;  %v692_v25 = vmul.f32 %v1890_v21, %v2356_v16  ;;  %v1970_v26 = vpop.f32.mrf.mxu1 }
 0x13c   :  { %v1443_v28 = vmul.f32 %v1970_v26, %v2361_v17  ;;  %v560_v29 = vpop.f32.mrf.mxu0 }
 0x13d   :  { %1636 = vst [vmem:[%s2829_s8 + $0x140] sm:$0xff] %v1572_v22  ;;  %v1575_v30 = vadd.f32 %v2375_v27, %v1504_v23  ;;  %v1502_v31 = vadd.f32 %v1438_v20, %v758_v24  ;;  %v763_v32 = vadd.f32 %v2366_v19, %v692_v25  ;;  %v690_v33 = vmul.f32 %v2356_v16, %v560_v29  ;;  %v1311_v34 = vpop.f32.mrf.mxu1 }
 0x13e   :  { %v1441_v35 = vmul.f32 %v2361_v17, %v1311_v34  ;;  %v1891_v36 = vpop.f32.mrf.mxu0 }
 0x13f   :  { %1639 = vst [vmem:[%s2829_s8 + $0x158] sm:$0xff] %v1575_v30  ;;  %v1573_v37 = vadd.f32 %v2375_v27, %v1502_v31  ;;  %v1507_v38 = vadd.f32 %v1443_v28, %v763_v32  ;;  %v761_v39 = vadd.f32 %v2366_v19, %v690_v33  ;;  %v693_v40 = vmul.f32 %v1891_v36, %v2356_v16  ;;  %v1971_v41 = vpop.f32.mrf.mxu1 }
 0x140   :  { %v1444_v42 = vmul.f32 %v1971_v41, %v2361_v17  ;;  %v563_v43 = vpop.f32.mrf.mxu0 }
 0x141   :  { %1637 = vst [vmem:[%s2829_s8 + $0x148] sm:$0xff] %v1573_v37  ;;  %v1578_v44 = vadd.f32 %v2375_v27, %v1507_v38  ;;  %v1505_v45 = vadd.f32 %v1441_v35, %v761_v39  ;;  %v764_v46 = vadd.f32 %v2366_v19, %v693_v40  ;;  %v691_v47 = vmul.f32 %v2356_v16, %v563_v43  ;;  %v1314_v48 = vpop.f32.mrf.mxu1 }
 0x142   :  { %v1442_v49 = vmul.f32 %v2361_v17, %v1314_v48  ;;  %v1894_v50 = vpop.f32.mrf.mxu0 }
 0x143   :  { %1642 = vst [vmem:[%s2829_s8 + $0x170] sm:$0xff] %v1578_v44  ;;  %v1576_v51 = vadd.f32 %v2375_v27, %v1505_v45  ;;  %v1508_v52 = vadd.f32 %v1444_v42, %v764_v46  ;;  %v762_v53 = vadd.f32 %v2366_v19, %v691_v47  ;;  %v696_v54 = vmul.f32 %v1894_v50, %v2356_v16  ;;  %v1974_v55 = vpop.f32.mrf.mxu1 }
 0x144   :  { %v1447_v56 = vmul.f32 %v1974_v55, %v2361_v17  ;;  %v576_v57 = vpop.f32.mrf.mxu0 }
 0x145   :  { %1640 = vst [vmem:[%s2829_s8 + $0x160] sm:$0xff] %v1576_v51  ;;  %v1579_v58 = vadd.f32 %v2375_v27, %v1508_v52  ;;  %v1506_v59 = vadd.f32 %v1442_v49, %v762_v53  ;;  %v767_v60 = vadd.f32 %v2366_v19, %v696_v54  ;;  %v694_v61 = vmul.f32 %v2356_v16, %v576_v57  ;;  %v1327_v62 = vpop.f32.mrf.mxu1 }
 0x146   :  { %v1445_v63 = vmul.f32 %v2361_v17, %v1327_v62  ;;  %v1895_v0 = vpop.f32.mrf.mxu0 }
 0x147   :  { %1643 = vst [vmem:[%s2829_s8 + $0x178] sm:$0xff] %v1579_v58  ;;  %v1577_v1 = vadd.f32 %v2375_v27, %v1506_v59  ;;  %v1511_v2 = vadd.f32 %v1447_v56, %v767_v60  ;;  %v765_v3 = vadd.f32 %v2366_v19, %v694_v61  ;;  %v697_v4 = vmul.f32 %v1895_v0, %v2356_v16  ;;  %v1975_v5 = vpop.f32.mrf.mxu1 }
 0x148   :  { %v1448_v6 = vmul.f32 %v1975_v5, %v2361_v17  ;;  %v579_v7 = vpop.f32.mrf.mxu0 }
 0x149   :  { %1641 = vst [vmem:[%s2829_s8 + $0x168] sm:$0xff] %v1577_v1  ;;  %v1582_v8 = vadd.f32 %v2375_v27, %v1511_v2  ;;  %v1509_v9 = vadd.f32 %v1445_v63, %v765_v3  ;;  %v768_v10 = vadd.f32 %v2366_v19, %v697_v4  ;;  %v695_v11 = vmul.f32 %v2356_v16, %v579_v7  ;;  %v1330_v12 = vpop.f32.mrf.mxu1 }
 0x14a   :  { %v1446_v13 = vmul.f32 %v2361_v17, %v1330_v12  ;;  %v1898_v14 = vpop.f32.mrf.mxu0 }
 0x14b   :  { %1646 = vst [vmem:[%s2829_s8 + $0x190] sm:$0xff] %v1582_v8  ;;  %v1580_v15 = vadd.f32 %v2375_v27, %v1509_v9  ;;  %v1512_v18 = vadd.f32 %v1448_v6, %v768_v10  ;;  %v766_v20 = vadd.f32 %v2366_v19, %v695_v11  ;;  %v700_v21 = vmul.f32 %v1898_v14, %v2356_v16  ;;  %v1978_v22 = vpop.f32.mrf.mxu1 }
 0x14c   :  { %v1451_v23 = vmul.f32 %v1978_v22, %v2361_v17  ;;  %v592_v24 = vpop.f32.mrf.mxu0 }
 0x14d   :  { %1644 = vst [vmem:[%s2829_s8 + $0x180] sm:$0xff] %v1580_v15  ;;  %v1583_v25 = vadd.f32 %v2375_v27, %v1512_v18  ;;  %v1510_v26 = vadd.f32 %v1446_v13, %v766_v20  ;;  %v771_v28 = vadd.f32 %v2366_v19, %v700_v21  ;;  %v698_v29 = vmul.f32 %v2356_v16, %v592_v24  ;;  %v1343_v30 = vpop.f32.mrf.mxu1 }
 0x14e   :  { %v1449_v31 = vmul.f32 %v2361_v17, %v1343_v30  ;;  %v1899_v32 = vpop.f32.mrf.mxu0 }
 0x14f   :  { %1647 = vst [vmem:[%s2829_s8 + $0x198] sm:$0xff] %v1583_v25  ;;  %v1581_v33 = vadd.f32 %v2375_v27, %v1510_v26  ;;  %v1515_v34 = vadd.f32 %v1451_v23, %v771_v28  ;;  %v769_v35 = vadd.f32 %v2366_v19, %v698_v29  ;;  %v701_v36 = vmul.f32 %v1899_v32, %v2356_v16  ;;  %v1979_v37 = vpop.f32.mrf.mxu1 }
 0x150   :  { %v1452_v38 = vmul.f32 %v1979_v37, %v2361_v17  ;;  %v595_v39 = vpop.f32.mrf.mxu0 }
 0x151   :  { %1645 = vst [vmem:[%s2829_s8 + $0x188] sm:$0xff] %v1581_v33  ;;  %v1586_v40 = vadd.f32 %v2375_v27, %v1515_v34  ;;  %v1513_v41 = vadd.f32 %v1449_v31, %v769_v35  ;;  %v772_v42 = vadd.f32 %v2366_v19, %v701_v36  ;;  %v699_v43 = vmul.f32 %v2356_v16, %v595_v39  ;;  %v1346_v44 = vpop.f32.mrf.mxu1 }
 0x152   :  { %v1450_v45 = vmul.f32 %v2361_v17, %v1346_v44  ;;  %v1902_v46 = vpop.f32.mrf.mxu0 }
 0x153   :  { %1650 = vst [vmem:[%s2829_s8 + $0x1b0] sm:$0xff] %v1586_v40  ;;  %v1584_v47 = vadd.f32 %v2375_v27, %v1513_v41  ;;  %v1516_v48 = vadd.f32 %v1452_v38, %v772_v42  ;;  %v770_v49 = vadd.f32 %v2366_v19, %v699_v43  ;;  %v704_v50 = vmul.f32 %v1902_v46, %v2356_v16  ;;  %v1982_v51 = vpop.f32.mrf.mxu1 }
 0x154   :  { %v1455_v52 = vmul.f32 %v1982_v51, %v2361_v17  ;;  %v608_v53 = vpop.f32.mrf.mxu0 }
 0x155   :  { %1648 = vst [vmem:[%s2829_s8 + $0x1a0] sm:$0xff] %v1584_v47  ;;  %v1587_v54 = vadd.f32 %v2375_v27, %v1516_v48  ;;  %v1514_v55 = vadd.f32 %v1450_v45, %v770_v49  ;;  %v775_v56 = vadd.f32 %v2366_v19, %v704_v50  ;;  %v702_v57 = vmul.f32 %v2356_v16, %v608_v53  ;;  %v1359_v58 = vpop.f32.mrf.mxu1 }
 0x156   :  { %v1453_v59 = vmul.f32 %v2361_v17, %v1359_v58  ;;  %v1903_v60 = vpop.f32.mrf.mxu0 }
 0x157   :  { %1651 = vst [vmem:[%s2829_s8 + $0x1b8] sm:$0xff] %v1587_v54  ;;  %v1585_v61 = vadd.f32 %v2375_v27, %v1514_v55  ;;  %v1519_v62 = vadd.f32 %v1455_v52, %v775_v56  ;;  %v773_v63 = vadd.f32 %v2366_v19, %v702_v57  ;;  %v705_v0 = vmul.f32 %v1903_v60, %v2356_v16  ;;  %v1983_v1 = vpop.f32.mrf.mxu1 }
 0x158   :  { %v1456_v2 = vmul.f32 %v1983_v1, %v2361_v17  ;;  %v611_v3 = vpop.f32.mrf.mxu0 }
 0x159   :  { %1649 = vst [vmem:[%s2829_s8 + $0x1a8] sm:$0xff] %v1585_v61  ;;  %v1590_v4 = vadd.f32 %v2375_v27, %v1519_v62  ;;  %v1517_v5 = vadd.f32 %v1453_v59, %v773_v63  ;;  %v776_v6 = vadd.f32 %v2366_v19, %v705_v0  ;;  %v703_v7 = vmul.f32 %v2356_v16, %v611_v3  ;;  %v1362_v8 = vpop.f32.mrf.mxu1 }
 0x15a   :  { %v1454_v9 = vmul.f32 %v2361_v17, %v1362_v8  ;;  %v1906_v10 = vpop.f32.mrf.mxu0 }
 0x15b   :  { %1654 = vst [vmem:[%s2829_s8 + $0x1d0] sm:$0xff] %v1590_v4  ;;  %v1588_v11 = vadd.f32 %v2375_v27, %v1517_v5  ;;  %v1520_v12 = vadd.f32 %v1456_v2, %v776_v6  ;;  %v774_v13 = vadd.f32 %v2366_v19, %v703_v7  ;;  %v708_v14 = vmul.f32 %v1906_v10, %v2356_v16  ;;  %v1986_v15 = vpop.f32.mrf.mxu1 }
 0x15c   :  { %v1459_v18 = vmul.f32 %v1986_v15, %v2361_v17  ;;  %v624_v20 = vpop.f32.mrf.mxu0 }
 0x15d   :  { %1652 = vst [vmem:[%s2829_s8 + $0x1c0] sm:$0xff] %v1588_v11  ;;  %v1591_v21 = vadd.f32 %v2375_v27, %v1520_v12  ;;  %v1518_v22 = vadd.f32 %v1454_v9, %v774_v13  ;;  %v779_v23 = vadd.f32 %v2366_v19, %v708_v14  ;;  %v706_v24 = vmul.f32 %v2356_v16, %v624_v20  ;;  %v1375_v25 = vpop.f32.mrf.mxu1 }
 0x15e   :  { %v1457_v26 = vmul.f32 %v2361_v17, %v1375_v25  ;;  %v1907_v28 = vpop.f32.mrf.mxu0 }
 0x15f   :  { %1655 = vst [vmem:[%s2829_s8 + $0x1d8] sm:$0xff] %v1591_v21  ;;  %v1589_v29 = vadd.f32 %v2375_v27, %v1518_v22  ;;  %v1523_v30 = vadd.f32 %v1459_v18, %v779_v23  ;;  %v777_v31 = vadd.f32 %v2366_v19, %v706_v24  ;;  %v709_v32 = vmul.f32 %v1907_v28, %v2356_v16  ;;  %v1987_v33 = vpop.f32.mrf.mxu1 }
 0x160   :  { %v1460_v34 = vmul.f32 %v1987_v33, %v2361_v17  ;;  %v627_v35 = vpop.f32.mrf.mxu0 }
 0x161   :  { %1653 = vst [vmem:[%s2829_s8 + $0x1c8] sm:$0xff] %v1589_v29  ;;  %v1594_v36 = vadd.f32 %v2375_v27, %v1523_v30  ;;  %v1521_v37 = vadd.f32 %v1457_v26, %v777_v31  ;;  %v780_v38 = vadd.f32 %v2366_v19, %v709_v32  ;;  %v707_v39 = vmul.f32 %v2356_v16, %v627_v35  ;;  %v1378_v40 = vpop.f32.mrf.mxu1 }
 0x162   :  { %v1458_v44 = vmul.f32 %v2361_v17, %v1378_v40 }
 0x163   :  { %1658 = vst [vmem:[%s2829_s8 + $0x1f0] sm:$0xff] %v1594_v36  ;;  %v1592_v41 = vadd.f32 %v2375_v27, %v1521_v37  ;;  %v1524_v42 = vadd.f32 %v1460_v34, %v780_v38  ;;  %v778_v43 = vadd.f32 %v2366_v19, %v707_v39 }
 0x165   :  { %1656 = vst [vmem:[%s2829_s8 + $0x1e0] sm:$0xff] %v1592_v41  ;;  %v1595_v45 = vadd.f32 %v2375_v27, %v1524_v42  ;;  %v1522_v46 = vadd.f32 %v1458_v44, %v778_v43 }
 0x167   :  { %1659 = vst [vmem:[%s2829_s8 + $0x1f8] sm:$0xff] %v1595_v45  ;;  %v1593_v16 = vadd.f32 %v2375_v27, %v1522_v46 }
 0x169   :  { %1657 = vst [vmem:[%s2829_s8 + $0x1e8] sm:$0xff] %v1593_v16 }

// kernel: residual_bottleneck_forward.4
= control target key start
LH: loop header
LB: loop body
LE: loop exit
PB: predicated region body
PF: predicated region fallthrough
CT: control target
= control target key end

     0   :  { %s7033_s15 = smov 0   ;;  %s7035_s16 = smov 0   ;;  %s9753_s0 = inlined_call_operand.vmem [shape: bf16[2,1,18,18,128], index: 0, kind: input, shape index: {}]   ;;  %s9754_s1 = inlined_call_operand.vmem [shape: bf16[9,128,128], index: 1, kind: input, shape index: {}]   ;;  %s9755_s2 = inlined_call_operand.vmem [shape: f32[1,128], index: 2, kind: input, shape index: {}]   ;;  %s9756_s3 = inlined_call_operand.vmem [shape: f32[1,128], index: 3, kind: input, shape index: {}]   ;;  %s9757_s4 = inlined_call_operand.vmem [shape: bf16[2,16,16,128], index: 4, kind: output, shape index: {}]  }
   0x1   :  { %s7037_s17 = smov 0  }
   0x2 LB: > { %s26_s18 = sadd.s32 1, %s7002_s16  ;;  %p5414_p0 = scmp.ge.s32.totalorder %s7006_s17, 1  ;;  %s7006_s17 = sphi %s7037_s17, %s14_s17   ;;  %s7002_s16 = sphi %s7035_s16, %s9952_s16   ;;  %s6998_s15 = sphi %s7033_s15, %s9951_s15  }
   0x3   : > { %p28_p1 = scmp.ge.s32.totalorder %s26_s18, 2  ;;  %p176_p2 = scmp.lt.s32.totalorder %s7006_s17, 3 }
   0x5   : > { %s9954_s18 = smov (%p28_p1, %s26_s18), 0  ;;  %p177_p3 = pnand %p5414_p0, %p176_p2 }
   0x7   : > { %180 = sbr.rel (%p177_p3) target bundleno = 561 (0x231), region = 36 }
   0xc   : > { %v6855_v0 = vld [vmem:[%s9754_s1 + $0x78] sm:$0xff]   ;;  %p207_p4 = scmp.lt.s32.totalorder %s6998_s15, 1  ;;  %v6856_v1 = vld [vmem:[%s9754_s1 + $0x70] sm:$0xff]   ;;  %v6857_v2 = vld [vmem:[%s9754_s1 + $0x68] sm:$0xff]   ;;  %vm292_vm0 = vsmask.f32 3328 }
   0xd   : > { %6382 = vmatprep.subr.bf16.mxu0 %v6855_v0  ;;  %6814 = vmatprep.subr.bf16.mxu1 %v6855_v0  ;;  %v6858_v3 = vld [vmem:[%s9754_s1 + $0x60] sm:$0xff]   ;;  %vm293_vm1 = vsmask.f32 7440  ;;  %v6859_v17 = vld [vmem:[%s9754_s1 + $0x58] sm:$0xff]   ;;  %v6860_v33 = vld [vmem:[%s9754_s1 + $0x50] sm:$0xff]   ;;  %vm1322_vm3 = vcmask 1042432  }
   0xe   : > { %s9956_s15 = smov (!%p207_p4, %s6998_s15), 1  ;;  %6383 = vmatpush3.bf16.msra.mxu0 %v6855_v0  ;;  %6822 = vmatpush3.bf16.msra.mxu1 %v6855_v0  ;;  %vm7097_vm2 = vmor %vm292_vm0, %vm293_vm1  ;;  %v6861_v58 = vld [vmem:[%s9754_s1 + $0x48] sm:$0xff]   ;;  %vm1323_vm4 = vcmask 1046532  }
   0xf   : > { %6384 = vmatprep.subr.bf16.mxu0 %v6856_v1  ;;  %6815 = vmatprep.subr.bf16.mxu1 %v6856_v1  ;;  %s6830_s25 = smul.u32 216, %s9956_s15  ;;  %vm7408_vm5 = vmor %vm1322_vm3, %vm1323_vm4  ;;  %s6038_s22 = sshll.u32 %s9956_s15, 7 }
  0x10   : > { %s9624_s24 = scalar_lea.vmem %s9757_s4, %s6038_s22 }
  0x11   : > { %s7066_s28 = scalar_lea.vmem %s9753_s0, %s6830_s25 }
  0x12   : > { %6385 = vmatpush3.bf16.msra.mxu0 %v6856_v1  ;;  %6823 = vmatpush3.bf16.msra.mxu1 %v6856_v1  ;;  %v7072_v4 = vld [vmem:[%s7066_s28] sm:$0xf]  ;;  %v7075_v5 = vld [vmem:[%s7066_s28 + $0x4] sm:$0xf]  ;;  %v7078_v6 = vld [vmem:[%s7066_s28 + $0x8] sm:$0x1] }
  0x13   : > { %6386 = vmatprep.subr.bf16.mxu0 %v6857_v2  ;;  %6816 = vmatprep.subr.bf16.mxu1 %v6857_v2  ;;  %v296_v7 = vshrl.u32 %v7072_v4, 16  ;;  %v299_v8 = vshll.u32 %v7072_v4, 16  ;;  %v305_v9 = vshll.u32 %v7075_v5, 16  ;;  %v309_v10 = vshrl.u32 %v7075_v5, 16  ;;  %v244_v12 = vld [vmem:[%s7066_s28 + $0x60] sm:$0xf] }
  0x14   : > { %v315_v11 = vshll.u32 %v7078_v6, 16  ;;  %v245_v15 = vld [vmem:[%s7066_s28 + $0x64] sm:$0xf]  ;;  %v284_v16 = vld [vmem:[%s7066_s28 + $0x68] sm:$0x1]  ;;  %v488_v21 = vshrl.u32 %v244_v12, 16 }
  0x15   : > { %v298_v13 = vrot.slane %v296_v7, 4  ;;  %v301_v14 = vrot.slane %v299_v8, 5  ;;  %v307_v18 = vrot.slane %v305_v9, 5  ;;  %v311_v19 = vrot.slane %v309_v10, 4  ;;  %v7093_v26 = vld [vmem:[%s7066_s28 + $0xc] sm:$0xf] }
  0x16   : > { %6387 = vmatpush3.bf16.msra.mxu0 %v6857_v2  ;;  %6824 = vmatpush3.bf16.msra.mxu1 %v6857_v2  ;;  %v491_v23 = vshll.u32 %v244_v12, 16  ;;  %v497_v24 = vshll.u32 %v245_v15, 16  ;;  %v501_v25 = vshrl.u32 %v245_v15, 16  ;;  %v317_v29 = vrot.slane %v315_v11, 5  ;;  %v7102_v32 = vld [vmem:[%s7066_s28 + $0x10] sm:$0xf] }
  0x17   : > { %6388 = vmatprep.subr.bf16.mxu0 %v6858_v3  ;;  %6817 = vmatprep.subr.bf16.mxu1 %v6858_v3  ;;  %v302_v22 = vor.u32 %v301_v14, %v298_v13  ;;  %v312_v28 = vor.u32 %v311_v19, %v307_v18  ;;  %v490_v30 = vrot.slane %v488_v21, 4  ;;  %v507_v31 = vshll.u32 %v284_v16, 16  ;;  %v7108_v40 = vld [vmem:[%s7066_s28 + $0x14] sm:$0x1]  ;;  %v246_v47 = vld [vmem:[%s7066_s28 + $0x6c] sm:$0xf] }
  0x18   : > { %v493_v35 = vrot.slane %v491_v23, 5  ;;  %v499_v36 = vrot.slane %v497_v24, 5  ;;  %v503_v37 = vrot.slane %v501_v25, 4  ;;  %v320_v41 = vshrl.u32 %v7093_v26, 16  ;;  %v247_v52 = vld [vmem:[%s7066_s28 + $0x70] sm:$0xf] }
  0x19   : > { %v303_v34 = vrot.slane %v302_v22, 4  ;;  %v313_v38 = vrot.slane %v312_v28, 4  ;;  %v509_v39 = vrot.slane %v507_v31, 5  ;;  %v323_v42 = vshll.u32 %v7093_v26, 16  ;;  %v285_v57 = vld [vmem:[%s7066_s28 + $0x74] sm:$0x1] }
  0x1a   : > { %6389 = vmatpush3.bf16.msra.mxu0 %v6858_v3  ;;  %6825 = vmatpush3.bf16.msra.mxu1 %v6858_v3  ;;  %v494_v44 = vor.u32 %v493_v35, %v490_v30  ;;  %v504_v45 = vor.u32 %v503_v37, %v499_v36  ;;  %v329_v46 = vshll.u32 %v7102_v32, 16  ;;  %v322_v49 = vrot.slane %v320_v41, 4  ;;  %v7131_v14 = vld [vmem:[%s7066_s28 + $0x18] sm:$0xf]  ;;  %v6862_v15 = vld [vmem:[%s9754_s1 + $0x40] sm:$0xff]  }
  0x1b   : > { %6390 = vmatprep.subr.bf16.mxu0 %v6859_v17  ;;  %6818 = vmatprep.subr.bf16.mxu1 %v6859_v17  ;;  %v308_v43 = vsel %vm7097_vm2, %v303_v34, %v307_v18  ;;  %v318_v48 = vsel %vm7097_vm2, %v313_v38, %v317_v29  ;;  %v325_v50 = vrot.slane %v323_v42, 5  ;;  %v333_v51 = vshrl.u32 %v7102_v32, 16  ;;  %v7139_v19 = vld [vmem:[%s7066_s28 + $0x1c] sm:$0xf]  ;;  %v7144_v25 = vld [vmem:[%s7066_s28 + $0x20] sm:$0x1] }
  0x1c   : > { %v5434_v53 = vcombine.low %v308_v43, %v318_v48  ;;  %v495_v54 = vrot.slane %v494_v44, 4  ;;  %v505_v55 = vrot.slane %v504_v45, 4  ;;  %v331_v56 = vrot.slane %v329_v46, 5  ;;  %v248_v34 = vld [vmem:[%s7066_s28 + $0x78] sm:$0xf] }
  0x1d   : > { %v326_v59 = vor.u32 %v325_v50, %v322_v49  ;;  %v335_v60 = vrot.slane %v333_v51, 4  ;;  %v339_v61 = vshll.u32 %v7108_v40, 16  ;;  %v512_v1 = vshrl.u32 %v246_v47, 16  ;;  %v6863_v41 = vld [vmem:[%s9754_s1 + $0x38] sm:$0xff]   ;;  %v286_v49 = vld [vmem:[%s7066_s28 + $0x80] sm:$0x1] }
  0x1e   : > { %6391 = vmatpush3.bf16.msra.mxu0 %v6859_v17  ;;  %6826 = vmatpush3.bf16.msra.mxu1 %v6859_v17  ;;  %v500_v63 = vsel %vm7097_vm2, %v495_v54, %v499_v36  ;;  %v510_v0 = vsel %vm7097_vm2, %v505_v55, %v509_v39  ;;  %v515_v2 = vshll.u32 %v246_v47, 16  ;;  %v521_v12 = vshll.u32 %v247_v52, 16  ;;  %v7153_v39 = vld [vmem:[%s7066_s28 + $0x7c] sm:$0xf] }
  0x1f   : > { %6392 = vmatprep.subr.bf16.mxu0 %v6860_v33  ;;  %6819 = vmatprep.subr.bf16.mxu1 %v6860_v33  ;;  %v5442_v3 = vcombine.low %v500_v63, %v510_v0  ;;  %v327_v7 = vrot.slane %v326_v59, 4  ;;  %v336_v8 = vor.u32 %v335_v60, %v331_v56  ;;  %v341_v9 = vrot.slane %v339_v61, 5  ;;  %v6864_v42 = vld [vmem:[%s9754_s1 + $0xb8] sm:$0xff]   ;;  %v6866_v59 = vld [vmem:[%s9754_s1 + $0xb0] sm:$0xff]   ;;  %v7180_v0 = vld [vmem:[%s7066_s28 + $0x28] sm:$0xf] }
  0x20   : > { %6398 = vmatprep.mubr.bf16.mxu0 %v5434_v53  ;;  %v514_v10 = vrot.slane %v512_v1, 4  ;;  %v517_v11 = vrot.slane %v515_v2, 5  ;;  %v525_v13 = vshrl.u32 %v247_v52, 16  ;;  %v531_v18 = vshll.u32 %v285_v57, 16  ;;  %v6865_v52 = vld [vmem:[%s9754_s1 + $0x30] sm:$0xff]  }
  0x21   : > { %v332_v16 = vsel %vm7097_vm2, %v327_v7, %v331_v56  ;;  %v337_v17 = vrot.slane %v336_v8, 4  ;;  %6414 = vmatprep.mubr.bf16.mxu1 %v5442_v3  ;;  %v523_v23 = vrot.slane %v521_v12, 5  ;;  %v344_v28 = vshrl.u32 %v7131_v14, 16  ;;  %v7171_v57 = vld [vmem:[%s7066_s28 + $0x24] sm:$0xf] }
  0x22   : > { %6393 = vmatpush3.bf16.msra.mxu0 %v6860_v33  ;;  %6827 = vmatpush3.bf16.msra.mxu1 %v6860_v33  ;;  %v518_v22 = vor.u32 %v517_v11, %v514_v10  ;;  %v527_v24 = vrot.slane %v525_v13, 4  ;;  %v533_v30 = vrot.slane %v531_v18, 5  ;;  %v347_v31 = vshll.u32 %v7131_v14, 16  ;;  %v7183_v8 = vld [vmem:[%s7066_s28 + $0x2c] sm:$0x1] }
  0x23   : > { %6394 = vmatprep.subr.bf16.mxu0 %v6861_v58  ;;  %6820 = vmatprep.subr.bf16.mxu1 %v6861_v58  ;;  %v342_v29 = vsel %vm7097_vm2, %v337_v17, %v341_v9  ;;  %v353_v33 = vshll.u32 %v7139_v19, 16  ;;  %v346_v38 = vrot.slane %v344_v28, 4  ;;  %v357_v45 = vshrl.u32 %v7139_v19, 16  ;;  %v7187_v13 = vld [vmem:[%s7066_s28 + $0x84] sm:$0xf] }
  0x24   : > { %v5435_v35 = vcombine.low %v332_v16, %v342_v29  ;;  %v519_v36 = vrot.slane %v518_v22, 4  ;;  %v528_v37 = vor.u32 %v527_v24, %v523_v23  ;;  %v349_v43 = vrot.slane %v347_v31, 5  ;;  %v7194_v22 = vld [vmem:[%s7066_s28 + $0x88] sm:$0xf] }
  0x25   : > { %v355_v44 = vrot.slane %v353_v33, 5  ;;  %v363_v46 = vshll.u32 %v7144_v25, 16  ;;  %v536_v50 = vshrl.u32 %v248_v34, 16  ;;  %v539_v51 = vshll.u32 %v248_v34, 16 }
  0x26   : > { %6395 = vmatpush3.bf16.msra.mxu0 %v6861_v58  ;;  %6828 = vmatpush3.bf16.msra.mxu1 %v6861_v58  ;;  %v524_v47 = vsel %vm7097_vm2, %v519_v36, %v523_v23  ;;  %v529_v48 = vrot.slane %v528_v37, 4  ;;  %v350_v53 = vor.u32 %v349_v43, %v346_v38  ;;  %v359_v54 = vrot.slane %v357_v45, 4  ;;  %v7203_v36 = vld [vmem:[%s7066_s28 + $0x8c] sm:$0x1] }
  0x27   : > { %6396 = vmatprep.subr.bf16.mxu0 %v6862_v15  ;;  %6821 = vmatprep.subr.bf16.mxu1 %v6862_v15  ;;  %v365_v55 = vrot.slane %v363_v46, 5  ;;  %v545_v56 = vshll.u32 %v7153_v39, 16  ;;  %v538_v60 = vrot.slane %v536_v50, 4  ;;  %v541_v61 = vrot.slane %v539_v51, 5  ;;  %v6868_v37 = vld [vmem:[%s9754_s1 + $0xa8] sm:$0xff]  }
  0x28   : > { %v534_v58 = vsel %vm7097_vm2, %v529_v48, %v533_v30  ;;  %v549_v63 = vshrl.u32 %v7153_v39, 16  ;;  %v351_v2 = vrot.slane %v350_v53, 4  ;;  %v360_v3 = vor.u32 %v359_v54, %v355_v44  ;;  %v6867_v30 = vld [vmem:[%s9754_s1 + $0x28] sm:$0xff]   ;;  %v7218_v53 = vld [vmem:[%s7066_s28 + $0x30] sm:$0xf] }
  0x29   : > { %v5443_v1 = vcombine.low %v524_v47, %v534_v58  ;;  %v547_v7 = vrot.slane %v545_v56, 5  ;;  %v542_v9 = vor.u32 %v541_v61, %v538_v60  ;;  %v555_v11 = vshll.u32 %v286_v49, 16  ;;  %v7227_v60 = vld [vmem:[%s7066_s28 + $0x34] sm:$0xf] }
  0x2a   : > { %6397 = vmatpush3.bf16.msra.mxu0 %v6862_v15  ;;  %6829 = vmatpush3.bf16.msra.mxu1 %v6862_v15  ;;  %v551_v10 = vrot.slane %v549_v63, 4  ;;  %v368_v12 = vshrl.u32 %v7171_v57, 16  ;;  %v356_v15 = vsel %vm7097_vm2, %v351_v2, %v355_v44  ;;  %v361_v16 = vrot.slane %v360_v3, 4 }
  0x2b   : > { %6430 = vmatprep.subr.bf16.mxu1 %v6863_v41  ;;  %6478 = vmatprep.subr.bf16.mxu0 %v6864_v42  ;;  %v371_v17 = vshll.u32 %v7171_v57, 16  ;;  %v377_v18 = vshll.u32 %v7180_v0, 16  ;;  %v543_v23 = vrot.slane %v542_v9, 4  ;;  %v557_v28 = vrot.slane %v555_v11, 5 }
  0x2c   : > { %v552_v24 = vor.u32 %v551_v10, %v547_v7  ;;  %v370_v29 = vrot.slane %v368_v12, 4  ;;  %v366_v31 = vsel %vm7097_vm2, %v361_v16, %v365_v55  ;;  %v387_v43 = vshll.u32 %v7183_v8, 16  ;;  %v7235_v16 = vld [vmem:[%s7066_s28 + $0x38] sm:$0x1] }
  0x2d   : > { %6399 = vmatmul.mubr.bf16.vlgmr.msra.gmra.mxu0 %v5435_v35  ;;  %6415 = vmatmul.mubr.bf16.vlgmr.msra.gmra.mxu1 %v5443_v1  ;;  %v373_v33 = vrot.slane %v371_v17, 5  ;;  %v379_v34 = vrot.slane %v377_v18, 5  ;;  %v381_v35 = vshrl.u32 %v7180_v0, 16  ;;  %v5436_v38 = vcombine.low %v356_v15, %v366_v31  ;;  %v7239_v18 = vld [vmem:[%s7066_s28 + $0x90] sm:$0xf] }
  0x2e   : > { %6431 = vmatpush3.bf16.msra.mxu1 %v6863_v41  ;;  %6479 = vmatpush3.bf16.msra.mxu0 %v6864_v42  ;;  %v548_v41 = vsel %vm7097_vm2, %v543_v23, %v547_v7  ;;  %v553_v42 = vrot.slane %v552_v24, 4  ;;  %v560_v46 = vshrl.u32 %v7187_v13, 16  ;;  %v563_v47 = vshll.u32 %v7187_v13, 16  ;;  %v7245_v31 = vld [vmem:[%s7066_s28 + $0x94] sm:$0xf] }
  0x2f   : > { %6432 = vmatprep.subr.bf16.mxu1 %v6865_v52  ;;  %6480 = vmatprep.subr.bf16.mxu0 %v6866_v59  ;;  %v374_v44 = vor.u32 %v373_v33, %v370_v29  ;;  %v383_v45 = vrot.slane %v381_v35, 4  ;;  %v389_v49 = vrot.slane %v387_v43, 5  ;;  %v569_v50 = vshll.u32 %v7194_v22, 16 }
  0x30   : > { %v558_v48 = vsel %vm7097_vm2, %v553_v42, %v557_v28  ;;  %v573_v51 = vshrl.u32 %v7194_v22, 16  ;;  %6402 = vmatprep.mubr.bf16.mxu0 %v5436_v38  ;;  %v562_v58 = vrot.slane %v560_v46, 4  ;;  %v565_v61 = vrot.slane %v563_v47, 5  ;;  %v6872_v38 = vld [vmem:[%s9754_s1 + $0x98] sm:$0xff]   ;;  %v6873_v46 = vld [vmem:[%s9754_s1 + $0x10] sm:$0xff]  }
  0x31   : > { %v5444_v54 = vcombine.low %v548_v41, %v558_v48  ;;  %v375_v55 = vrot.slane %v374_v44, 4  ;;  %v384_v56 = vor.u32 %v383_v45, %v379_v34  ;;  %v571_v63 = vrot.slane %v569_v50, 5  ;;  %v7255_v44 = vld [vmem:[%s7066_s28 + $0x98] sm:$0x1] }
  0x32   : > { %6433 = vmatpush3.bf16.msra.mxu1 %v6865_v52  ;;  %6481 = vmatpush3.bf16.msra.mxu0 %v6866_v59  ;;  %v6869_v52 = vld [vmem:[%s9754_s1 + $0x20] sm:$0xff]   ;;  %v575_v1 = vrot.slane %v573_v51, 4  ;;  %v579_v2 = vshll.u32 %v7203_v36, 16  ;;  %v392_v9 = vshrl.u32 %v7218_v53, 16  ;;  %v395_v10 = vshll.u32 %v7218_v53, 16 }
  0x33   : > { %6434 = vmatprep.subr.bf16.mxu1 %v6867_v30  ;;  %v6870_v59 = vld [vmem:[%s9754_s1 + $0xa0] sm:$0xff]   ;;  %6482 = vmatprep.subr.bf16.mxu0 %v6868_v37  ;;  %v380_v3 = vsel %vm7097_vm2, %v375_v55, %v379_v34  ;;  %v385_v7 = vrot.slane %v384_v56, 4  ;;  %v566_v11 = vor.u32 %v565_v61, %v562_v58  ;;  %v401_v17 = vshll.u32 %v7227_v60, 16  ;;  %v7268_v51 = vld [vmem:[%s7066_s28 + $0x3c] sm:$0xf]  ;;  %v6874_v55 = vld [vmem:[%s9754_s1 + $0x90] sm:$0xff]  }
  0x34   : > { %6418 = vmatprep.mubr.bf16.mxu1 %v5444_v54  ;;  %v576_v12 = vor.u32 %v575_v1, %v571_v63  ;;  %v581_v15 = vrot.slane %v579_v2, 5  ;;  %v394_v24 = vrot.slane %v392_v9, 4  ;;  %v397_v28 = vrot.slane %v395_v10, 5  ;;  %v7271_v54 = vld [vmem:[%s7066_s28 + $0x40] sm:$0xf] }
  0x35   : > { %v390_v23 = vsel %vm7097_vm2, %v385_v7, %v389_v49  ;;  %v405_v29 = vshrl.u32 %v7227_v60, 16  ;;  %v567_v34 = vrot.slane %v566_v11, 4  ;;  %v411_v43 = vshll.u32 %v7235_v16, 16  ;;  %v7278_v7 = vld [vmem:[%s7066_s28 + $0x44] sm:$0x1] }
  0x36   : > { %6435 = vmatpush3.bf16.msra.mxu1 %v6867_v30  ;;  %6483 = vmatpush3.bf16.msra.mxu0 %v6868_v37  ;;  %v6871_v30 = vld [vmem:[%s9754_s1 + $0x18] sm:$0xff]   ;;  %v5437_v33 = vcombine.low %v380_v3, %v390_v23  ;;  %v577_v35 = vrot.slane %v576_v12, 4  ;;  %v403_v37 = vrot.slane %v401_v17, 5  ;;  %v398_v41 = vor.u32 %v397_v28, %v394_v24  ;;  %v7290_v28 = vld [vmem:[%s7066_s28 + $0xa0] sm:$0xf] }
  0x37   : > { %6436 = vmatprep.subr.bf16.mxu1 %v6869_v52  ;;  %6484 = vmatprep.subr.bf16.mxu0 %v6870_v59  ;;  %v407_v42 = vrot.slane %v405_v29, 4  ;;  %v584_v45 = vshrl.u32 %v7239_v18, 16  ;;  %v572_v47 = vsel %vm7097_vm2, %v567_v34, %v571_v63  ;;  %v587_v49 = vshll.u32 %v7239_v18, 16  ;;  %v7281_v9 = vld [vmem:[%s7066_s28 + $0x9c] sm:$0xf]  ;;  %v6875_v29 = vld [vmem:[%s9754_s1 + $0x8] sm:$0xff]  }
  0x38   : > { %6403 = vmatmul.mubr.bf16.gmra.mxu0 %v5437_v33  ;;  %v582_v48 = vsel %vm7097_vm2, %v577_v35, %v581_v15  ;;  %v593_v50 = vshll.u32 %v7245_v31, 16  ;;  %v399_v58 = vrot.slane %v398_v41, 4  ;;  %v413_v63 = vrot.slane %v411_v43, 5  ;;  %v6876_v41 = vld [vmem:[%s9754_s1 + $0x88] sm:$0xff]  }
  0x39   : > { %v5445_v56 = vcombine.low %v572_v47, %v582_v48  ;;  %v408_v61 = vor.u32 %v407_v42, %v403_v37  ;;  %v589_v1 = vrot.slane %v587_v49, 5  ;;  %v597_v3 = vshrl.u32 %v7245_v31, 16 }
  0x3a   : > { %6437 = vmatpush3.bf16.msra.mxu1 %v6869_v52  ;;  %6485 = vmatpush3.bf16.msra.mxu0 %v6870_v59  ;;  %v586_v52 = vrot.slane %v584_v45, 4  ;;  %v595_v2 = vrot.slane %v593_v50, 5  ;;  %v404_v10 = vsel %vm7097_vm2, %v399_v58, %v403_v37  ;;  %v603_v11 = vshll.u32 %v7255_v44, 16 }
  0x3b   : > { %6438 = vmatprep.subr.bf16.mxu1 %v6871_v30  ;;  %6486 = vmatprep.subr.bf16.mxu0 %v6872_v38  ;;  %v409_v59 = vrot.slane %v408_v61, 4  ;;  %v416_v12 = vshrl.u32 %v7268_v51, 16  ;;  %v599_v17 = vrot.slane %v597_v3, 4  ;;  %v419_v23 = vshll.u32 %v7268_v51, 16  ;;  %v7306_v61 = vld [vmem:[%s7066_s28 + $0xa4] sm:$0x1] }
  0x3c   : > { %6419 = vmatmul.mubr.bf16.gmra.mxu1 %v5445_v56  ;;  %v590_v15 = vor.u32 %v589_v1, %v586_v52  ;;  %v425_v24 = vshll.u32 %v7271_v54, 16  ;;  %v605_v34 = vrot.slane %v603_v11, 5  ;;  %v429_v37 = vshrl.u32 %v7271_v54, 16 }
  0x3d   : > { %v414_v33 = vsel %vm7097_vm2, %v409_v59, %v413_v63  ;;  %v418_v35 = vrot.slane %v416_v12, 4  ;;  %v600_v43 = vor.u32 %v599_v17, %v595_v2  ;;  %v421_v45 = vrot.slane %v419_v23, 5  ;;  %v7311_v59 = vld [vmem:[%s7066_s28 + $0x48] sm:$0xf]  ;;  %v7320_v17 = vld [vmem:[%s7066_s28 + $0x4c] sm:$0xf] }
  0x3e   : > { %6439 = vmatpush3.bf16.msra.mxu1 %v6871_v30  ;;  %6487 = vmatpush3.bf16.msra.mxu0 %v6872_v38  ;;  %v5438_v42 = vcombine.low %v404_v10, %v414_v33  ;;  %v591_v30 = vrot.slane %v590_v15, 4  ;;  %v427_v47 = vrot.slane %v425_v24, 5  ;;  %v431_v48 = vrot.slane %v429_v37, 4 }
  0x3f   : > { %6440 = vmatprep.subr.bf16.mxu1 %v6873_v46  ;;  %6488 = vmatprep.subr.bf16.mxu0 %v6874_v55  ;;  %v435_v49 = vshll.u32 %v7278_v7, 16  ;;  %v608_v50 = vshrl.u32 %v7281_v9, 16  ;;  %v601_v56 = vrot.slane %v600_v43, 4  ;;  %v422_v58 = vor.u32 %v421_v45, %v418_v35 }
  0x40   : > { %6406 = vmatprep.mubr.bf16.mxu0 %v5438_v42  ;;  %v596_v38 = vsel %vm7097_vm2, %v591_v30, %v595_v2  ;;  %v611_v63 = vshll.u32 %v7281_v9, 16  ;;  %v432_v52 = vor.u32 %v431_v48, %v427_v47  ;;  %v617_v10 = vshll.u32 %v7290_v28, 16  ;;  %v6877_v2 = vld [vmem:[%s9754_s1] sm:$0xff]   ;;  %v7329_v30 = vld [vmem:[%s7066_s28 + $0x50] sm:$0x1] }
  0x41   : > { %v437_v1 = vrot.slane %v435_v49, 5  ;;  %v610_v3 = vrot.slane %v608_v50, 4  ;;  %v606_v11 = vsel %vm7097_vm2, %v601_v56, %v605_v34  ;;  %v423_v12 = vrot.slane %v422_v58, 4 }
  0x42   : > { %6441 = vmatpush3.bf16.msra.mxu1 %v6873_v46  ;;  %6489 = vmatpush3.bf16.msra.mxu0 %v6874_v55  ;;  %v613_v15 = vrot.slane %v611_v63, 5  ;;  %v621_v46 = vshrl.u32 %v7290_v28, 16  ;;  %v6878_v55 = vld [vmem:[%s9754_s1 + $0x80] sm:$0xff]   ;;  %v5446_v23 = vcombine.low %v596_v38, %v606_v11  ;;  %v433_v24 = vrot.slane %v432_v52, 4  ;;  %v7337_v38 = vld [vmem:[%s7066_s28 + $0xa8] sm:$0xf] }
  0x43   : > { %6442 = vmatprep.subr.bf16.mxu1 %v6875_v29  ;;  %6490 = vmatprep.subr.bf16.mxu0 %v6876_v41  ;;  %v619_v33 = vrot.slane %v617_v10, 5  ;;  %v627_v35 = vshll.u32 %v7306_v61, 16  ;;  %v428_v34 = vsel %vm7097_vm2, %v423_v12, %v427_v47  ;;  %v440_v43 = vshrl.u32 %v7311_v59, 16  ;;  %9784 = vst [vmem:[#allocation2_spill] sm:$0xff] %v7337_v38  ;;  %v7342_v47 = vld [vmem:[%s9754_s1 + $0xf8] sm:$0xff]  }
  0x44   : > { %v614_v37 = vor.u32 %v613_v15, %v610_v3  ;;  %v623_v42 = vrot.slane %v621_v46, 4  ;;  %6422 = vmatprep.mubr.bf16.mxu1 %v5446_v23  ;;  %v438_v45 = vsel %vm7097_vm2, %v433_v24, %v437_v1  ;;  %v443_v49 = vshll.u32 %v7311_v59, 16  ;;  %v7345_v52 = vld [vmem:[%s7066_s28 + $0xac] sm:$0xf]  ;;  %v7350_v1 = vld [vmem:[%s9754_s1 + $0x138] sm:$0xff]  }
  0x45   : > { %v629_v48 = vrot.slane %v627_v35, 5  ;;  %v449_v50 = vshll.u32 %v7320_v17, 16  ;;  %v442_v63 = vrot.slane %v440_v43, 4  ;;  %v453_v10 = vshrl.u32 %v7320_v17, 16  ;;  %v7355_v12 = vld [vmem:[%s7066_s28 + $0xb0] sm:$0x1] }
  0x46   : > { %6443 = vmatpush3.bf16.msra.mxu1 %v6875_v29  ;;  %6491 = vmatpush3.bf16.msra.mxu0 %v6876_v41  ;;  %v5439_v29 = vcombine.low %v428_v34, %v438_v45  ;;  %v615_v56 = vrot.slane %v614_v37, 4  ;;  %v624_v58 = vor.u32 %v623_v42, %v619_v33  ;;  %v445_v41 = vrot.slane %v443_v49, 5  ;;  %9785 = vst [vmem:[#allocation3_spill] sm:$0xff] %v7355_v12  ;;  %v7358_v15 = vld [vmem:[%s7066_s28 + $0x54] sm:$0xf] }
  0x47   : > { %6444 = vmatprep.subr.bf16.mxu1 %v6877_v2  ;;  %6492 = vmatprep.subr.bf16.mxu0 %v6878_v55  ;;  %v451_v3 = vrot.slane %v449_v50, 5  ;;  %v459_v11 = vshll.u32 %v7329_v30, 16  ;;  %v632_v24 = vshrl.u32 %v7337_v38, 16  ;;  %v635_v35 = vshll.u32 %v7337_v38, 16  ;;  %v7365_v34 = vld [vmem:[%s7066_s28 + $0x58] sm:$0xf] }
  0x48   : > { %6407 = vmatmul.mubr.bf16.gmra.mxu0 %v5439_v29  ;;  %v620_v46 = vsel %vm7097_vm2, %v615_v56, %v619_v33  ;;  %v625_v23 = vrot.slane %v624_v58, 4  ;;  %v446_v37 = vor.u32 %v445_v41, %v442_v63  ;;  %v455_v42 = vrot.slane %v453_v10, 4 }
  0x49   : > { %v461_v43 = vrot.slane %v459_v11, 5  ;;  %v641_v45 = vshll.u32 %v7345_v52, 16  ;;  %v634_v49 = vrot.slane %v632_v24, 4  ;;  %v637_v50 = vrot.slane %v635_v35, 5 }
  0x4a   : > { %6445 = vmatpush3.bf16.msra.mxu1 %v6877_v2  ;;  %6493 = vmatpush3.bf16.msra.mxu0 %v6878_v55  ;;  %v630_v33 = vsel %vm7097_vm2, %v625_v23, %v629_v48  ;;  %v645_v29 = vshrl.u32 %v7345_v52, 16  ;;  %v447_v56 = vrot.slane %v446_v37, 4  ;;  %v456_v58 = vor.u32 %v455_v42, %v451_v3  ;;  %v7374_v55 = vld [vmem:[%s7066_s28 + $0x5c] sm:$0x1]  ;;  %v7379_v48 = vld [vmem:[%s7066_s28 + $0xb4] sm:$0xf] }
  0x4b   : > { %6526 = vmatprep.subr.bf16.mxu1 %v7342_v47  ;;  %6574 = vmatprep.subr.bf16.mxu0 %v7350_v1  ;;  %v5447_v2 = vcombine.low %v620_v46, %v630_v33  ;;  %v643_v63 = vrot.slane %v641_v45, 5  ;;  %v638_v41 = vor.u32 %v637_v50, %v634_v49  ;;  %v651_v11 = vshll.u32 %v7355_v12, 16  ;;  %9786 = vst [vmem:[#allocation4_spill] sm:$0xff] %v7379_v48  ;;  %v7386_v37 = vld [vmem:[%s7066_s28 + $0xb8] sm:$0xf] }
  0x4c   : > { %v647_v10 = vrot.slane %v645_v29, 4  ;;  %v464_v21 = vshrl.u32 %v7358_v15, 16  ;;  %v452_v23 = vsel %vm7097_vm2, %v447_v56, %v451_v3  ;;  %v457_v24 = vrot.slane %v456_v58, 4  ;;  %9787 = vst [vmem:[#allocation5_spill] sm:$0xff] %v7386_v37  ;;  %v7392_v3 = vld [vmem:[%s7066_s28 + $0xbc] sm:$0x1] }
  0x4d   : > { %6423 = vmatmul.mubr.bf16.gmra.mxu1 %v5447_v2  ;;  %v467_v46 = vshll.u32 %v7358_v15, 16  ;;  %v473_v35 = vshll.u32 %v7365_v34, 16  ;;  %v639_v42 = vrot.slane %v638_v41, 4  ;;  %v653_v33 = vrot.slane %v651_v11, 5  ;;  %9788 = vst [vmem:[#allocation6_spill] sm:$0xff] %v7392_v3 }
  0x4e   : > { %v648_v45 = vor.u32 %v647_v10, %v643_v63  ;;  %v466_v49 = vrot.slane %v464_v21, 4  ;;  %v462_v50 = vsel %vm7097_vm2, %v457_v24, %v461_v43  ;;  %v477_v62 = vshrl.u32 %v7365_v34, 16  ;;  %v1274_v10 = vld [vmem:[%s7066_s28] sm:$0xe] }
  0x4f   : > { %v469_v29 = vrot.slane %v467_v46, 5  ;;  %v475_v2 = vrot.slane %v473_v35, 5  ;;  %v5440_v56 = vcombine.low %v452_v23, %v462_v50  ;;  %v644_v58 = vsel %vm7097_vm2, %v639_v42, %v643_v63 }
  0x50   : > { %v649_v20 = vrot.slane %v648_v45, 4  ;;  %v483_v41 = vshll.u32 %v7374_v55, 16  ;;  %v479_v21 = vrot.slane %v477_v62, 4  ;;  %v656_v12 = vshrl.u32 %v7379_v48, 16 }
  0x51   : > { %v470_v11 = vor.u32 %v469_v29, %v466_v49  ;;  %v659_v43 = vshll.u32 %v7379_v48, 16  ;;  %6410 = vmatprep.mubr.bf16.mxu0 %v5440_v56  ;;  %v665_v46 = vshll.u32 %v7386_v37, 16  ;;  %v669_v63 = vshrl.u32 %v7386_v37, 16  ;;  %v1275_v49 = vld [vmem:[%s7066_s28 + $0xc] sm:$0xe] }
  0x52   : > { %v654_v24 = vsel %vm7097_vm2, %v649_v20, %v653_v33  ;;  %v485_v23 = vrot.slane %v483_v41, 5  ;;  %v480_v45 = vor.u32 %v479_v21, %v475_v2  ;;  %v658_v50 = vrot.slane %v656_v12, 4  ;;  %v1276_v20 = vld [vmem:[%s7066_s28 + $0x18] sm:$0xe] }
  0x53   : > { %v5448_v35 = vcombine.low %v644_v58, %v654_v24  ;;  %v471_v42 = vrot.slane %v470_v11, 4  ;;  %v661_v62 = vrot.slane %v659_v43, 5  ;;  %v667_v29 = vrot.slane %v665_v46, 5 }
  0x54   : > { %v671_v38 = vrot.slane %v669_v63, 4  ;;  %v675_v48 = vshll.u32 %v7392_v3, 16  ;;  %v481_v58 = vrot.slane %v480_v45, 4  ;;  %v5482_v41 = vrot.slane %v1274_v10, 9 }
  0x55   : > { %6426 = vmatprep.mubr.bf16.mxu1 %v5448_v35  ;;  %v476_v33 = vsel %vm7097_vm2, %v471_v42, %v475_v2  ;;  %v1327_v12 = vrot.slane %v7075_v5, 5  ;;  %v662_v11 = vor.u32 %v661_v62, %v658_v50  ;;  %v5483_v24 = vrot.slane %v1275_v49, 9 }
  0x56   : > { %v672_v21 = vor.u32 %v671_v38, %v667_v29  ;;  %v677_v43 = vrot.slane %v675_v48, 5  ;;  %v486_v46 = vsel %vm7097_vm2, %v481_v58, %v485_v23  ;;  %v1334_v35 = vrot.slane %v7102_v32, 5 }
  0x57   : > { %v1328_v63 = vsel %vm7408_vm5, %v5482_v41, %v1327_v12  ;;  %v1329_v3 = vrot.slane %v1327_v12, 4  ;;  %v5441_v37 = vcombine.low %v476_v33, %v486_v46  ;;  %v663_v2 = vrot.slane %v662_v11, 4  ;;  %v1278_v12 = vld [vmem:[%s7066_s28 + $0x30] sm:$0xe]  ;;  %v1280_v46 = vld [vmem:[%s7066_s28 + $0x48] sm:$0xe] }
  0x58   : > { %v673_v42 = vrot.slane %v672_v21, 4  ;;  %v5458_v10 = vcombine.low %v7072_v4, %v7075_v5  ;;  %v9791_v38 = vrot.slane %v7078_v6, 5  ;;  %v1336_v45 = vrot.slane %v1334_v35, 4 }
  0x59   : > { %v5484_v23 = vrot.slane %v1276_v20, 9  ;;  %6411 = vmatmul.mubr.bf16.gmra.mxu0 %v5441_v37  ;;  %v668_v50 = vsel %vm7097_vm2, %v663_v2, %v667_v29  ;;  %v1341_v33 = vrot.slane %v7139_v19, 5  ;;  %v1335_v4 = vsel %vm7408_vm5, %v5483_v24, %v1334_v35  ;;  %v1279_v24 = vld [vmem:[%s7066_s28 + $0x3c] sm:$0xe] }
  0x5a   : > { %v1331_v48 = vsel %vm7408_vm5, %v1329_v3, %v9791_v38  ;;  %v678_v49 = vsel %vm7097_vm2, %v673_v42, %v677_v43  ;;  %v9792_v5 = vrot.slane %v7108_v40, 5  ;;  %v1344_v37 = vrot.slane %v7144_v25, 5  ;;  %v1277_v3 = vld [vmem:[%s7066_s28 + $0x24] sm:$0xe]  ;;  %v6886_v25 = vld [vmem:[%s9754_s1 + $0x130] sm:$0xff]  }
  0x5b   : > { %v5514_v62 = vcombine.low %v1328_v63, %v1331_v48  ;;  %v5449_v58 = vcombine.low %v668_v50, %v678_v49  ;;  %v1342_v29 = vsel %vm7408_vm5, %v5484_v23, %v1341_v33  ;;  %v1343_v20 = vrot.slane %v1341_v33, 4  ;;  %v6885_v23 = vld [vmem:[%s9754_s1 + $0xf0] sm:$0xff]  }
  0x5c   : > { %v1338_v6 = vsel %vm7408_vm5, %v1336_v45, %v9792_v5  ;;  %v1348_v41 = vrot.slane %v7180_v0, 5  ;;  %v5485_v21 = vrot.slane %v1277_v3, 9  ;;  %v1355_v43 = vrot.slane %v7227_v60, 5  ;;  %v7483_v3 = vld [vmem:[%s7066_s28 + $0x68] sm:$0x1] }
  0x5d   : > { %6494 = vmatprep.mubr.bf16.mxu0 %v5514_v62  ;;  %6427 = vmatmul.mubr.bf16.gmra.mxu1 %v5449_v58  ;;  %v5515_v11 = vcombine.low %v1335_v4, %v1338_v6  ;;  %v1345_v40 = vsel %vm7408_vm5, %v1343_v20, %v1344_v37  ;;  %v1351_v2 = vrot.slane %v7183_v8, 5  ;;  %v5486_v42 = vrot.slane %v1278_v12, 9  ;;  %v1281_v37 = vld [vmem:[%s7066_s28 + $0x54] sm:$0xe]  ;;  %v7507_v12 = vld [vmem:[%s7066_s28 + $0x60] sm:$0xe] }
  0x5e   : > { %6446 = vmatprep.mubr.bf16.mxu1 %v5458_v10  ;;  %v5516_v63 = vcombine.low %v1342_v29, %v1345_v40  ;;  %v1350_v35 = vrot.slane %v1348_v41, 4  ;;  %v1357_v38 = vrot.slane %v1355_v43, 4  ;;  %v1358_v10 = vrot.slane %v7235_v16, 5 }
  0x5f   : > { %v1362_v48 = vrot.slane %v7271_v54, 5  ;;  %v5460_v45 = vcombine.low %v7131_v14, %v7139_v19  ;;  %v1369_v50 = vrot.slane %v7320_v17, 5  ;;  %v5487_v49 = vrot.slane %v1279_v24, 9  ;;  %v6894_v24 = vld [vmem:[%s9754_s1 + $0x120] sm:$0xff]  }
  0x60   : > { %v1365_v8 = vrot.slane %v7278_v7, 5  ;;  %v5488_v33 = vrot.slane %v1280_v46, 9  ;;  %v1349_v14 = vsel %vm7408_vm5, %v5485_v21, %v1348_v41  ;;  %v1352_v19 = vsel %vm7408_vm5, %v1350_v35, %v1351_v2  ;;  %v7519_v46 = vld [vmem:[%s7066_s28 + $0x78] sm:$0xe]  ;;  %v6893_v2 = vld [vmem:[%s9754_s1 + $0xe0] sm:$0xff]  }
  0x61   : > { %6495 = vmatmul.mubr.bf16.vlgmr.msra.gmra.mxu0 %v5515_v11  ;;  %v1364_v62 = vrot.slane %v1362_v48, 4  ;;  %v1371_v16 = vrot.slane %v1369_v50, 4  ;;  %v1372_v58 = vrot.slane %v7329_v30, 5  ;;  %v1356_v4 = vsel %vm7408_vm5, %v5486_v42, %v1355_v43  ;;  %v7510_v11 = vld [vmem:[%s7066_s28 + $0x6c] sm:$0xe] }
  0x62   : > { %6575 = vmatpush3.bf16.msra.mxu0 %v7350_v1  ;;  %6498 = vmatprep.mubr.bf16.mxu0 %v5516_v63  ;;  %v1359_v7 = vsel %vm7408_vm5, %v1357_v38, %v1358_v10  ;;  %v6890_v1 = vld [vmem:[%s9754_s1 + $0x128] sm:$0xff]   ;;  %v1376_v5 = vrot.slane %v7365_v34, 5  ;;  %v9793_v6 = vcombine.low %v7093_v26, %v7102_v32  ;;  %v5461_v30 = vcombine.low %v7171_v57, %v7180_v0  ;;  %v1285_v63 = vld [vmem:[%s7066_s28 + $0x84] sm:$0xe]  ;;  %v1286_v42 = vld [vmem:[%s7066_s28 + $0x90] sm:$0xe] }
  0x63   : > { %6576 = vmatprep.subr.bf16.mxu0 %v6886_v25  ;;  %v1386_v29 = vrot.slane %v7483_v3, 5  ;;  %v5517_v20 = vcombine.low %v1349_v14, %v1352_v19  ;;  %v7489_v41 = vsel %vm7408_vm5, %v5487_v49, %v1362_v48  ;;  %v7493_v26 = vsel %vm7408_vm5, %v1364_v62, %v1365_v8  ;;  %v6889_v32 = vld [vmem:[%s9754_s1 + $0xe8] sm:$0xff]   ;;  %v7538_v48 = vld [vmem:[%s7066_s28 + $0x64] sm:$0xf]  ;;  %v1287_v49 = vld [vmem:[%s7066_s28 + $0x9c] sm:$0xe] }
  0x64   : > { %v5518_v57 = vcombine.low %v1356_v4, %v1359_v7  ;;  %v7500_v0 = vsel %vm7408_vm5, %v5488_v33, %v1369_v50  ;;  %v5462_v40 = vcombine.low %v7218_v53, %v7227_v60  ;;  %v5489_v21 = vrot.slane %v1281_v37, 9  ;;  %v7560_v4 = vld [vmem:[%s7066_s28 + $0x74] sm:$0x1] }
  0x65   : > { %6447 = vmatmul.mubr.bf16.vlgmr.msra.gmra.mxu1 %v9793_v6  ;;  %v1379_v43 = vrot.slane %v7374_v55, 5  ;;  %v5463_v35 = vcombine.low %v7268_v51, %v7271_v54  ;;  %v5519_v53 = vcombine.low %v7489_v41, %v7493_v26  ;;  %v5464_v60 = vcombine.low %v7311_v59, %v7320_v17  ;;  %v6979_v54 = vld [vmem:[%s7066_s28 + $0x80] sm:$0x1] }
  0x66   : > { %6527 = vmatpush3.bf16.msra.mxu1 %v7342_v47  ;;  %6450 = vmatprep.mubr.bf16.mxu1 %v5460_v45  ;;  %v7504_v47 = vsel %vm7408_vm5, %v1371_v16, %v1372_v58  ;;  %v5465_v55 = vcombine.low %v7358_v15, %v7365_v34  ;;  %v5490_v10 = vrot.slane %v7507_v12, 9  ;;  %v1383_v45 = vrot.slane %v7538_v48, 5  ;;  %v7556_v16 = vld [vmem:[%s7066_s28 + $0x70] sm:$0xf]  ;;  %v6980_v17 = vld [vmem:[%s7066_s28 + $0x60] sm:$0xf] }
  0x67   : > { %6528 = vmatprep.subr.bf16.mxu1 %v6885_v23  ;;  %6577 = vmatpush3.bf16.msra.mxu0 %v6886_v25  ;;  %v1378_v25 = vrot.slane %v1376_v5, 4  ;;  %v5520_v38 = vcombine.low %v7500_v0, %v7504_v47  ;;  %v5491_v62 = vrot.slane %v7510_v11, 9  ;;  %v1404_v8 = vrot.slane %v7194_v22, 5  ;;  %v1288_v0 = vld [vmem:[%s7066_s28 + $0xa8] sm:$0xe]  ;;  %v7740_v15 = vld [vmem:[%s9754_s1 + $0x1b8] sm:$0xff]  }
  0x68   : > { %6578 = vmatprep.subr.bf16.mxu0 %v6890_v1  ;;  %v1407_v33 = vrot.slane %v7203_v36, 5  ;;  %v7549_v14 = vsel %vm7408_vm5, %v5489_v21, %v1376_v5  ;;  %v1390_v58 = vrot.slane %v7556_v16, 5  ;;  %v1393_v7 = vrot.slane %v7560_v4, 5  ;;  %v6897_v36 = vld [vmem:[%s9754_s1 + $0xd8] sm:$0xff]  }
  0x69   : > { %6499 = vmatmul.mubr.bf16.gmra.mxu0 %v5517_v20  ;;  %v7553_v19 = vsel %vm7408_vm5, %v1378_v25, %v1379_v43  ;;  %v5492_v5 = vrot.slane %v7519_v46, 9  ;;  %v1406_v37 = vrot.slane %v1404_v8, 4  ;;  %v5494_v41 = vrot.slane %v1286_v42, 9  ;;  %v5610_v42 = vld [vmem:[%s7066_s28 + $0xc] sm:$0xf] }
  0x6a   : > { %6529 = vmatpush3.bf16.msra.mxu1 %v6885_v23  ;;  %6502 = vmatprep.mubr.bf16.mxu0 %v5518_v57  ;;  %v5493_v23 = vrot.slane %v1285_v63, 9  ;;  %v1411_v26 = vrot.slane %v7245_v31, 5  ;;  %v1414_v57 = vrot.slane %v7255_v44, 5  ;;  %v1397_v47 = vrot.slane %v7153_v39, 5 }
  0x6b   : > { %6530 = vmatprep.subr.bf16.mxu1 %v6889_v32  ;;  %6579 = vmatpush3.bf16.msra.mxu0 %v6890_v1  ;;  %v6898_v1 = vld [vmem:[%s9754_s1 + $0x118] sm:$0xff]   ;;  %v7584_v21 = vsel %vm7408_vm5, %v1406_v37, %v1407_v33  ;;  %v1418_v63 = vrot.slane %v7290_v28, 5  ;;  %v5496_v33 = vrot.slane %v1288_v0, 9  ;;  %v1425_v37 = vrot.slane %v7345_v52, 5  ;;  %v6901_v0 = vld [vmem:[%s9754_s1 + $0xd0] sm:$0xff]  }
  0x6c   : > { %6580 = vmatprep.subr.bf16.mxu0 %v6894_v24  ;;  %v7572_v6 = vsel %vm7408_vm5, %v5493_v23, %v1404_v8  ;;  %v7592_v44 = vsel %vm7408_vm5, %v5494_v41, %v1411_v26  ;;  %v1413_v43 = vrot.slane %v1411_v26, 4  ;;  %v6902_v23 = vld [vmem:[%s9754_s1 + $0x110] sm:$0xff]   ;;  %v1421_v8 = vrot.slane %v7306_v61, 5  ;;  %v9795_v61 = vld [vmem:[#allocation3_spill] sm:$0xff] }
  0x6d   : > { %6451 = vmatmul.mubr.bf16.gmra.mxu1 %v5461_v30  ;;  %v1385_v30 = vrot.slane %v1383_v45, 4  ;;  %v1420_v20 = vrot.slane %v1418_v63, 4  ;;  %v1428_v50 = vrot.slane %v9795_v61, 5  ;;  %v1384_v61 = vsel %vm7408_vm5, %v5490_v10, %v1383_v45  ;;  %v5613_v45 = vld [vmem:[%s7066_s28 + $0x18] sm:$0xf] }
  0x6e   : > { %6454 = vmatprep.mubr.bf16.mxu1 %v5462_v40  ;;  %6531 = vmatpush3.bf16.msra.mxu1 %v6889_v32  ;;  %v5495_v40 = vrot.slane %v1287_v49, 9  ;;  %v7604_v32 = vld [vmem:[%s7066_s28 + $0x10] sm:$0xf]  ;;  %v7608_v41 = vsel %vm7408_vm5, %v1413_v43, %v1414_v57  ;;  %v1427_v57 = vrot.slane %v1425_v37, 4  ;;  %v2198_v12 = vshrl.u32 %v5610_v42, 16 }
  0x6f   : > { %6532 = vmatprep.subr.bf16.mxu1 %v6893_v2  ;;  %6581 = vmatpush3.bf16.msra.mxu0 %v6894_v24  ;;  %v9794_v24 = vld [vmem:[#allocation2_spill] sm:$0xff]  ;;  %v9797_v43 = vld [vmem:[#allocation4_spill] sm:$0xff]  ;;  %v2201_v10 = vshll.u32 %v5610_v42, 16  ;;  %v1392_v51 = vrot.slane %v1390_v58, 4  ;;  %v2207_v59 = vshll.u32 %v7604_v32, 16  ;;  %v1398_v4 = vsel %vm7408_vm5, %v5492_v5, %v1397_v47 }
  0x70   : > { %6582 = vmatprep.subr.bf16.mxu0 %v6898_v1  ;;  %v7612_v26 = vsel %vm7408_vm5, %v5495_v40, %v1418_v63  ;;  %v9796_v40 = vld [vmem:[#allocation5_spill] sm:$0xff]  ;;  %v7678_v42 = vld [vmem:[%s7066_s28 + $0x14] sm:$0x1]  ;;  %v2200_v63 = vrot.slane %v2198_v12, 4  ;;  %v9799_v5 = vld [vmem:[#allocation6_spill] sm:$0xff] }
  0x71   : > { %6503 = vmatmul.mubr.bf16.gmra.mxu0 %v5519_v53  ;;  %v2203_v49 = vrot.slane %v2201_v10, 5  ;;  %v5616_v53 = vld [vmem:[%s7066_s28 + $0x24] sm:$0xf]  ;;  %v1394_v11 = vsel %vm7408_vm5, %v1392_v51, %v1393_v7 }
  0x72   : > { %6533 = vmatpush3.bf16.msra.mxu1 %v6893_v2  ;;  %6506 = vmatprep.mubr.bf16.mxu0 %v5520_v38  ;;  %v7622_v2 = vsel %vm7408_vm5, %v5496_v33, %v1425_v37  ;;  %v5521_v38 = vcombine.low %v7549_v14, %v7553_v19  ;;  %v1387_v33 = vsel %vm7408_vm5, %v1385_v30, %v1386_v29  ;;  %v6906_v14 = vld [vmem:[%s9754_s1 + $0x108] sm:$0xff]   ;;  %v6910_v30 = vld [vmem:[%s9754_s1 + $0x100] sm:$0xff]   ;;  %v7697_v19 = vrot.slane %v2207_v59, 5 }
  0x73   : > { %6534 = vmatprep.subr.bf16.mxu1 %v6897_v36  ;;  %6583 = vmatpush3.bf16.msra.mxu0 %v6898_v1  ;;  %v7640_v37 = vsel %vm7408_vm5, %v1420_v20, %v1421_v8  ;;  %v7652_v29 = vsel %vm7408_vm5, %v1427_v57, %v1428_v50  ;;  %v6905_v50 = vld [vmem:[%s9754_s1 + $0xc8] sm:$0xff]   ;;  %v7667_v1 = vld [vmem:[%s7066_s28 + $0xb4] sm:$0xe]  ;;  %v5522_v20 = vcombine.low %v1384_v61, %v1387_v33  ;;  %v2211_v8 = vshrl.u32 %v7604_v32, 16  ;;  %v7695_v61 = vld [vmem:[%s7066_s28 + $0x1c] sm:$0xf] }
  0x74   : > { %6584 = vmatprep.subr.bf16.mxu0 %v6902_v23  ;;  %v7682_v57 = vld [vmem:[%s7066_s28 + $0x6c] sm:$0xf]  ;;  %v2222_v33 = vshrl.u32 %v5613_v45, 16  ;;  %v2231_v51 = vshll.u32 %v7695_v61, 16  ;;  %v2235_v39 = vshrl.u32 %v7695_v61, 16  ;;  %v2246_v59 = vshrl.u32 %v5616_v53, 16 }
  0x75   : > { %6455 = vmatmul.mubr.bf16.gmra.mxu1 %v5463_v35  ;;  %v1400_v35 = vrot.slane %v6979_v54, 5  ;;  %v5467_v54 = vcombine.low %v7682_v57, %v7556_v16  ;;  %v2213_v3 = vrot.slane %v2211_v8, 4  ;;  %v2249_v46 = vshll.u32 %v5616_v53, 16  ;;  %v6983_v8 = vld [vmem:[%s7066_s28 + $0x7c] sm:$0xf] }
  0x76   : > { %6458 = vmatprep.mubr.bf16.mxu1 %v5464_v60  ;;  %6535 = vmatpush3.bf16.msra.mxu1 %v6897_v36  ;;  %v5466_v60 = vcombine.low %v6980_v17, %v7538_v48  ;;  %v1399_v36 = vrot.slane %v1397_v47, 4  ;;  %v7692_v48 = vsel %vm7408_vm5, %v5491_v62, %v1390_v58  ;;  %v2225_v17 = vshll.u32 %v5613_v45, 16  ;;  %v6909_v58 = vld [vmem:[%s9754_s1 + $0xc0] sm:$0xff]   ;;  %v7722_v45 = vld [vmem:[%s7066_s28 + $0x28] sm:$0xf] }
  0x77   : > { %6536 = vmatprep.subr.bf16.mxu1 %v6901_v0  ;;  %6585 = vmatpush3.bf16.msra.mxu0 %v6902_v23  ;;  %v9767_v62 = vrot.slane %v9796_v40, 5  ;;  %v7709_v23 = vld [vmem:[%s7066_s28 + $0x20] sm:$0x1]  ;;  %v2224_v12 = vrot.slane %v2222_v33, 4  ;;  %9798 = vst [vmem:[#allocation2_spill] sm:$0xff] %v7722_v45  ;;  %v5523_v34 = vcombine.low %v7692_v48, %v1394_v11  ;;  %v2255_v53 = vshll.u32 %v7722_v45, 16 }
  0x78   : > { %6586 = vmatprep.subr.bf16.mxu0 %v6906_v14  ;;  %v2227_v10 = vrot.slane %v2225_v17, 5  ;;  %v1401_v7 = vsel %vm7408_vm5, %v1399_v36, %v1400_v35  ;;  %v2204_v35 = vor.u32 %v2203_v49, %v2200_v63  ;;  %v7735_v36 = vld [vmem:[%s9754_s1 + $0x178] sm:$0xff]   ;;  %v5619_v63 = vld [vmem:[%s7066_s28 + $0x30] sm:$0xf]  ;;  %v7756_v48 = vld [vmem:[%s7066_s28 + $0x34] sm:$0xf] }
  0x79   : > { %6507 = vmatmul.mubr.bf16.gmra.mxu0 %v5521_v38  ;;  %v2217_v38 = vshll.u32 %v7678_v42, 16  ;;  %v5524_v17 = vcombine.low %v1398_v4, %v1401_v7  ;;  %9801 = vst [vmem:[#allocation5_spill] sm:$0xff] %v7756_v48  ;;  %v7758_v11 = vrot.slane %v2231_v51, 5  ;;  %v2251_v47 = vrot.slane %v2249_v46, 5  ;;  %v7777_v46 = vld [vmem:[%s7066_s28 + $0x40] sm:$0xf] }
  0x7a   : > { %6537 = vmatpush3.bf16.msra.mxu1 %v6901_v0  ;;  %6510 = vmatprep.mubr.bf16.mxu0 %v5522_v20  ;;  %v2214_v20 = vor.u32 %v2213_v3, %v7697_v19  ;;  %v2228_v49 = vor.u32 %v2227_v10, %v2224_v12  ;;  %v6982_v3 = vld [vmem:[%s7066_s28 + $0x78] sm:$0xf]  ;;  %v2237_v12 = vrot.slane %v2235_v39, 4  ;;  %v2248_v10 = vrot.slane %v2246_v59, 4  ;;  %9802 = vst [vmem:[#allocation4_spill] sm:$0xff] %v7777_v46 }
  0x7b   : > { %6538 = vmatprep.subr.bf16.mxu1 %v6905_v50  ;;  %6587 = vmatpush3.bf16.msra.mxu0 %v6906_v14  ;;  %v2241_v14 = vshll.u32 %v7709_v23, 16  ;;  %v5468_v33 = vcombine.low %v6982_v3, %v6983_v8  ;;  %v7749_v25 = vrot.slane %v2217_v38, 5  ;;  %v7761_v0 = vld [vmem:[%s7066_s28 + $0x38] sm:$0x1]  ;;  %v7763_v4 = vrot.slane %v2204_v35, 4 }
  0x7c   : > { %6588 = vmatprep.subr.bf16.mxu0 %v6910_v30  ;;  %v7765_v7 = vrot.slane %v2214_v20, 4  ;;  %v2270_v3 = vshrl.u32 %v5619_v63, 16  ;;  %v5622_v8 = vld [vmem:[%s7066_s28 + $0x3c] sm:$0xf]  ;;  %v7773_v51 = vrot.slane %v2255_v53, 5  ;;  %v2273_v39 = vshll.u32 %v5619_v63, 16 }
  0x7d   : > { %6459 = vmatmul.mubr.bf16.gmra.mxu1 %v5465_v55  ;;  %v1434_v55 = vrot.slane %v9767_v62, 4  ;;  %v7767_v38 = vrot.slane %v2241_v14, 5  ;;  %v2279_v59 = vshll.u32 %v7756_v48, 16  ;;  %v2283_v20 = vshrl.u32 %v7756_v48, 16 }
  0x7e   : > { %6462 = vmatprep.mubr.bf16.mxu1 %v5466_v60  ;;  %6539 = vmatpush3.bf16.msra.mxu1 %v6905_v50  ;;  %v7752_v60 = vld [vmem:[%s7066_s28 + $0x2c] sm:$0x1]  ;;  %v2259_v50 = vshrl.u32 %v7722_v45, 16  ;;  %v2238_v14 = vor.u32 %v2237_v12, %v7758_v11  ;;  %v2272_v53 = vrot.slane %v2270_v3, 4  ;;  %v2275_v63 = vrot.slane %v2273_v39, 5 }
  0x7f   : > { %6540 = vmatprep.subr.bf16.mxu1 %v6909_v58  ;;  %9800 = vst [vmem:[#allocation3_spill] sm:$0xff] %v7752_v60  ;;  %6589 = vmatpush3.bf16.msra.mxu0 %v6910_v30  ;;  %v7771_v30 = vrot.slane %v2228_v49, 4  ;;  %v2294_v49 = vshrl.u32 %v5622_v8, 16  ;;  %v2297_v62 = vshll.u32 %v5622_v8, 16  ;;  %v2285_v48 = vrot.slane %v2283_v20, 4 }
  0x80   : > { %6670 = vmatprep.subr.bf16.mxu0 %v7740_v15  ;;  %v2261_v35 = vrot.slane %v2259_v50, 4  ;;  %v7787_v50 = vrot.slane %v2279_v59, 5  ;;  %v7790_v45 = vld [vmem:[%s7066_s28 + $0x44] sm:$0x1]  ;;  %v2307_v12 = vshrl.u32 %v7777_v46, 16  ;;  %v9803_v16 = vrot.slane %v9796_v40, 5 }
  0x81   : > { %6511 = vmatmul.mubr.bf16.gmra.mxu0 %v5523_v34  ;;  %v2265_v34 = vshll.u32 %v7752_v60, 16  ;;  %v9804_v57 = vrot.slane %v7667_v1, 9  ;;  %v7811_v39 = vld [vmem:[%s7066_s28 + $0x4c] sm:$0xf]  ;;  %v2296_v59 = vrot.slane %v2294_v49, 4  ;;  %v2299_v20 = vrot.slane %v2297_v62, 5 }
  0x82   : > { %6541 = vmatpush3.bf16.msra.mxu1 %v6909_v58  ;;  %6514 = vmatprep.mubr.bf16.mxu0 %v5524_v17  ;;  %v2252_v58 = vor.u32 %v2251_v47, %v2248_v10  ;;  %v2289_v17 = vshll.u32 %v7761_v0, 16  ;;  %v2303_v47 = vshll.u32 %v7777_v46, 16  ;;  %v5625_v10 = vld [vmem:[%s7066_s28 + $0x48] sm:$0xf]  ;;  %v2262_v8 = vor.u32 %v2261_v35, %v7773_v51 }
  0x83   : > { %6622 = vmatprep.subr.bf16.mxu1 %v7735_v36  ;;  %v2309_v1 = vrot.slane %v2307_v12, 4  ;;  %v7815_v46 = vrot.slane %v2238_v14, 4  ;;  %v2210_v62 = vsel %vm7097_vm2, %v7763_v4, %v7697_v19  ;;  %v2220_v35 = vsel %vm7097_vm2, %v7765_v7, %v7749_v25  ;;  %v5628_v4 = vld [vmem:[%s7066_s28 + $0x54] sm:$0xf] }
  0x84   : > { %v7813_v60 = vrot.slane %v2303_v47, 5  ;;  %v2321_v14 = vshll.u32 %v5625_v10, 16  ;;  %v2313_v49 = vshll.u32 %v7790_v45, 16  ;;  %v2331_v19 = vshrl.u32 %v7811_v39, 16 }
  0x85   : > { %6463 = vmatmul.mubr.bf16.gmra.mxu1 %v5467_v54  ;;  %v7801_v54 = vsel %vm7408_vm5, %v9804_v57, %v9803_v16  ;;  %v7817_v16 = vrot.slane %v2252_v58, 4  ;;  %v7819_v57 = vrot.slane %v2265_v34, 5  ;;  %v2327_v58 = vshll.u32 %v7811_v39, 16 }
  0x86   : > { %6466 = vmatprep.mubr.bf16.mxu1 %v5468_v33  ;;  %v9805_v33 = vrot.slane %v9799_v5, 5  ;;  %v2318_v5 = vshrl.u32 %v5625_v10, 16  ;;  %v9807_v34 = vcombine.low %v7592_v44, %v7608_v41  ;;  %v7840_v47 = vrot.slane %v2262_v8, 4  ;;  %v7846_v10 = vld [vmem:[%s7066_s28 + $0x58] sm:$0xf] }
  0x87   : > { %v7842_v12 = vrot.slane %v2289_v17, 5  ;;  %v2300_v25 = vor.u32 %v2299_v20, %v2296_v59  ;;  %v2310_v7 = vor.u32 %v2309_v1, %v7813_v60  ;;  %v9808_v44 = vcombine.low %v7187_v13, %v7194_v22  ;;  %v7852_v41 = vld [vmem:[%s7066_s28 + $0x50] sm:$0x1] }
  0x88   : > { %v7807_v3 = vsel %vm7408_vm5, %v1434_v55, %v9805_v33  ;;  %v9806_v55 = vcombine.low %v7572_v6, %v7584_v21  ;;  %v2276_v6 = vor.u32 %v2275_v63, %v2272_v53  ;;  %v2286_v21 = vor.u32 %v2285_v48, %v7787_v50 }
  0x89   : > { %v2320_v48 = vrot.slane %v2318_v5, 4  ;;  %v2323_v53 = vrot.slane %v2321_v14, 5  ;;  %v7854_v63 = vrot.slane %v2327_v58, 5  ;;  %v2333_v17 = vrot.slane %v2331_v19, 4  ;;  %v5631_v5 = vld [vmem:[%s7066_s28 + $0x60] sm:$0xf] }
  0x8a   : > { %6515 = vmatmul.mubr.bf16.gmra.mxu0 %v9806_v55  ;;  %v9809_v33 = vcombine.low %v7239_v18, %v7245_v31  ;;  %v2342_v8 = vshrl.u32 %v5628_v4, 16  ;;  %v2345_v59 = vshll.u32 %v5628_v4, 16  ;;  %v7859_v20 = vrot.slane %v2276_v6, 4  ;;  %v7876_v31 = vld [vmem:[%s7066_s28 + $0x64] sm:$0xf] }
  0x8b   : > { %6518 = vmatprep.mubr.bf16.mxu0 %v9807_v34  ;;  %v7861_v1 = vrot.slane %v2286_v21, 4  ;;  %v7863_v13 = vrot.slane %v2313_v49, 5  ;;  %v2351_v22 = vshll.u32 %v7846_v10, 16  ;;  %v5529_v55 = vcombine.low %v7801_v54, %v7807_v3  ;;  %v7872_v34 = vld [vmem:[%s7066_s28 + $0x5c] sm:$0x1] }
  0x8c   : > { %v5674_v14 = vcombine.low %v2210_v62, %v2220_v35  ;;  %v7869_v58 = vrot.slane %v2300_v25, 4  ;;  %v2355_v18 = vshrl.u32 %v7846_v10, 16  ;;  %v7878_v6 = vrot.slane %v2310_v7, 4 }
  0x8d   : > { %6467 = vmatmul.mubr.bf16.gmra.mxu1 %v9808_v44  ;;  %v2337_v21 = vshll.u32 %v7852_v41, 16  ;;  %v2366_v49 = vshrl.u32 %v5631_v5, 16  ;;  %v2369_v19 = vshll.u32 %v5631_v5, 16  ;;  %v9810_v4 = vcombine.low %v7612_v26, %v7640_v37 }
  0x8e   : > { %6470 = vmatprep.mubr.bf16.mxu1 %v9809_v33  ;;  %v2324_v54 = vor.u32 %v2323_v53, %v2320_v48  ;;  %v2334_v3 = vor.u32 %v2333_v17, %v7854_v63  ;;  %v2344_v62 = vrot.slane %v2342_v8, 4  ;;  %v2347_v35 = vrot.slane %v2345_v59, 5  ;;  %v7916_v8 = vld [vmem:[%s7066_s28 + $0x70] sm:$0xf] }
  0x8f   : > { %v9811_v25 = vcombine.low %v7622_v2, %v7652_v29  ;;  %v7888_v7 = vrot.slane %v2351_v22, 5  ;;  %v2357_v44 = vrot.slane %v2355_v18, 4  ;;  %v2361_v33 = vshll.u32 %v7872_v34, 16 }
  0x90   : > { %v2375_v26 = vshll.u32 %v7876_v31, 16  ;;  %v2234_v37 = vsel %vm7097_vm2, %v7771_v30, %v7758_v11  ;;  %v2244_v2 = vsel %vm7097_vm2, %v7815_v46, %v7767_v38  ;;  %v2368_v29 = vrot.slane %v2366_v49, 4  ;;  %v5634_v46 = vld [vmem:[%s7066_s28 + $0x6c] sm:$0xf] }
  0x91   : > { %v2371_v48 = vrot.slane %v2369_v19, 5  ;;  %v9812_v53 = vcombine.low %v7281_v9, %v7290_v28  ;;  %v2258_v17 = vsel %vm7097_vm2, %v7817_v16, %v7773_v51  ;;  %v2268_v11 = vsel %vm7097_vm2, %v7840_v47, %v7819_v57  ;;  %v7924_v16 = vld [vmem:[%s7066_s28 + $0x68] sm:$0x1] }
  0x92   : > { %6519 = vmatmul.mubr.bf16.gmra.mxu0 %v9810_v4  ;;  %v7911_v30 = vrot.slane %v2337_v21, 5  ;;  %v2379_v38 = vshrl.u32 %v7876_v31, 16  ;;  %v9813_v9 = vcombine.low %v9794_v24, %v7345_v52  ;;  %v7921_v28 = vrot.slane %v2324_v54, 4  ;;  %v6911_v52 = vld [vmem:[%s7066_s28 + $0xc] sm:$0xff]  }
  0x93   : > { %6522 = vmatprep.mubr.bf16.mxu0 %v9811_v25  ;;  %v2348_v51 = vor.u32 %v2347_v35, %v2344_v62  ;;  %v2390_v59 = vshrl.u32 %v5634_v46, 16  ;;  %v2393_v57 = vshll.u32 %v5634_v46, 16  ;;  %v7926_v47 = vrot.slane %v2334_v3, 4  ;;  %v7937_v62 = vld [vmem:[%s7066_s28 + $0x74] sm:$0x1] }
  0x94   : > { %v2358_v22 = vor.u32 %v2357_v44, %v7888_v7  ;;  %v7929_v5 = vrot.slane %v2361_v33, 5  ;;  %v2399_v18 = vshll.u32 %v7916_v8, 16  ;;  %v2372_v24 = vor.u32 %v2371_v48, %v2368_v29  ;;  %v5637_v25 = vld [vmem:[%s7066_s28 + $0x78] sm:$0xf]  ;;  %v7941_v44 = vld [vmem:[%s7066_s28 + $0x7c] sm:$0xf] }
  0x95   : > { %6471 = vmatmul.mubr.bf16.gmra.mxu1 %v9812_v53  ;;  %v7933_v21 = vrot.slane %v2375_v26, 5  ;;  %v2381_v49 = vrot.slane %v2379_v38, 4  ;;  %v2403_v19 = vshrl.u32 %v7916_v8, 16  ;;  %v5675_v4 = vcombine.low %v2234_v37, %v2244_v2  ;;  %v7948_v26 = vld [vmem:[%s7066_s28 + $0x80] sm:$0x1] }
  0x96   : > { %6474 = vmatprep.mubr.bf16.mxu1 %v9813_v9  ;;  %v5676_v54 = vcombine.low %v2258_v17, %v2268_v11  ;;  %v2392_v3 = vrot.slane %v2390_v59, 4  ;;  %v2395_v35 = vrot.slane %v2393_v57, 5  ;;  %v7943_v33 = vrot.slane %v2348_v51, 4 }
  0x97   : > { %v7945_v53 = vrot.slane %v2399_v18, 5  ;;  %v2405_v29 = vrot.slane %v2403_v19, 4  ;;  %v2414_v48 = vshrl.u32 %v5637_v25, 16  ;;  %v2385_v37 = vshll.u32 %v7924_v16, 16  ;;  %v5640_v19 = vld [vmem:[%s7066_s28 + $0x84] sm:$0xf] }
  0x98   : > { %v2417_v2 = vshll.u32 %v5637_v25, 16  ;;  %v2423_v17 = vshll.u32 %v7941_v44, 16  ;;  %v2427_v11 = vshrl.u32 %v7941_v44, 16  ;;  %v7953_v38 = vrot.slane %v2358_v22, 4  ;;  %v6915_v25 = vld [vmem:[%s7066_s28 + $0x24] sm:$0xff]  }
  0x99   : > { %v7955_v46 = vrot.slane %v2372_v24, 4  ;;  %v2416_v9 = vrot.slane %v2414_v48, 4  ;;  %v9814_v51 = vcombine.low %v9797_v43, %v9796_v40  ;;  %v2282_v22 = vsel %vm7097_vm2, %v7859_v20, %v7787_v50 }
  0x9a   : > { %6523 = vmatmul.mubr.bf16.gmra.mxu0 %v5529_v55  ;;  %v2382_v55 = vor.u32 %v2381_v49, %v7933_v21  ;;  %v2419_v59 = vrot.slane %v2417_v2, 5  ;;  %v7961_v57 = vrot.slane %v2423_v17, 5  ;;  %v2429_v18 = vrot.slane %v2427_v11, 4  ;;  %v8010_v17 = vld [vmem:[%s7066_s28 + $0x8c] sm:$0x1] }
  0x9b   : > { %6590 = vmatprep.mubr.bf16.mxu0 %v5674_v14  ;;  %v2396_v14 = vor.u32 %v2395_v35, %v2392_v3  ;;  %v2406_v24 = vor.u32 %v2405_v29, %v7945_v53  ;;  %v2409_v49 = vshll.u32 %v7937_v62, 16  ;;  %v2433_v40 = vshll.u32 %v7948_v26, 16  ;;  %v7984_v3 = vld [vmem:[%s7066_s28 + $0x88] sm:$0xf]  ;;  %v6912_v35 = vld [vmem:[%s7066_s28 + $0x18] sm:$0xff]  }
  0x9c   : > { %v2292_v43 = vsel %vm7097_vm2, %v7861_v1, %v7842_v12  ;;  %v2316_v50 = vsel %vm7097_vm2, %v7878_v6, %v7863_v13  ;;  %v2420_v20 = vor.u32 %v2419_v59, %v2416_v9  ;;  %v6918_v12 = vld [vmem:[%s9754_s1 + $0x1b0] sm:$0xff]   ;;  %v7991_v1 = vrot.slane %v2385_v37, 5  ;;  %v8015_v11 = vld [vmem:[%s9754_s1 + $0x1a8] sm:$0xff]  }
  0x9d   : > { %6475 = vmatmul.mubr.bf16.gmra.mxu1 %v9814_v51  ;;  %v2441_v29 = vshll.u32 %v5640_v19, 16  ;;  %v6917_v13 = vld [vmem:[%s9754_s1 + $0x170] sm:$0xff]   ;;  %v2330_v6 = vsel %vm7097_vm2, %v7921_v28, %v7854_v63  ;;  %v2340_v48 = vsel %vm7097_vm2, %v7926_v47, %v7911_v30  ;;  %v8005_v37 = vrot.slane %v2382_v55, 4 }
  0x9e   : > { %6542 = vmatprep.mubr.bf16.mxu1 %v6911_v52  ;;  %v2306_v52 = vsel %vm7097_vm2, %v7869_v58, %v7813_v60  ;;  %v2430_v60 = vor.u32 %v2429_v18, %v7961_v57  ;;  %v2438_v58 = vshrl.u32 %v5640_v19, 16  ;;  %v8007_v2 = vrot.slane %v2396_v14, 4  ;;  %v5643_v14 = vld [vmem:[%s7066_s28 + $0x90] sm:$0xf]  ;;  %v8038_v59 = vld [vmem:[%s7066_s28 + $0x94] sm:$0xf] }
  0x9f   : > { %v8017_v63 = vrot.slane %v2406_v24, 4  ;;  %v8019_v28 = vrot.slane %v2409_v49, 5  ;;  %v2447_v30 = vshll.u32 %v7984_v3, 16  ;;  %v2451_v47 = vshrl.u32 %v7984_v3, 16  ;;  %9815 = vst [vmem:[#allocation6_spill] sm:$0xff] %v8038_v59 }
  0xa0   : > { %v2364_v55 = vsel %vm7097_vm2, %v7953_v38, %v7929_v5  ;;  %v8032_v9 = vrot.slane %v2420_v20, 4  ;;  %v8034_v51 = vrot.slane %v2433_v40, 5  ;;  %v2443_v18 = vrot.slane %v2441_v29, 5  ;;  %v6921_v5 = vld [vmem:[%s9754_s1 + $0x168] sm:$0xff]  }
  0xa1   : > { %v2465_v38 = vshll.u32 %v5643_v14, 16  ;;  %v2471_v24 = vshll.u32 %v8038_v59, 16  ;;  %v2475_v49 = vshrl.u32 %v8038_v59, 16  ;;  %v5677_v40 = vcombine.low %v2282_v22, %v2292_v43 }
  0xa2   : > { %6591 = vmatmul.mubr.bf16.vlgmr.msra.gmra.mxu0 %v5675_v4  ;;  %v2354_v4 = vsel %vm7097_vm2, %v7943_v33, %v7888_v7  ;;  %v2457_v7 = vshll.u32 %v8010_v17, 16  ;;  %v2462_v33 = vshrl.u32 %v5643_v14, 16  ;;  %v5678_v20 = vcombine.low %v2306_v52, %v2316_v50 }
  0xa3   : > { %6671 = vmatpush3.bf16.msra.mxu0 %v7740_v15  ;;  %6594 = vmatprep.mubr.bf16.mxu0 %v5676_v54  ;;  %v8040_v15 = vrot.slane %v2430_v60, 4  ;;  %v2440_v54 = vrot.slane %v2438_v58, 4  ;;  %v8049_v19 = vrot.slane %v2447_v30, 5  ;;  %v6916_v60 = vld [vmem:[%s7066_s28 + $0x30] sm:$0xff]   ;;  %v6926_v58 = vld [vmem:[%s9754_s1 + $0x1a0] sm:$0xff]   ;;  %v2467_v14 = vrot.slane %v2465_v38, 5 }
  0xa4   : > { %6672 = vmatprep.subr.bf16.mxu0 %v6918_v12  ;;  %v2464_v29 = vrot.slane %v2462_v33, 4  ;;  %v2477_v22 = vrot.slane %v2475_v49, 4  ;;  %v8057_v43 = vcombine.low %v2330_v6, %v2340_v48  ;;  %v8060_v52 = vcombine.low %v2354_v4, %v2364_v55  ;;  %v5646_v30 = vld [vmem:[%s7066_s28 + $0x9c] sm:$0xf]  ;;  %v8082_v4 = vld [vmem:[%s7066_s28 + $0xa4] sm:$0x1] }
  0xa5   : > { %6543 = vmatmul.mubr.bf16.vlgmr.msra.gmra.mxu1 %v6912_v35  ;;  %v2453_v35 = vrot.slane %v2451_v47, 4  ;;  %v2444_v48 = vor.u32 %v2443_v18, %v2440_v54  ;;  %v8079_v47 = vld [vmem:[%s7066_s28 + $0xa0] sm:$0xf]  ;;  %9818 = vst [vmem:[#allocation9_spill] sm:$0xff] %v8082_v4  ;;  %v2486_v55 = vshrl.u32 %v5646_v30, 16  ;;  %v2489_v33 = vshll.u32 %v5646_v30, 16 }
  0xa6   : > { %6623 = vmatpush3.bf16.msra.mxu1 %v7735_v36  ;;  %6546 = vmatprep.mubr.bf16.mxu1 %v6915_v25  ;;  %v8055_v36 = vrot.slane %v2471_v24, 5  ;;  %v2388_v25 = vsel %vm7097_vm2, %v8005_v37, %v7991_v1  ;;  %9817 = vst [vmem:[#allocation8_spill] sm:$0xff] %v8079_v47  ;;  %v6919_v38 = vld [vmem:[%s7066_s28 + $0x3c] sm:$0xff]   ;;  %v2495_v37 = vshll.u32 %v8079_v47, 16  ;;  %v2499_v24 = vshrl.u32 %v8079_v47, 16 }
  0xa7   : > { %6624 = vmatprep.subr.bf16.mxu1 %v6917_v13  ;;  %6673 = vmatpush3.bf16.msra.mxu0 %v6918_v12  ;;  %v8071_v12 = vld [vmem:[%s7066_s28 + $0x98] sm:$0x1]  ;;  %v2454_v1 = vor.u32 %v2453_v35, %v8049_v19  ;;  %v6925_v54 = vld [vmem:[%s9754_s1 + $0x160] sm:$0xff]   ;;  %v2468_v18 = vor.u32 %v2467_v14, %v2464_v29  ;;  %v2488_v30 = vrot.slane %v2486_v55, 4  ;;  %v2491_v49 = vrot.slane %v2489_v33, 5 }
  0xa8   : > { %6674 = vmatprep.subr.bf16.mxu0 %v8015_v11  ;;  %9816 = vst [vmem:[#allocation7_spill] sm:$0xff] %v8071_v12  ;;  %v2481_v35 = vshll.u32 %v8071_v12, 16  ;;  %v2501_v6 = vrot.slane %v2499_v24, 4  ;;  %v2505_v50 = vshll.u32 %v8082_v4, 16  ;;  %v5649_v47 = vld [vmem:[%s7066_s28 + $0xa8] sm:$0xf] }
  0xa9   : > { %v6929_v29 = vld [vmem:[%s9754_s1 + $0x158] sm:$0xff]   ;;  %v8105_v14 = vrot.slane %v2444_v48, 4  ;;  %v2510_v55 = vshrl.u32 %v5649_v47, 16  ;;  %v2513_v33 = vshll.u32 %v5649_v47, 16  ;;  %v8118_v4 = vld [vmem:[%s7066_s28 + $0xb0] sm:$0x1] }
  0xaa   : > { %6595 = vmatmul.mubr.bf16.gmra.mxu0 %v5677_v40  ;;  %6625 = vmatpush3.bf16.msra.mxu1 %v6917_v13  ;;  %v6930_v13 = vld [vmem:[%s9754_s1 + $0x198] sm:$0xff]   ;;  %v2478_v40 = vor.u32 %v2477_v22, %v8055_v36  ;;  %v8107_v22 = vrot.slane %v2457_v7, 5  ;;  %v6920_v48 = vld [vmem:[%s7066_s28 + $0x48] sm:$0xff]   ;;  %v8121_v7 = vrot.slane %v2454_v1, 4  ;;  %v8123_v12 = vrot.slane %v2468_v18, 4 }
  0xab   : > { %6598 = vmatprep.mubr.bf16.mxu0 %v5678_v20  ;;  %6626 = vmatprep.subr.bf16.mxu1 %v6921_v5  ;;  %v8098_v20 = vrot.slane %v2495_v37, 5  ;;  %v2492_v37 = vor.u32 %v2491_v49, %v2488_v30  ;;  %v8125_v59 = vrot.slane %v2481_v35, 5  ;;  %v6933_v49 = vld [vmem:[%s9754_s1 + $0x150] sm:$0xff]   ;;  %v8142_v18 = vrot.slane %v2513_v33, 5 }
  0xac   : > { %6675 = vmatpush3.bf16.msra.mxu0 %v8015_v11  ;;  %v8110_v11 = vld [vmem:[%s7066_s28 + $0xac] sm:$0xf]  ;;  %v2529_v35 = vshll.u32 %v8118_v4, 16 }
  0xad   : > { %6547 = vmatmul.mubr.bf16.gmra.mxu1 %v6916_v60  ;;  %6676 = vmatprep.subr.bf16.mxu0 %v6926_v58  ;;  %9819 = vst [vmem:[#allocation10_spill] sm:$0xff] %v8110_v11  ;;  %v2412_v60 = vsel %vm7097_vm2, %v8017_v63, %v8019_v28  ;;  %v2502_v24 = vor.u32 %v2501_v6, %v8098_v20  ;;  %v2519_v47 = vshll.u32 %v8110_v11, 16  ;;  %v6923_v63 = vld [vmem:[%s7066_s28 + $0x54] sm:$0xff]   ;;  %v8132_v28 = vrot.slane %v2478_v40, 4 }
  0xae   : > { %6550 = vmatprep.mubr.bf16.mxu1 %v6919_v38  ;;  %6627 = vmatpush3.bf16.msra.mxu1 %v6921_v5  ;;  %v6934_v5 = vld [vmem:[%s9754_s1 + $0x190] sm:$0xff]   ;;  %v8134_v6 = vrot.slane %v2505_v50, 5  ;;  %v8136_v38 = vrot.slane %v2510_v55, 4  ;;  %v2523_v1 = vshrl.u32 %v8110_v11, 16  ;;  %v8151_v40 = vrot.slane %v2492_v37, 4 }
  0xaf   : > { %6628 = vmatprep.subr.bf16.mxu1 %v6925_v54  ;;  %v8153_v30 = vrot.slane %v2502_v24, 4  ;;  %v5652_v55 = vld [vmem:[%s7066_s28 + $0xb4] sm:$0xf]  ;;  %v8157_v11 = vld [vmem:[%s7066_s28 + $0xb8] sm:$0xf]  ;;  %v6937_v24 = vld [vmem:[%s9754_s1 + $0x148] sm:$0xff]  }
  0xb0   : > { %6677 = vmatpush3.bf16.msra.mxu0 %v6926_v58  ;;  %v9820_v58 = vsel %vm7097_vm2, %v7955_v46, %v7933_v21  ;;  %9821 = vst [vmem:[#allocation11_spill] sm:$0xff] %v8157_v11  ;;  %v2426_v21 = vsel %vm7097_vm2, %v8032_v9, %v7961_v57  ;;  %v8169_v46 = vrot.slane %v2519_v47, 5  ;;  %v5655_v37 = vld [vmem:[%s7066_s28 + $0xc0] sm:$0xf]  ;;  %v2436_v57 = vsel %vm7097_vm2, %v8040_v15, %v8034_v51  ;;  %v8196_v47 = vld [vmem:[%s7066_s28 + $0xc4] sm:$0xf] }
  0xb1   : > { %6678 = vmatprep.subr.bf16.mxu0 %v6930_v13  ;;  %v5681_v50 = vcombine.low %v9820_v58, %v2388_v25  ;;  %v2534_v25 = vshrl.u32 %v5652_v55, 16  ;;  %v2450_v9 = vsel %vm7097_vm2, %v8105_v14, %v8049_v19  ;;  %9824 = vst [vmem:[#allocation13_spill] sm:$0xff] %v8196_v47  ;;  %v8199_v51 = vld [vmem:[%s7066_s28 + $0xc8] sm:$0x1]  ;;  %v2567_v58 = vshll.u32 %v8196_v47, 16 }
  0xb2   : > { %6599 = vmatmul.mubr.bf16.gmra.mxu0 %v8057_v43  ;;  %6629 = vmatpush3.bf16.msra.mxu1 %v6925_v54  ;;  %v9822_v43 = vsel %vm7097_vm2, %v8007_v2, %v7945_v53  ;;  %v2525_v54 = vrot.slane %v2523_v1, 4  ;;  %v2537_v53 = vshll.u32 %v5652_v55, 16  ;;  %v2543_v2 = vshll.u32 %v8157_v11, 16 }
  0xb3   : > { %6602 = vmatprep.mubr.bf16.mxu0 %v8060_v52  ;;  %v5682_v33 = vcombine.low %v9822_v43, %v2412_v60  ;;  %6630 = vmatprep.subr.bf16.mxu1 %v6929_v29  ;;  %v6938_v52 = vld [vmem:[%s9754_s1 + $0x188] sm:$0xff]   ;;  %v2547_v60 = vshrl.u32 %v8157_v11, 16  ;;  %v2536_v15 = vrot.slane %v2534_v25, 4  ;;  %v9825_v55 = vrot.slane %v7604_v32, 5 }
  0xb4   : > { %6679 = vmatpush3.bf16.msra.mxu0 %v6930_v13  ;;  %v2460_v13 = vsel %vm7097_vm2, %v8121_v7, %v8107_v22  ;;  %v2539_v19 = vrot.slane %v2537_v53, 5  ;;  %v8201_v14 = vrot.slane %v2543_v2, 5  ;;  %v2558_v22 = vshrl.u32 %v5655_v37, 16  ;;  %v6924_v2 = vld [vmem:[%s7066_s28 + $0x60] sm:$0xff]  }
  0xb5   : > { %6551 = vmatmul.mubr.bf16.gmra.mxu1 %v6920_v48  ;;  %6680 = vmatprep.subr.bf16.mxu0 %v6934_v5  ;;  %v8193_v48 = vld [vmem:[%s7066_s28 + $0xbc] sm:$0x1]  ;;  %v2549_v1 = vrot.slane %v2547_v60, 4  ;;  %v2561_v7 = vshll.u32 %v5655_v37, 16  ;;  %v8206_v43 = vrot.slane %v9825_v55, 4  ;;  %v8211_v25 = vrot.slane %v2529_v35, 5 }
  0xb6   : > { %9823 = vst [vmem:[#allocation12_spill] sm:$0xff] %v8193_v48  ;;  %6554 = vmatprep.mubr.bf16.mxu1 %v6923_v63  ;;  %6631 = vmatpush3.bf16.msra.mxu1 %v6929_v29  ;;  %v2516_v63 = vor.u32 %v8142_v18, %v8136_v38  ;;  %v2526_v29 = vor.u32 %v2525_v54, %v8169_v46  ;;  %v2571_v53 = vshrl.u32 %v8196_v47, 16  ;;  %v2553_v60 = vshll.u32 %v8193_v48, 16  ;;  %v6927_v38 = vld [vmem:[%s7066_s28 + $0x6c] sm:$0xff]   ;;  %v8231_v48 = vld [vmem:[%s7066_s28 + $0x18] sm:$0xe] }
  0xb7   : > { %6632 = vmatprep.subr.bf16.mxu1 %v6933_v49  ;;  %v2560_v37 = vrot.slane %v2558_v22, 4  ;;  %v2563_v11 = vrot.slane %v2561_v7, 5  ;;  %v8216_v55 = vrot.slane %v2567_v58, 5  ;;  %v2540_v18 = vor.u32 %v2539_v19, %v2536_v15  ;;  %v6941_v22 = vld [vmem:[%s9754_s1 + $0x140] sm:$0xff]   ;;  %v8228_v58 = vld [vmem:[%s7066_s28 + $0xc] sm:$0xe] }
  0xb8   : > { %6681 = vmatpush3.bf16.msra.mxu0 %v6934_v5  ;;  %v6942_v5 = vld [vmem:[%s9754_s1 + $0x180] sm:$0xff]   ;;  %v2550_v35 = vor.u32 %v2549_v1, %v8201_v14  ;;  %v2573_v54 = vrot.slane %v2571_v53, 4  ;;  %v2577_v47 = vshll.u32 %v8199_v51, 16  ;;  %v5683_v15 = vcombine.low %v2426_v21, %v2436_v57 }
  0xb9   : > { %6682 = vmatprep.subr.bf16.mxu0 %v6938_v52  ;;  %v2564_v7 = vor.u32 %v2563_v11, %v2560_v37  ;;  %v5684_v19 = vcombine.low %v2450_v9, %v2460_v13  ;;  %v8239_v1 = vrot.slane %v2516_v63, 4  ;;  %v8241_v11 = vrot.slane %v2526_v29, 4  ;;  %v6928_v9 = vld [vmem:[%s7066_s28 + $0x78] sm:$0xff]   ;;  %v6931_v37 = vld [vmem:[%s7066_s28 + $0x84] sm:$0xff]  }
  0xba   : > { %6603 = vmatmul.mubr.bf16.gmra.mxu0 %v5681_v50  ;;  %6633 = vmatpush3.bf16.msra.mxu1 %v6933_v49  ;;  %v8236_v49 = vld [vmem:[%s9754_s1 + $0x238] sm:$0xff]   ;;  %v2574_v50 = vor.u32 %v2573_v54, %v8216_v55  ;;  %v8250_v53 = vrot.slane %v2550_v35, 4  ;;  %v8252_v21 = vrot.slane %v2553_v60, 5  ;;  %v8258_v63 = vrot.slane %v2577_v47, 5  ;;  %v5701_v60 = vld [vmem:[%s7066_s28 + $0x30] sm:$0xe] }
  0xbb   : > { %6606 = vmatprep.mubr.bf16.mxu0 %v5682_v33  ;;  %6634 = vmatprep.subr.bf16.mxu1 %v6937_v24  ;;  %v8246_v33 = vld [vmem:[%s9754_s1 + $0x1f8] sm:$0xff]   ;;  %v8256_v13 = vrot.slane %v2564_v7, 4  ;;  %v2972_v29 = vrot.slane %v7678_v42, 5  ;;  %v9826_v35 = vld [vmem:[#allocation2_spill] sm:$0xff]  ;;  %v5717_v47 = vrot.slane %v5701_v60, 9  ;;  %v9829_v60 = vld [vmem:[#allocation3_spill] sm:$0xff] }
  0xbc   : > { %6683 = vmatpush3.bf16.msra.mxu0 %v6938_v52  ;;  %v8248_v52 = vrot.slane %v2540_v18, 4  ;;  %v9827_v7 = vld [vmem:[#allocation5_spill] sm:$0xff]  ;;  %v2993_v18 = vrot.slane %v7761_v0, 5  ;;  %v2508_v0 = vsel %vm7097_vm2, %v8153_v30, %v8134_v6  ;;  %v3007_v30 = vrot.slane %v7852_v41, 5 }
  0xbd   : > { %6555 = vmatmul.mubr.bf16.gmra.mxu1 %v6924_v2  ;;  %6684 = vmatprep.subr.bf16.mxu0 %v6942_v5  ;;  %v2990_v57 = vrot.slane %v9827_v7, 5  ;;  %v9828_v2 = vld [vmem:[#allocation4_spill] sm:$0xff] }
  0xbe   : > { %6558 = vmatprep.mubr.bf16.mxu1 %v6927_v38  ;;  %6635 = vmatpush3.bf16.msra.mxu1 %v6937_v24  ;;  %v8263_v24 = vrot.slane %v2574_v50, 4  ;;  %v2976_v38 = vrot.slane %v7695_v61, 5  ;;  %v2474_v50 = vsel %vm7097_vm2, %v8123_v12, %v8055_v36  ;;  %v2997_v54 = vrot.slane %v9828_v2, 5  ;;  %v5702_v12 = vld [vmem:[%s7066_s28 + $0x3c] sm:$0xe] }
  0xbf   : > { %6636 = vmatprep.subr.bf16.mxu1 %v6941_v22  ;;  %v8285_v7 = vsel %vm7408_vm5, %v5717_v47, %v2990_v57  ;;  %v2992_v36 = vrot.slane %v2990_v57, 4  ;;  %v5718_v2 = vrot.slane %v5702_v12, 9  ;;  %v6932_v47 = vld [vmem:[%s7066_s28 + $0x90] sm:$0xff]   ;;  %v3014_v12 = vrot.slane %v7872_v34, 5 }
  0xc0   : > { %6685 = vmatpush3.bf16.msra.mxu0 %v6942_v5  ;;  %v2484_v5 = vsel %vm7097_vm2, %v8132_v28, %v8125_v59  ;;  %v2498_v59 = vsel %vm7097_vm2, %v8151_v40, %v8098_v20  ;;  %v2999_v28 = vrot.slane %v2997_v54, 4  ;;  %v3004_v20 = vrot.slane %v7811_v39, 5 }
  0xc1   : > { %6766 = vmatprep.subr.bf16.mxu0 %v8236_v49  ;;  %v8299_v57 = vsel %vm7408_vm5, %v2992_v36, %v2993_v18  ;;  %v5686_v18 = vcombine.low %v2498_v59, %v2508_v0  ;;  %v8314_v39 = vsel %vm7408_vm5, %v5718_v2, %v2997_v54  ;;  %v2522_v36 = vsel %vm7097_vm2, %v8239_v1, %v8169_v46  ;;  %v5704_v54 = vld [vmem:[%s7066_s28 + $0x54] sm:$0xe] }
  0xc2   : > { %6607 = vmatmul.mubr.bf16.gmra.mxu0 %v5683_v15  ;;  %6637 = vmatpush3.bf16.msra.mxu1 %v6941_v22  ;;  %v2986_v15 = vrot.slane %v9829_v60, 5  ;;  %v3000_v22 = vrot.slane %v7790_v45, 5  ;;  %v5749_v40 = vcombine.low %v8285_v7, %v8299_v57  ;;  %v5703_v45 = vld [vmem:[%s7066_s28 + $0x48] sm:$0xe]  ;;  %v2532_v46 = vsel %vm7097_vm2, %v8241_v11, %v8211_v25  ;;  %v6952_v7 = vld [vmem:[%s7066_s28 + $0x54] sm:$0xff]  }
  0xc3   : > { %6610 = vmatprep.mubr.bf16.mxu0 %v5684_v19  ;;  %6718 = vmatprep.subr.bf16.mxu1 %v8246_v33  ;;  %v5685_v19 = vcombine.low %v2474_v50, %v2484_v5  ;;  %v3006_v50 = vrot.slane %v3004_v20, 4  ;;  %v6935_v5 = vld [vmem:[%s7066_s28 + $0x9c] sm:$0xff]   ;;  %v3018_v2 = vrot.slane %v7876_v31, 5  ;;  %v2546_v34 = vsel %vm7097_vm2, %v8248_v52, %v8201_v14 }
  0xc4   : > { %v8306_v6 = vsel %vm7408_vm5, %v2999_v28, %v3000_v22  ;;  %v5720_v28 = vrot.slane %v5704_v54, 9  ;;  %v5705_v22 = vld [vmem:[%s7066_s28 + $0x60] sm:$0xe]  ;;  %v3021_v25 = vrot.slane %v7924_v16, 5  ;;  %v2556_v11 = vsel %vm7097_vm2, %v8250_v53, %v8252_v21 }
  0xc5   : > { %6559 = vmatmul.mubr.bf16.gmra.mxu1 %v6928_v9  ;;  %v3011_v9 = vrot.slane %v7846_v10, 5  ;;  %v5750_v41 = vcombine.low %v8314_v39, %v8306_v6  ;;  %v8329_v59 = vsel %vm7408_vm5, %v3006_v50, %v3007_v30  ;;  %v3025_v14 = vrot.slane %v7916_v8, 5  ;;  %v5931_v6 = vld [vmem:[%s7066_s28 + $0x24] sm:$0xe] }
  0xc6   : > { %6562 = vmatprep.mubr.bf16.mxu1 %v6931_v37  ;;  %v5719_v37 = vrot.slane %v5703_v45, 9  ;;  %v3020_v45 = vrot.slane %v3018_v2, 4  ;;  %v5687_v52 = vcombine.low %v2522_v36, %v2532_v46  ;;  %v3028_v8 = vrot.slane %v7937_v62, 5  ;;  %v5707_v36 = vld [vmem:[%s7066_s28 + $0x78] sm:$0xe] }
  0xc7   : > { %v3013_v0 = vrot.slane %v3011_v9, 4  ;;  %v8356_v31 = vsel %vm7408_vm5, %v5720_v28, %v3011_v9  ;;  %v3027_v9 = vrot.slane %v3025_v14, 4  ;;  %v3032_v54 = vrot.slane %v7941_v44, 5 }
  0xc8   : > { %v8325_v10 = vsel %vm7408_vm5, %v5719_v37, %v3004_v20  ;;  %v5721_v20 = vrot.slane %v5705_v22, 9  ;;  %v8368_v53 = vsel %vm7408_vm5, %v3020_v45, %v3021_v25  ;;  %v5688_v37 = vcombine.low %v2546_v34, %v2556_v11 }
  0xc9   : > { %v8384_v46 = vsel %vm7408_vm5, %v3027_v9, %v3028_v8  ;;  %v5723_v62 = vrot.slane %v5707_v36, 9  ;;  %v3039_v28 = vrot.slane %v7984_v3, 5  ;;  %v3034_v44 = vrot.slane %v3032_v54, 4  ;;  %v6943_v8 = vld [vmem:[%s7066_s28 + $0x18] sm:$0xff]   ;;  %v9834_v36 = vld [vmem:[#allocation8_spill] sm:$0xff] }
  0xca   : > { %6611 = vmatmul.mubr.bf16.gmra.mxu0 %v5685_v19  ;;  %v8347_v19 = vsel %vm7408_vm5, %v3013_v0, %v3014_v12  ;;  %v8363_v16 = vsel %vm7408_vm5, %v5721_v20, %v3018_v2  ;;  %v3035_v0 = vrot.slane %v7948_v26, 5  ;;  %v3042_v26 = vrot.slane %v8010_v17, 5  ;;  %v5708_v20 = vld [vmem:[%s7066_s28 + $0x84] sm:$0xe] }
  0xcb   : > { %6614 = vmatprep.mubr.bf16.mxu0 %v5686_v18  ;;  %v5706_v18 = vld [vmem:[%s7066_s28 + $0x6c] sm:$0xe]  ;;  %v2570_v2 = vsel %vm7097_vm2, %v8256_v13, %v8216_v55  ;;  %v8396_v34 = vsel %vm7408_vm5, %v5723_v62, %v3032_v54  ;;  %v2580_v3 = vsel %vm7097_vm2, %v8263_v24, %v8258_v63  ;;  %v5724_v25 = vrot.slane %v5708_v20, 9  ;;  %v9832_v63 = vld [vmem:[#allocation6_spill] sm:$0xff] }
  0xcc   : > { %v5722_v21 = vrot.slane %v5706_v18, 9  ;;  %v8405_v17 = vsel %vm7408_vm5, %v3034_v44, %v3035_v0  ;;  %v3041_v11 = vrot.slane %v3039_v28, 4  ;;  %v9830_v45 = vrot.slane %v7604_v32, 5  ;;  %v5709_v18 = vld [vmem:[%s7066_s28 + $0x90] sm:$0xe]  ;;  %v6955_v62 = vld [vmem:[%s7066_s28 + $0x60] sm:$0xff]  }
  0xcd   : > { %6563 = vmatmul.mubr.bf16.gmra.mxu1 %v6932_v47  ;;  %v6936_v47 = vld [vmem:[%s7066_s28 + $0xa8] sm:$0xff]   ;;  %v9831_v55 = vrot.slane %v8228_v58, 9  ;;  %v3046_v24 = vrot.slane %v9832_v63, 5  ;;  %v8422_v32 = vsel %vm7408_vm5, %v5724_v25, %v3039_v28  ;;  %v3053_v54 = vrot.slane %v9834_v36, 5 }
  0xce   : > { %6566 = vmatprep.mubr.bf16.mxu1 %v6935_v5  ;;  %v6939_v5 = vld [vmem:[%s7066_s28 + $0xb4] sm:$0xff]   ;;  %v8380_v12 = vsel %vm7408_vm5, %v5722_v21, %v3025_v14  ;;  %v5700_v14 = vld [vmem:[%s7066_s28 + $0x24] sm:$0xe]  ;;  %v9833_v21 = vld [vmem:[#allocation7_spill] sm:$0xff]  ;;  %v8426_v58 = vsel %vm7408_vm5, %v3041_v11, %v3042_v26  ;;  %v5689_v0 = vcombine.low %v2570_v2, %v2580_v3  ;;  %v2973_v28 = vsel %vm7408_vm5, %v8206_v43, %v2972_v29 }
  0xcf   : > { %v2970_v13 = vsel %vm7408_vm5, %v9831_v55, %v9830_v45  ;;  %v3049_v9 = vrot.slane %v9833_v21, 5  ;;  %v3048_v44 = vrot.slane %v3046_v24, 4  ;;  %v6940_v45 = vld [vmem:[%s7066_s28 + $0xc0] sm:$0xff]   ;;  %v2978_v26 = vrot.slane %v2976_v38, 4  ;;  %v5710_v2 = vld [vmem:[%s7066_s28 + $0x9c] sm:$0xe] }
  0xd0   : > { %v3055_v3 = vrot.slane %v3053_v54, 4  ;;  %v5726_v11 = vrot.slane %v5710_v2, 9  ;;  %v9836_v55 = vld [vmem:[#allocation10_spill] sm:$0xff]  ;;  %v5711_v63 = vld [vmem:[%s7066_s28 + $0xa8] sm:$0xe]  ;;  %v5746_v21 = vcombine.low %v2970_v13, %v2973_v28  ;;  %v9840_v28 = vrot.slane %v8231_v48, 9 }
  0xd1   : > { %v8447_v25 = vsel %vm7408_vm5, %v3048_v44, %v3049_v9  ;;  %v3060_v42 = vrot.slane %v9836_v55, 5  ;;  %v8570_v43 = vld [vmem:[%s7066_s28 + $0x34] sm:$0xf] }
  0xd2   : > { %6615 = vmatmul.mubr.bf16.gmra.mxu0 %v5687_v52  ;;  %v8460_v9 = vsel %vm7408_vm5, %v5726_v11, %v3053_v54  ;;  %v5712_v54 = vld [vmem:[%s7066_s28 + $0xb4] sm:$0xe]  ;;  %v3897_v39 = vshll.u32 %v8570_v43, 16 }
  0xd3   : > { %6618 = vmatprep.mubr.bf16.mxu0 %v5688_v37  ;;  %v5725_v37 = vrot.slane %v5709_v18, 9  ;;  %v5716_v18 = vrot.slane %v5700_v14, 9  ;;  %v3062_v36 = vrot.slane %v3060_v42, 4  ;;  %v9837_v14 = vrot.slane %v9826_v35, 5 }
  0xd4   : > { %v5728_v55 = vrot.slane %v5712_v54, 9 }
  0xd5   : > { %6567 = vmatmul.mubr.bf16.gmra.mxu1 %v6936_v47  ;;  %v9835_v47 = vld [vmem:[#allocation9_spill] sm:$0xff]  ;;  %v2985_v44 = vrot.slane %v9837_v14, 4  ;;  %v9842_v61 = vmov %v9837_v14  ;;  %v3077_v14 = vrot.slane %v8199_v51, 5  ;;  %v5848_v51 = vld [vmem:[%s7066_s28 + $0x30] sm:$0xf] }
  0xd6   : > { %6570 = vmatprep.mubr.bf16.mxu1 %v6939_v5  ;;  %v3056_v20 = vrot.slane %v9835_v47, 5  ;;  %v8442_v5 = vsel %vm7408_vm5, %v5725_v37, %v3046_v24  ;;  %v3063_v24 = vrot.slane %v8118_v4, 5  ;;  %v5727_v37 = vrot.slane %v5711_v63, 9 }
  0xd7   : > { %v9841_v63 = vrot.slane %v7709_v23, 5  ;;  %v2984_v48 = vsel %vm7408_vm5, %v5716_v18, %v9842_v61  ;;  %v2987_v23 = vsel %vm7408_vm5, %v2985_v44, %v2986_v15  ;;  %v8540_v61 = vld [vmem:[%s7066_s28 + $0x28] sm:$0xf] }
  0xd8   : > { %v8454_v29 = vsel %vm7408_vm5, %v3055_v3, %v3056_v20  ;;  %v9838_v20 = vld [vmem:[#allocation11_spill] sm:$0xff]  ;;  %v8469_v4 = vsel %vm7408_vm5, %v5727_v37, %v3060_v42  ;;  %v8473_v13 = vsel %vm7408_vm5, %v3062_v36, %v3063_v24  ;;  %v2977_v3 = vsel %vm7408_vm5, %v9840_v28, %v2976_v38  ;;  %v5713_v37 = vld [vmem:[%s7066_s28 + $0xc0] sm:$0xe]  ;;  %v9843_v38 = vld [vmem:[#allocation13_spill] sm:$0xff] }
  0xd9   : > { %v3067_v2 = vrot.slane %v9838_v20, 5  ;;  %v2980_v24 = vsel %vm7408_vm5, %v2978_v26, %v9841_v63  ;;  %v3074_v36 = vrot.slane %v9843_v38, 5  ;;  %v5729_v18 = vrot.slane %v5713_v37, 9  ;;  %v6950_v20 = vld [vmem:[%s9754_s1 + $0x230] sm:$0xff]   ;;  %v5845_v63 = vld [vmem:[%s7066_s28 + $0x24] sm:$0xf] }
  0xda   : > { %6619 = vmatmul.mubr.bf16.gmra.mxu0 %v5689_v0  ;;  %v5747_v15 = vcombine.low %v2977_v3, %v2980_v24  ;;  %v5748_v54 = vcombine.low %v2984_v48, %v2987_v23  ;;  %v6949_v28 = vld [vmem:[%s9754_s1 + $0x1f0] sm:$0xff]   ;;  %v6948_v48 = vld [vmem:[%s7066_s28 + $0x3c] sm:$0xff]   ;;  %v3864_v37 = vshrl.u32 %v5845_v63, 16  ;;  %v6951_v38 = vld [vmem:[%s7066_s28 + $0x48] sm:$0xff]   ;;  %v3873_v23 = vshll.u32 %v8540_v61, 16 }
  0xdb   : > { %6686 = vmatprep.mubr.bf16.mxu0 %v6943_v8  ;;  %v9839_v8 = vld [vmem:[#allocation12_spill] sm:$0xff]  ;;  %v3069_v42 = vrot.slane %v3067_v2, 4  ;;  %v8504_v26 = vsel %vm7408_vm5, %v5728_v55, %v3067_v2  ;;  %v3076_v60 = vrot.slane %v3074_v36, 4  ;;  %v8517_v44 = vsel %vm7408_vm5, %v5729_v18, %v3074_v36  ;;  %v5842_v2 = vld [vmem:[%s7066_s28 + $0x18] sm:$0xf]  ;;  %v6954_v55 = vld [vmem:[%s9754_s1 + $0x228] sm:$0xff]  }
  0xdc   : > { %v3070_v0 = vrot.slane %v9839_v8, 5  ;;  %v3843_v24 = vshll.u32 %v5842_v2, 16  ;;  %v6953_v36 = vld [vmem:[%s9754_s1 + $0x1e8] sm:$0xff]   ;;  %v5844_v18 = vld [vmem:[%s7066_s28 + $0x20] sm:$0x1]  ;;  %v3866_v11 = vrot.slane %v3864_v37, 4 }
  0xdd   : > { %6571 = vmatmul.mubr.bf16.gmra.mxu1 %v6940_v45  ;;  %v6944_v45 = vld [vmem:[%s7066_s28 + $0x24] sm:$0xff]   ;;  %v8522_v8 = vsel %vm7408_vm5, %v3076_v60, %v3077_v14  ;;  %v3867_v14 = vshll.u32 %v5845_v63, 16  ;;  %v8560_v63 = vld [vmem:[%s7066_s28 + $0x2c] sm:$0x1]  ;;  %v3888_v37 = vshrl.u32 %v5848_v51, 16 }
  0xde   : > { %6638 = vmatprep.mubr.bf16.mxu1 %v5746_v21  ;;  %v6947_v21 = vld [vmem:[%s7066_s28 + $0x30] sm:$0xff]   ;;  %v8508_v35 = vsel %vm7408_vm5, %v3069_v42, %v3070_v0  ;;  %v8525_v0 = vld [vmem:[%s7066_s28 + $0x1c] sm:$0xf]  ;;  %v3840_v42 = vshrl.u32 %v5842_v2, 16 }
  0xdf   : > { %v4611_v3 = vrot.slane %v8525_v0, 5  ;;  %v3869_v47 = vrot.slane %v3867_v14, 5 }
  0xe0   : > { %v3842_v60 = vrot.slane %v3840_v42, 4  ;;  %v6957_v42 = vld [vmem:[%s9754_s1 + $0x1e0] sm:$0xff]  }
  0xe2   : > { %6687 = vmatmul.mubr.bf16.vlgmr.msra.gmra.mxu0 %v6944_v45  ;;  %v3853_v45 = vshrl.u32 %v8525_v0, 16 }
  0xe3   : > { %6767 = vmatpush3.bf16.msra.mxu0 %v8236_v49  ;;  %6690 = vmatprep.mubr.bf16.mxu0 %v6947_v21  ;;  %v3849_v49 = vshll.u32 %v8525_v0, 16  ;;  %v3877_v21 = vshrl.u32 %v8540_v61, 16 }
  0xe4   : > { %6768 = vmatprep.subr.bf16.mxu0 %v6950_v20 }
  0xe5   : > { %6639 = vmatmul.mubr.bf16.vlgmr.msra.gmra.mxu1 %v5747_v15  ;;  %v5930_v15 = vld [vmem:[%s7066_s28 + $0x18] sm:$0xe]  ;;  %v8555_v2 = vrot.slane %v3849_v49, 5  ;;  %v3859_v49 = vshll.u32 %v5844_v18, 16  ;;  %v3879_v0 = vrot.slane %v3877_v21, 4 }
  0xe6   : > { %6719 = vmatpush3.bf16.msra.mxu1 %v8246_v33  ;;  %6642 = vmatprep.mubr.bf16.mxu1 %v5748_v54  ;;  %v6958_v33 = vld [vmem:[%s9754_s1 + $0x220] sm:$0xff]   ;;  %v3855_v54 = vrot.slane %v3853_v45, 4  ;;  %v8567_v45 = vrot.slane %v3873_v23, 5  ;;  %v6962_v23 = vld [vmem:[%s9754_s1 + $0x218] sm:$0xff]  }
  0xe7   : > { %6720 = vmatprep.subr.bf16.mxu1 %v6949_v28  ;;  %6769 = vmatpush3.bf16.msra.mxu0 %v6950_v20  ;;  %v3845_v20 = vrot.slane %v3843_v24, 5 }
  0xe8   : > { %6770 = vmatprep.subr.bf16.mxu0 %v6954_v55  ;;  %v3856_v21 = vor.u32 %v3855_v54, %v8555_v2  ;;  %v3880_v54 = vor.u32 %v3879_v0, %v8567_v45 }
  0xea   : > { %6691 = vmatmul.mubr.bf16.gmra.mxu0 %v6948_v48  ;;  %6721 = vmatpush3.bf16.msra.mxu1 %v6949_v28  ;;  %v5946_v48 = vrot.slane %v5930_v15, 9  ;;  %v4614_v28 = vrot.slane %v5844_v18, 5  ;;  %v4613_v18 = vrot.slane %v4611_v3, 4  ;;  %v3883_v15 = vshll.u32 %v8560_v63, 16 }
  0xeb   : > { %6694 = vmatprep.mubr.bf16.mxu0 %v6951_v38  ;;  %6722 = vmatprep.subr.bf16.mxu1 %v6953_v36  ;;  %v3891_v38 = vshll.u32 %v5848_v51, 16  ;;  %v4618_v51 = vrot.slane %v8540_v61, 5  ;;  %v3901_v61 = vshrl.u32 %v8570_v43, 16 }
  0xec   : > { %6771 = vmatpush3.bf16.msra.mxu0 %v6954_v55  ;;  %v3846_v55 = vor.u32 %v3845_v20, %v3842_v60  ;;  %v6961_v60 = vld [vmem:[%s9754_s1 + $0x1d8] sm:$0xff]   ;;  %v8593_v20 = vrot.slane %v3859_v49, 5  ;;  %v6966_v49 = vld [vmem:[%s9754_s1 + $0x210] sm:$0xff]  }
  0xed   : > { %v8565_v24 = vpop.f32.mrf.mxu0  ;;  %6643 = vmatmul.mubr.bf16.gmra.mxu1 %v5749_v40  ;;  %6772 = vmatprep.subr.bf16.mxu0 %v6958_v33  ;;  %v8575_v14 = vpop.f32.mrf.mxu1  ;;  %v3870_v40 = vor.u32 %v3869_v47, %v3866_v11  ;;  %v3890_v47 = vrot.slane %v3888_v37, 4  ;;  %v3893_v11 = vrot.slane %v3891_v38, 5  ;;  %v8620_v37 = vld [vmem:[%s7066_s28 + $0x40] sm:$0xf]  ;;  %v4620_v50 = vrot.slane %v4618_v51, 4 }
  0xee   : > { %9844 = vst [vmem:[#allocation2_spill] sm:$0xff] %v8575_v14  ;;  %6646 = vmatprep.mubr.bf16.mxu1 %v5750_v41  ;;  %6723 = vmatpush3.bf16.msra.mxu1 %v6953_v36  ;;  %v8600_v41 = vsel %vm7408_vm5, %v5946_v48, %v4611_v3  ;;  %v5851_v36 = vld [vmem:[%s7066_s28 + $0x3c] sm:$0xf]  ;;  %v8609_v0 = vrot.slane %v3846_v55, 4  ;;  %v8615_v3 = vsel %vm7408_vm5, %v4613_v18, %v4614_v28  ;;  %v8617_v48 = vrot.slane %v3883_v15, 5  ;;  %v6965_v55 = vld [vmem:[%s9754_s1 + $0x1d0] sm:$0xff]  }
  0xef   : > { %v8586_v57 = vpop.f32.mrf.mxu0  ;;  %6724 = vmatprep.subr.bf16.mxu1 %v6957_v42  ;;  %v8604_v52 = vpop.f32.mrf.mxu1  ;;  %v8627_v22 = vrot.slane %v3870_v40, 4  ;;  %v4621_v28 = vrot.slane %v8560_v63, 5  ;;  %v3881_v18 = vrot.slane %v3880_v54, 4  ;;  %v8631_v15 = vld [vmem:[%s7066_s28 + $0x38] sm:$0x1]  ;;  %v3915_v30 = vshll.u32 %v5851_v36, 16 }
  0xf0   : > { %6773 = vmatpush3.bf16.msra.mxu0 %v6958_v33  ;;  %9845 = vst [vmem:[#allocation5_spill] sm:$0xff] %v8604_v52  ;;  %v8611_v33 = vrot.slane %v3856_v21, 4  ;;  %v5947_v21 = vrot.slane %v5931_v6, 9  ;;  %v3894_v1 = vor.u32 %v3893_v11, %v3890_v47  ;;  %v8635_v52 = vrot.slane %v3901_v61, 4  ;;  %v5932_v40 = vld [vmem:[%s7066_s28 + $0x30] sm:$0xe] }
  0xf1   : > { %6774 = vmatprep.subr.bf16.mxu0 %v6962_v23  ;;  %v8622_v38 = vpop.f32.mrf.mxu0  ;;  %v3921_v6 = vshll.u32 %v8620_v37, 16  ;;  %v3925_v63 = vshrl.u32 %v8620_v37, 16  ;;  %v8643_v54 = vpop.f32.mrf.mxu1  ;;  %v9848_v11 = vcombine.low %v8356_v31, %v8347_v19  ;;  %v6956_v61 = vld [vmem:[%s7066_s28 + $0x6c] sm:$0xff]   ;;  %v8676_v19 = vsel %vm7408_vm5, %v4620_v50, %v4621_v28  ;;  %v8694_v28 = vld [vmem:[%s7066_s28 + $0x44] sm:$0x1] }
  0xf2   : > { %6695 = vmatmul.mubr.bf16.gmra.mxu0 %v6952_v7  ;;  %6725 = vmatpush3.bf16.msra.mxu1 %v6957_v42  ;;  %v8633_v7 = vrot.slane %v3897_v39, 5  ;;  %v3912_v42 = vshrl.u32 %v5851_v36, 16  ;;  %9847 = vst [vmem:[#allocation4_spill] sm:$0xff] %v8643_v54  ;;  %v3852_v39 = vsel %vm7097_vm2, %v8609_v0, %v8555_v2  ;;  %v3862_v47 = vsel %vm7097_vm2, %v8611_v33, %v8593_v20  ;;  %v6959_v36 = vld [vmem:[%s7066_s28 + $0x78] sm:$0xff]   ;;  %v8687_v33 = vld [vmem:[%s7066_s28 + $0x4c] sm:$0xf] }
  0xf3   : > { %6698 = vmatprep.mubr.bf16.mxu0 %v6955_v62  ;;  %6726 = vmatprep.subr.bf16.mxu1 %v6961_v60  ;;  %v9846_v62 = vcombine.low %v8325_v10, %v8329_v59  ;;  %v4625_v59 = vrot.slane %v8570_v43, 5  ;;  %v3876_v2 = vsel %vm7097_vm2, %v8627_v22, %v8567_v45  ;;  %v8672_v20 = vsel %vm7408_vm5, %v5947_v21, %v4618_v51  ;;  %v5854_v43 = vld [vmem:[%s7066_s28 + $0x48] sm:$0xf]  ;;  %v8698_v54 = vpop.f32.mrf.mxu1  ;;  %v5933_v14 = vld [vmem:[%s7066_s28 + $0x3c] sm:$0xe] }
  0xf4   : > { %6775 = vmatpush3.bf16.msra.mxu0 %v6962_v23  ;;  %v6970_v23 = vld [vmem:[%s9754_s1 + $0x208] sm:$0xff]   ;;  %v3907_v31 = vshll.u32 %v8631_v15, 16  ;;  %v3886_v22 = vsel %vm7097_vm2, %v3881_v18, %v8617_v48  ;;  %v5948_v45 = vrot.slane %v5932_v40, 9  ;;  %v3914_v0 = vrot.slane %v3912_v42, 4  ;;  %9850 = vst [vmem:[#allocation6_spill] sm:$0xff] %v8698_v54  ;;  %v6973_v42 = vld [vmem:[%s9754_s1 + $0x1c0] sm:$0xff]  }
  0xf5   : > { %6647 = vmatmul.mubr.bf16.gmra.mxu1 %v9846_v62  ;;  %6776 = vmatprep.subr.bf16.mxu0 %v6966_v49  ;;  %v8664_v62 = vpop.f32.mrf.mxu0  ;;  %v3917_v51 = vrot.slane %v3915_v30, 5  ;;  %v8689_v50 = vrot.slane %v3894_v1, 4  ;;  %v3904_v21 = vor.u32 %v8635_v52, %v8633_v7  ;;  %v3927_v10 = vrot.slane %v3925_v63, 4  ;;  %v6974_v30 = vld [vmem:[%s9754_s1 + $0x200] sm:$0xff]  }
  0xf6   : > { %6650 = vmatprep.mubr.bf16.mxu1 %v9848_v11  ;;  %6727 = vmatpush3.bf16.msra.mxu1 %v6961_v60  ;;  %9849 = vst [vmem:[#allocation3_spill] sm:$0xff] %v8664_v62  ;;  %v6969_v60 = vld [vmem:[%s9754_s1 + $0x1c8] sm:$0xff]   ;;  %v8696_v11 = vrot.slane %v3921_v6, 5  ;;  %v4627_v48 = vrot.slane %v4625_v59, 4  ;;  %v3936_v1 = vshrl.u32 %v5854_v43, 16  ;;  %v3939_v18 = vshll.u32 %v5854_v43, 16 }
  0xf7   : > { %6728 = vmatprep.subr.bf16.mxu1 %v6965_v55  ;;  %v8709_v40 = vcombine.low %v3852_v39, %v3862_v47  ;;  %v3949_v63 = vshrl.u32 %v8687_v33, 16  ;;  %v8717_v43 = vrot.slane %v3907_v31, 5  ;;  %v3931_v54 = vshll.u32 %v8694_v28, 16  ;;  %v5857_v39 = vld [vmem:[%s7066_s28 + $0x54] sm:$0xf]  ;;  %v6960_v6 = vld [vmem:[%s7066_s28 + $0x84] sm:$0xff]  }
  0xf8   : > { %6777 = vmatpush3.bf16.msra.mxu0 %v6966_v49  ;;  %v4628_v49 = vrot.slane %v8631_v15, 5  ;;  %v8704_v52 = vpop.f32.mrf.mxu0  ;;  %v3945_v15 = vshll.u32 %v8687_v33, 16  ;;  %v4632_v31 = vrot.slane %v8620_v37, 5  ;;  %v9854_v37 = vcombine.low %v8380_v12, %v8384_v46  ;;  %v6963_v47 = vld [vmem:[%s7066_s28 + $0x90] sm:$0xff]  }
  0xf9   : > { %6778 = vmatprep.subr.bf16.mxu0 %v6970_v23  ;;  %9851 = vst [vmem:[#allocation7_spill] sm:$0xff] %v8704_v52 }
  0xfa   : > { %6699 = vmatmul.mubr.bf16.gmra.mxu0 %v6956_v61  ;;  %6729 = vmatpush3.bf16.msra.mxu1 %v6965_v55  ;;  %v8715_v61 = vcombine.low %v3876_v2, %v3886_v22  ;;  %v3918_v55 = vor.u32 %v3917_v51, %v3914_v0  ;;  %v3928_v2 = vor.u32 %v3927_v10, %v8696_v11  ;;  %v8733_v22 = vld [vmem:[%s7066_s28 + $0x58] sm:$0xf]  ;;  %v8740_v51 = vrot.slane %v3904_v21, 4 }
  0xfb   : > { %6702 = vmatprep.mubr.bf16.mxu0 %v6959_v36  ;;  %6730 = vmatprep.subr.bf16.mxu1 %v6969_v60  ;;  %v8728_v36 = vsel %vm7408_vm5, %v5948_v45, %v4625_v59  ;;  %v9852_v0 = vcombine.low %v8363_v16, %v8368_v53  ;;  %v8744_v59 = vsel %vm7408_vm5, %v4627_v48, %v4628_v49  ;;  %v3938_v45 = vrot.slane %v3936_v1, 4  ;;  %v8751_v16 = vpop.f32.mrf.mxu0  ;;  %v5856_v1 = vld [vmem:[%s7066_s28 + $0x50] sm:$0x1] }
  0xfc   : > { %6779 = vmatpush3.bf16.msra.mxu0 %v6970_v23  ;;  %v8738_v23 = vpop.f32.mrf.mxu1  ;;  %v3941_v10 = vrot.slane %v3939_v18, 5  ;;  %9855 = vst [vmem:[#allocation9_spill] sm:$0xff] %v8751_v16  ;;  %v5949_v53 = vrot.slane %v5933_v14, 9  ;;  %v3951_v21 = vrot.slane %v3949_v63, 4  ;;  %v3919_v48 = vrot.slane %v3918_v55, 4 }
  0xfd   : > { %6651 = vmatmul.mubr.bf16.gmra.mxu1 %v9852_v0  ;;  %9853 = vst [vmem:[#allocation8_spill] sm:$0xff] %v8738_v23  ;;  %6780 = vmatprep.subr.bf16.mxu0 %v6974_v30  ;;  %v8753_v0 = vrot.slane %v3945_v15, 5  ;;  %v3960_v23 = vshrl.u32 %v5857_v39, 16  ;;  %v3933_v49 = vrot.slane %v3931_v54, 5  ;;  %v3963_v18 = vshll.u32 %v5857_v39, 16  ;;  %v8769_v39 = vpop.f32.mrf.mxu0 }
  0xfe   : > { %6654 = vmatprep.mubr.bf16.mxu1 %v9854_v37  ;;  %6731 = vmatpush3.bf16.msra.mxu1 %v6969_v60  ;;  %v3969_v52 = vshll.u32 %v8733_v22, 16  ;;  %v3929_v12 = vrot.slane %v3928_v2, 4  ;;  %v4634_v46 = vrot.slane %v4632_v31, 4  ;;  %v4635_v37 = vrot.slane %v8694_v28, 5  ;;  %v8759_v60 = vpop.f32.mrf.mxu1  ;;  %v5860_v55 = vld [vmem:[%s7066_s28 + $0x60] sm:$0xf] }
  0xff   : > { %6732 = vmatprep.subr.bf16.mxu1 %v6973_v42  ;;  %v3973_v14 = vshrl.u32 %v8733_v22, 16  ;;  %9856 = vst [vmem:[#allocation10_spill] sm:$0xff] %v8759_v60  ;;  %v3910_v15 = vsel %vm7097_vm2, %v8740_v51, %v8717_v43  ;;  %v3942_v63 = vor.u32 %v3941_v10, %v3938_v45  ;;  %v3952_v28 = vor.u32 %v3951_v21, %v8753_v0  ;;  %v5934_v60 = vld [vmem:[%s7066_s28 + $0x48] sm:$0xe] }
 0x100   : > { %6781 = vmatpush3.bf16.msra.mxu0 %v6974_v30  ;;  %v4639_v30 = vrot.slane %v8687_v33, 5  ;;  %v3955_v2 = vshll.u32 %v5856_v1, 16  ;;  %v3962_v16 = vrot.slane %v3960_v23, 4  ;;  %v3965_v62 = vrot.slane %v3963_v18, 5  ;;  %v8794_v10 = vpop.f32.mrf.mxu1 }
 0x101   : > { %v3924_v43 = vsel %vm7097_vm2, %v3919_v48, %v8696_v11  ;;  %v8778_v33 = vsel %vm7408_vm5, %v5949_v53, %v4632_v31  ;;  %v3934_v51 = vsel %vm7097_vm2, %v3929_v12, %v3933_v49  ;;  %v8786_v23 = vsel %vm7408_vm5, %v4634_v46, %v4635_v37  ;;  %9858 = vst [vmem:[#allocation11_spill] sm:$0xff] %v8794_v10  ;;  %v8797_v49 = vld [vmem:[%s7066_s28 + $0x64] sm:$0xf]  ;;  %v6964_v12 = vld [vmem:[%s7066_s28 + $0x9c] sm:$0xff]   ;;  %v8803_v46 = vpop.f32.mrf.mxu0 }
 0x102   : > { %6703 = vmatmul.mubr.bf16.gmra.mxu0 %v6960_v6  ;;  %6733 = vmatpush3.bf16.msra.mxu1 %v6973_v42  ;;  %v8780_v6 = vrot.slane %v3969_v52, 5  ;;  %v3975_v42 = vrot.slane %v3973_v14, 4  ;;  %v3984_v45 = vshrl.u32 %v5860_v55, 16  ;;  %v3987_v11 = vshll.u32 %v5860_v55, 16  ;;  %v6967_v55 = vld [vmem:[%s7066_s28 + $0xa8] sm:$0xff]  }
 0x103   : > { %6706 = vmatprep.mubr.bf16.mxu0 %v6963_v47  ;;  %v8789_v47 = vld [vmem:[%s7066_s28 + $0x5c] sm:$0x1]  ;;  %v9857_v31 = vcombine.low %v8396_v34, %v8405_v17  ;;  %v3943_v52 = vrot.slane %v3942_v63, 4  ;;  %v5950_v53 = vrot.slane %v5934_v60, 9  ;;  %v4641_v21 = vrot.slane %v4639_v30, 4 }
 0x104   : > { %v4642_v48 = vrot.slane %v5856_v1, 5  ;;  %v9859_v18 = vcombine.low %v8422_v32, %v8426_v58  ;;  %v3953_v37 = vrot.slane %v3952_v28, 4  ;;  %v3957_v14 = vrot.slane %v3955_v2, 5  ;;  %v5935_v63 = vld [vmem:[%s7066_s28 + $0x54] sm:$0xe]  ;;  %v8821_v28 = vpop.f32.mrf.mxu1 }
 0x105   : > { %6655 = vmatmul.mubr.bf16.gmra.mxu1 %v9857_v31  ;;  %v3966_v34 = vor.u32 %v3965_v62, %v3962_v16  ;;  %v4646_v17 = vrot.slane %v8733_v22, 5  ;;  %v3976_v60 = vor.u32 %v3975_v42, %v8780_v6  ;;  %v3979_v1 = vshll.u32 %v8789_v47, 16  ;;  %9861 = vst [vmem:[#allocation12_spill] sm:$0xff] %v8821_v28  ;;  %v5936_v62 = vld [vmem:[%s7066_s28 + $0x60] sm:$0xe] }
 0x106   : > { %6658 = vmatprep.mubr.bf16.mxu1 %v9859_v18  ;;  %v3986_v31 = vrot.slane %v3984_v45, 4  ;;  %v3989_v54 = vrot.slane %v3987_v11, 5  ;;  %v9860_v32 = vsel %vm7097_vm2, %v8689_v50, %v8633_v7  ;;  %v3993_v22 = vshll.u32 %v8797_v49, 16 }
 0x107   : > { %v8815_v58 = vcombine.low %v9860_v32, %v3910_v15  ;;  %v3997_v16 = vshrl.u32 %v8797_v49, 16  ;;  %v8823_v2 = vcombine.low %v3924_v43, %v3934_v51  ;;  %v3948_v42 = vsel %vm7097_vm2, %v3943_v52, %v8753_v0  ;;  %v5863_v15 = vld [vmem:[%s7066_s28 + $0x6c] sm:$0xf]  ;;  %v8841_v32 = vld [vmem:[%s7066_s28 + $0x70] sm:$0xf] }
 0x108   : > { %v8830_v7 = vsel %vm7408_vm5, %v5950_v53, %v4639_v30  ;;  %v8834_v50 = vsel %vm7408_vm5, %v4641_v21, %v4642_v48  ;;  %v8837_v45 = vpop.f32.mrf.mxu0  ;;  %v3967_v43 = vrot.slane %v3966_v34, 4  ;;  %v5951_v51 = vrot.slane %v5935_v63, 9  ;;  %v5862_v53 = vld [vmem:[%s7066_s28 + $0x68] sm:$0x1] }
 0x109   : > { %9862 = vst [vmem:[#allocation13_spill] sm:$0xff] %v8837_v45  ;;  %v4648_v11 = vrot.slane %v4646_v17, 4  ;;  %v4649_v18 = vrot.slane %v8789_v47, 5  ;;  %v3958_v0 = vsel %vm7097_vm2, %v3953_v37, %v3957_v14  ;;  %v3977_v30 = vrot.slane %v3976_v60, 4  ;;  %v5938_v45 = vld [vmem:[%s7066_s28 + $0x78] sm:$0xe] }
 0x10a   : > { %6707 = vmatmul.mubr.bf16.gmra.mxu0 %v6964_v12  ;;  %v3981_v52 = vrot.slane %v3979_v1, 5  ;;  %v3990_v21 = vor.u32 %v3989_v54, %v3986_v31  ;;  %v8846_v48 = vrot.slane %v3993_v22, 5  ;;  %v3999_v12 = vrot.slane %v3997_v16, 4  ;;  %v6968_v31 = vld [vmem:[%s7066_s28 + $0xb4] sm:$0xff]  }
 0x10b   : > { %6710 = vmatprep.mubr.bf16.mxu0 %v6967_v55  ;;  %v4008_v34 = vshrl.u32 %v5863_v15, 16  ;;  %v4011_v63 = vshll.u32 %v5863_v15, 16  ;;  %v9863_v47 = vcombine.low %v8442_v5, %v8447_v25  ;;  %v4653_v14 = vrot.slane %v8797_v49, 5  ;;  %v8863_v5 = vpop.f32.mrf.mxu0 }
 0x10c   : > { %v4017_v54 = vshll.u32 %v8841_v32, 16  ;;  %v4021_v60 = vshrl.u32 %v8841_v32, 16  ;;  %v9865_v1 = vcombine.low %v8460_v9, %v8454_v29  ;;  %9866 = vst [vmem:[#allocation15_spill] sm:$0xff] %v8863_v5  ;;  %v8865_v25 = vcombine.low %v3948_v42, %v3958_v0  ;;  %v5866_v29 = vld [vmem:[%s7066_s28 + $0x78] sm:$0xf]  ;;  %v6971_v9 = vld [vmem:[%s7066_s28 + $0xc0] sm:$0xff]  }
 0x10d   : > { %6659 = vmatmul.mubr.bf16.gmra.mxu1 %v9863_v47  ;;  %v8852_v55 = vpop.f32.mrf.mxu1  ;;  %v3972_v22 = vsel %vm7097_vm2, %v3967_v43, %v8780_v6  ;;  %v8872_v49 = vsel %vm7408_vm5, %v5951_v51, %v4646_v17  ;;  %v8876_v16 = vsel %vm7408_vm5, %v4648_v11, %v4649_v18  ;;  %v3982_v15 = vsel %vm7097_vm2, %v3977_v30, %v3981_v52  ;;  %v8889_v43 = vld [vmem:[%s7066_s28 + $0x74] sm:$0x1]  ;;  %v8946_v5 = vld [vmem:[%s7066_s28 + $0x8c] sm:$0x1] }
 0x10e   : > { %9864 = vst [vmem:[#allocation14_spill] sm:$0xff] %v8852_v55  ;;  %6662 = vmatprep.mubr.bf16.mxu1 %v9865_v1  ;;  %v8882_v47 = vrot.slane %v3990_v21, 4  ;;  %v4003_v42 = vshll.u32 %v5862_v53, 16  ;;  %v5952_v0 = vrot.slane %v5936_v62, 9  ;;  %v8885_v1 = vld [vmem:[%s7066_s28 + $0x7c] sm:$0xf]  ;;  %v4000_v6 = vor.u32 %v3999_v12, %v8846_v48  ;;  %v8895_v21 = vpop.f32.mrf.mxu0 }
 0x10f   : > { %v4656_v17 = vrot.slane %v5862_v53, 5  ;;  %v4010_v51 = vrot.slane %v4008_v34, 4  ;;  %v4013_v11 = vrot.slane %v4011_v63, 5  ;;  %v8891_v18 = vpop.f32.mrf.mxu1  ;;  %v4655_v37 = vrot.slane %v4653_v14, 4  ;;  %9868 = vst [vmem:[#allocation17_spill] sm:$0xff] %v8895_v21 }
 0x110   : > { %9867 = vst [vmem:[#allocation16_spill] sm:$0xff] %v8891_v18  ;;  %v8893_v55 = vrot.slane %v4017_v54, 5  ;;  %v4023_v30 = vrot.slane %v4021_v60, 4  ;;  %v4032_v52 = vshrl.u32 %v5866_v29, 16  ;;  %v5937_v53 = vld [vmem:[%s7066_s28 + $0x6c] sm:$0xe]  ;;  %v8902_v18 = vcombine.low %v3972_v22, %v3982_v15 }
 0x111   : > { %v4035_v12 = vshll.u32 %v5866_v29, 16  ;;  %v4041_v34 = vshll.u32 %v8885_v1, 16  ;;  %v4045_v63 = vshrl.u32 %v8885_v1, 16  ;;  %v8904_v54 = vrot.slane %v4003_v42, 5  ;;  %v5869_v62 = vld [vmem:[%s7066_s28 + $0x84] sm:$0xf]  ;;  %v8925_v42 = vpop.f32.mrf.mxu1 }
 0x112   : > { %6711 = vmatmul.mubr.bf16.gmra.mxu0 %v6968_v31  ;;  %9869 = vst [vmem:[#allocation18_spill] sm:$0xff] %v8902_v18  ;;  %v8908_v60 = vsel %vm7408_vm5, %v5952_v0, %v4653_v14  ;;  %v4027_v31 = vshll.u32 %v8889_v43, 16  ;;  %v8916_v28 = vrot.slane %v4000_v6, 4  ;;  %v4660_v22 = vrot.slane %v8841_v32, 5  ;;  %v8920_v15 = vld [vmem:[%s7066_s28 + $0x88] sm:$0xf] }
 0x113   : > { %6714 = vmatprep.mubr.bf16.mxu0 %v6971_v9  ;;  %v4014_v9 = vor.u32 %v4013_v11, %v4010_v51  ;;  %v9870_v14 = vcombine.low %v8469_v4, %v8473_v13  ;;  %9871 = vst [vmem:[#allocation19_spill] sm:$0xff] %v8925_v42  ;;  %v6972_v0 = vld [vmem:[%s7066_s28 + $0xcc] sm:$0xff]   ;;  %v8930_v10 = vsel %vm7408_vm5, %v4655_v37, %v4656_v17  ;;  %v5953_v6 = vrot.slane %v5937_v53, 9  ;;  %v8933_v11 = vpop.f32.mrf.mxu0  ;;  %v8939_v4 = vld [vmem:[%s7066_s28 + $0x80] sm:$0x1] }
 0x114   : > { %v4024_v29 = vor.u32 %v4023_v30, %v8893_v55  ;;  %v4034_v51 = vrot.slane %v4032_v52, 4  ;;  %9872 = vst [vmem:[#allocation20_spill] sm:$0xff] %v8933_v11  ;;  %v9873_v32 = vcombine.low %v8504_v26, %v8508_v35  ;;  %v4037_v13 = vrot.slane %v4035_v12, 5 }
 0x115   : > { %6663 = vmatmul.mubr.bf16.gmra.mxu1 %v9870_v14  ;;  %v8941_v14 = vrot.slane %v4041_v34, 5  ;;  %v4047_v42 = vrot.slane %v4045_v63, 4  ;;  %v4056_v21 = vshrl.u32 %v5869_v62, 16  ;;  %v4029_v37 = vrot.slane %v4027_v31, 5 }
 0x116   : > { %6666 = vmatprep.mubr.bf16.mxu1 %v9873_v32  ;;  %v4663_v17 = vrot.slane %v8889_v43, 5  ;;  %v4059_v30 = vshll.u32 %v5869_v62, 16  ;;  %v4065_v52 = vshll.u32 %v8920_v15, 16  ;;  %v4015_v53 = vrot.slane %v4014_v9, 4  ;;  %v8949_v32 = vpop.f32.mrf.mxu1 }
 0x117   : > { %v4662_v11 = vrot.slane %v4660_v22, 4  ;;  %v4058_v26 = vrot.slane %v4056_v21, 4  ;;  %v4069_v35 = vshrl.u32 %v8920_v15, 16  ;;  %v4025_v12 = vrot.slane %v4024_v29, 4 }
 0x118   : > { %v4051_v34 = vshll.u32 %v8939_v4, 16  ;;  %v4061_v63 = vrot.slane %v4059_v30, 5  ;;  %v8952_v31 = vrot.slane %v4065_v52, 5  ;;  %v4038_v62 = vor.u32 %v4037_v13, %v4034_v51  ;;  %v5939_v52 = vld [vmem:[%s7066_s28 + $0x84] sm:$0xe] }
 0x119   : > { %v8954_v43 = vpop.f32.mrf.mxu0  ;;  %v4048_v9 = vor.u32 %v4047_v42, %v8941_v14  ;;  %v4667_v21 = vrot.slane %v8885_v1, 5  ;;  %v4071_v18 = vrot.slane %v4069_v35, 4  ;;  %v9874_v29 = vcombine.low %v8600_v41, %v8615_v3 }
 0x11a   : > { %6715 = vmatmul.mubr.bf16.gmra.mxu0 %v6972_v0  ;;  %v4006_v30 = vsel %vm7097_vm2, %v8916_v28, %v8904_v54  ;;  %v8970_v51 = vsel %vm7408_vm5, %v5953_v6, %v4660_v22  ;;  %v4075_v42 = vshll.u32 %v8946_v5, 16  ;;  %v4020_v41 = vsel %vm7097_vm2, %v4015_v53, %v8893_v55  ;;  %v5872_v54 = vld [vmem:[%s7066_s28 + $0x90] sm:$0xf] }
 0x11b   : > { %6782 = vmatprep.mubr.bf16.mxu0 %v9874_v29  ;;  %v8973_v1 = vpop.f32.mrf.mxu0  ;;  %v4062_v3 = vor.u32 %v4061_v63, %v4058_v26  ;;  %v4072_v13 = vor.u32 %v4071_v18, %v8952_v31  ;;  %v4674_v28 = vrot.slane %v8920_v15, 5  ;;  %v9876_v22 = vcombine.low %v8517_v44, %v8522_v8 }
 0x11c   : > { %v4030_v6 = vsel %vm7097_vm2, %v4025_v12, %v4029_v37  ;;  %v8991_v55 = vsel %vm7408_vm5, %v4662_v11, %v4663_v17  ;;  %v4053_v53 = vrot.slane %v4051_v34, 5  ;;  %v5954_v18 = vrot.slane %v5938_v45, 9  ;;  %v9000_v12 = vld [vmem:[%s7066_s28 + $0x94] sm:$0xf] }
 0x11d   : > { %v8982_v35 = vpop.f32.mrf.mxu1  ;;  %6667 = vmatmul.mubr.bf16.gmra.mxu1 %v9876_v22  ;;  %v8993_v26 = vpop.f32.mrf.mxu0  ;;  %v4039_v15 = vrot.slane %v4038_v62, 4  ;;  %v4049_v63 = vrot.slane %v4048_v9, 4  ;;  %v4669_v29 = vrot.slane %v4667_v21, 4  ;;  %v4670_v0 = vrot.slane %v8939_v4, 5 }
 0x11e   : > { %9875 = vst [vmem:[#allocation21_spill] sm:$0xff] %v8982_v35  ;;  %6734 = vmatprep.mubr.bf16.mxu1 %v8709_v40  ;;  %v4077_v8 = vrot.slane %v4075_v42, 5  ;;  %v5955_v37 = vrot.slane %v5939_v52, 9  ;;  %v4080_v11 = vshrl.u32 %v5872_v54, 16  ;;  %v4083_v17 = vshll.u32 %v5872_v54, 16 }
 0x11f   : > { %v8997_v44 = vpop.f32.mrf.mxu1  ;;  %v9002_v34 = vpop.f32.mrf.mxu0  ;;  %v4063_v45 = vrot.slane %v4062_v3, 4  ;;  %v4073_v22 = vrot.slane %v4072_v13, 4  ;;  %v4676_v40 = vrot.slane %v4674_v28, 4  ;;  %v4677_v62 = vrot.slane %v8946_v5, 5  ;;  %v9023_v54 = vld [vmem:[%s7066_s28 + $0x98] sm:$0x1] }
 0x120   : > { %9877 = vst [vmem:[#allocation22_spill] sm:$0xff] %v8997_v44  ;;  %v9879_v4 = vsel %vm7097_vm2, %v8882_v47, %v8846_v48  ;;  %v9014_v52 = vcombine.low %v4020_v41, %v4030_v6  ;;  %v9020_v13 = vsel %vm7408_vm5, %v5954_v18, %v4667_v21  ;;  %v4044_v48 = vsel %vm7097_vm2, %v4039_v15, %v8941_v14  ;;  %v5875_v41 = vld [vmem:[%s7066_s28 + $0x9c] sm:$0xf]  ;;  %v9040_v6 = vld [vmem:[%s7066_s28 + $0xa0] sm:$0xf] }
 0x121   : > { %v9005_v9 = vpop.f32.mrf.mxu1  ;;  %v9012_v42 = vcombine.low %v9879_v4, %v4006_v30  ;;  %v6496_v5 = vpop.f32.mrf.mxu0  ;;  %v4054_v47 = vsel %vm7097_vm2, %v4049_v63, %v4053_v53  ;;  %v9035_v30 = vsel %vm7408_vm5, %v4669_v29, %v4670_v0  ;;  %v4089_v21 = vshll.u32 %v9000_v12, 16  ;;  %v9127_v35 = vld [vmem:[%s7066_s28 + $0xb0] sm:$0x1] }
 0x122   : > { %9878 = vst [vmem:[#allocation23_spill] sm:$0xff] %v9005_v9  ;;  %v9880_v9 = vcombine.low %v8672_v20, %v8676_v19  ;;  %v9882_v20 = vcombine.low %v8728_v36, %v8744_v59  ;;  %v9049_v19 = vsel %vm7408_vm5, %v5955_v37, %v4674_v28  ;;  %v4082_v14 = vrot.slane %v4080_v11, 4  ;;  %v9064_v37 = vld [vmem:[%s7066_s28 + $0x90] sm:$0xe] }
 0x123   : > { %v9042_v18 = vpop.f32.mrf.mxu1  ;;  %v4085_v53 = vrot.slane %v4083_v17, 5  ;;  %v4093_v0 = vshrl.u32 %v9000_v12, 16  ;;  %v1600_v15 = vpop.f32.mrf.mxu0  ;;  %v4068_v63 = vsel %vm7097_vm2, %v4063_v45, %v8952_v31  ;;  %v4078_v29 = vsel %vm7097_vm2, %v4073_v22, %v4077_v8 }
 0x124   : > { %6783 = vmatmul.mubr.bf16.vlgmr.msra.gmra.mxu0 %v9880_v9  ;;  %9881 = vst [vmem:[#allocation24_spill] sm:$0xff] %v9042_v18  ;;  %v9059_v36 = vsel %vm7408_vm5, %v4676_v40, %v4677_v62  ;;  %v4099_v59 = vshll.u32 %v9023_v54, 16  ;;  %v4104_v11 = vshrl.u32 %v5875_v41, 16  ;;  %v4107_v17 = vshll.u32 %v5875_v41, 16 }
 0x125   : > { %6786 = vmatprep.mubr.bf16.mxu0 %v9882_v20  ;;  %v6448_v28 = vpop.f32.mrf.mxu1  ;;  %6735 = vmatmul.mubr.bf16.vlgmr.msra.gmra.mxu1 %v8715_v61  ;;  %v4113_v9 = vshll.u32 %v9040_v6, 16  ;;  %v4117_v31 = vshrl.u32 %v9040_v6, 16  ;;  %v6497_v45 = vpop.f32.mrf.mxu0  ;;  %v9070_v22 = vcombine.low %v4044_v48, %v4054_v47  ;;  %v9074_v40 = vrot.slane %v4089_v21, 5  ;;  %v9088_v61 = vld [vmem:[%s7066_s28 + $0xa4] sm:$0x1] }
 0x126   : > { %v1156_v8 = vadd.f32 %v6448_v28, %v8565_v24  ;;  %6738 = vmatprep.mubr.bf16.mxu1 %v8815_v58  ;;  %v9076_v4 = vcombine.low %v4068_v63, %v4078_v29  ;;  %v4086_v20 = vor.u32 %v4085_v53, %v4082_v14  ;;  %v4095_v24 = vrot.slane %v4093_v0, 4  ;;  %v5878_v28 = vld [vmem:[%s7066_s28 + $0xa8] sm:$0xf]  ;;  %v9093_v14 = vld [vmem:[%s7066_s28 + $0xac] sm:$0xf] }
 0x127   : > { %v1147_v62 = vpop.f32.mrf.mxu1  ;;  %v1603_v48 = vpop.f32.mrf.mxu0  ;;  %v9084_v47 = vrot.slane %v4099_v59, 5  ;;  %v5956_v21 = vrot.slane %v9064_v37, 9  ;;  %v4106_v29 = vrot.slane %v4104_v11, 4  ;;  %v4109_v18 = vrot.slane %v4107_v17, 5 }
 0x128   : > { %v9081_v3 = vadd.f32 %v6496_v5, %v1156_v8  ;;  %v1148_v58 = vadd.f32 %v1147_v62, %v8586_v57  ;;  %v9090_v44 = vrot.slane %v4113_v9, 5  ;;  %v4119_v41 = vrot.slane %v4117_v31, 4  ;;  %v9888_v62 = vld [vmem:[#allocation3_spill] sm:$0xff] }
 0x129   : > { %v6449_v63 = vpop.f32.mrf.mxu1  ;;  %v6500_v5 = vpop.f32.mrf.mxu0  ;;  %v9885_v0 = vcombine.low %v8778_v33, %v8786_v23  ;;  %v4128_v59 = vshrl.u32 %v5878_v28, 16  ;;  %v4131_v37 = vshll.u32 %v5878_v28, 16  ;;  %v9886_v11 = vcombine.low %v8830_v7, %v8834_v50 }
 0x12a   : > { %9883 = vst [vmem:[#allocation25_spill] sm:$0xff] %v9081_v3  ;;  %v9095_v53 = vadd.f32 %v1600_v15, %v1148_v58  ;;  %v1159_v57 = vadd.f32 %v6449_v63, %v8622_v38  ;;  %v9104_v17 = vrot.slane %v4086_v20, 4  ;;  %v4096_v15 = vor.u32 %v4095_v24, %v9074_v40  ;;  %v5941_v58 = vld [vmem:[%s7066_s28 + $0x9c] sm:$0xe] }
 0x12b   : > { %v1150_v8 = vpop.f32.mrf.mxu1  ;;  %v4681_v9 = vrot.slane %v9000_v12, 5  ;;  %v4123_v38 = vshll.u32 %v9088_v61, 16  ;;  %v1616_v23 = vpop.f32.mrf.mxu0  ;;  %v4684_v28 = vrot.slane %v9023_v54, 5  ;;  %v4137_v63 = vshll.u32 %v9093_v14, 16 }
 0x12c   : > { %9884 = vst [vmem:[#allocation26_spill] sm:$0xff] %v9095_v53  ;;  %6787 = vmatmul.mubr.bf16.gmra.mxu0 %v9885_v0  ;;  %v9109_v31 = vadd.f32 %v6497_v45, %v1159_v57  ;;  %v1151_v33 = vadd.f32 %v1150_v8, %v9888_v62  ;;  %v4110_v50 = vor.u32 %v4109_v18, %v4106_v29  ;;  %v4688_v12 = vrot.slane %v9040_v6, 5  ;;  %v9889_v57 = vld [vmem:[#allocation7_spill] sm:$0xff]  ;;  %v9890_v6 = vld [vmem:[#allocation9_spill] sm:$0xff] }
 0x12d   : > { %6790 = vmatprep.mubr.bf16.mxu0 %v9886_v11  ;;  %v6452_v7 = vpop.f32.mrf.mxu1  ;;  %6739 = vmatmul.mubr.bf16.gmra.mxu1 %v8823_v2  ;;  %v4120_v20 = vor.u32 %v4119_v41, %v9090_v44  ;;  %v4141_v45 = vshrl.u32 %v9093_v14, 16  ;;  %v6501_v8 = vpop.f32.mrf.mxu0  ;;  %v4130_v54 = vrot.slane %v4128_v59, 4  ;;  %v4133_v11 = vrot.slane %v4131_v37, 5 }
 0x12e   : > { %9887 = vst [vmem:[#allocation27_spill] sm:$0xff] %v9109_v31  ;;  %v9119_v24 = vadd.f32 %v1603_v48, %v1151_v33  ;;  %v1172_v0 = vadd.f32 %v6452_v7, %v9889_v57  ;;  %6742 = vmatprep.mubr.bf16.mxu1 %v8865_v25  ;;  %v4097_v31 = vrot.slane %v4096_v15, 4  ;;  %v4683_v2 = vrot.slane %v4681_v9, 4 }
 0x12f   : > { %v1163_v62 = vpop.f32.mrf.mxu1  ;;  %v4125_v18 = vrot.slane %v4123_v38, 5  ;;  %v5957_v29 = vrot.slane %v5941_v58, 9  ;;  %v1619_v3 = vpop.f32.mrf.mxu0  ;;  %v9129_v48 = vrot.slane %v4137_v63, 5  ;;  %v4143_v33 = vrot.slane %v4141_v45, 4 }
 0x130   : > { %v9123_v41 = vadd.f32 %v6500_v5, %v1172_v0  ;;  %v1164_v53 = vadd.f32 %v1163_v62, %v9890_v6  ;;  %v4111_v57 = vrot.slane %v4110_v50, 4  ;;  %v4121_v25 = vrot.slane %v4120_v20, 4 }
 0x131   : > { %v6453_v7 = vpop.f32.mrf.mxu1  ;;  %v4690_v59 = vrot.slane %v4688_v12, 4  ;;  %v4691_v37 = vrot.slane %v9088_v61, 5  ;;  %v6504_v38 = vpop.f32.mrf.mxu0  ;;  %v9891_v58 = vcombine.low %v8872_v49, %v8876_v16  ;;  %v9140_v63 = vsel %vm7408_vm5, %v5956_v21, %v4681_v9  ;;  %v5942_v21 = vld [vmem:[%s7066_s28 + $0xa8] sm:$0xe] }
 0x132   : > { %v9132_v15 = vadd.f32 %v1616_v23, %v1164_v53  ;;  %v1175_v5 = vadd.f32 %v6453_v7, %v8769_v39  ;;  %v4134_v50 = vor.u32 %v4133_v11, %v4130_v54  ;;  %v9892_v20 = vcombine.low %v8908_v60, %v8930_v10 }
 0x133   : > { %v1166_v45 = vpop.f32.mrf.mxu1  ;;  %v4092_v39 = vsel %vm7097_vm2, %v9104_v17, %v9074_v40  ;;  %v4102_v49 = vsel %vm7097_vm2, %v4097_v31, %v9084_v47  ;;  %v9154_v16 = vsel %vm7408_vm5, %v4683_v2, %v4684_v28  ;;  %v4147_v61 = vshll.u32 %v9127_v35, 16  ;;  %v1632_v60 = vpop.f32.mrf.mxu0  ;;  %v5881_v17 = vld [vmem:[%s7066_s28 + $0xb4] sm:$0xf]  ;;  %v9893_v47 = vld [vmem:[#allocation18_spill] sm:$0xff]  ;;  %v9183_v2 = vld [vmem:[%s7066_s28 + $0xb8] sm:$0xf] }
 0x134   : > { %6791 = vmatmul.mubr.bf16.gmra.mxu0 %v9891_v58  ;;  %v9158_v53 = vadd.f32 %v6501_v8, %v1175_v5  ;;  %v1167_v10 = vadd.f32 %v1166_v45, %v8803_v46  ;;  %v4144_v9 = vor.u32 %v4143_v33, %v9129_v48  ;;  %v4695_v40 = vrot.slane %v9093_v14, 5  ;;  %v9894_v8 = vld [vmem:[#allocation13_spill] sm:$0xff] }
 0x135   : > { %6794 = vmatprep.mubr.bf16.mxu0 %v9892_v20  ;;  %v6456_v23 = vpop.f32.mrf.mxu1  ;;  %6743 = vmatmul.mubr.bf16.gmra.mxu1 %v9893_v47  ;;  %v4116_v31 = vsel %vm7097_vm2, %v4111_v57, %v9090_v44  ;;  %v4126_v28 = vsel %vm7097_vm2, %v4121_v25, %v4125_v18  ;;  %v9172_v46 = vsel %vm7408_vm5, %v5957_v29, %v4688_v12  ;;  %v6505_v11 = vpop.f32.mrf.mxu0  ;;  %v4135_v62 = vrot.slane %v4134_v50, 4  ;;  %v9895_v57 = vld [vmem:[#allocation15_spill] sm:$0xff]  ;;  %v9899_v47 = vld [vmem:[#allocation20_spill] sm:$0xff] }
 0x136   : > { %v9176_v0 = vsel %vm7408_vm5, %v4690_v59, %v4691_v37  ;;  %v9178_v14 = vadd.f32 %v1619_v3, %v1167_v10  ;;  %v1188_v54 = vadd.f32 %v6456_v23, %v9894_v8  ;;  %6746 = vmatprep.mubr.bf16.mxu1 %v9012_v42  ;;  %v5958_v44 = vrot.slane %v5942_v21, 9 }
 0x137   : > { %v1179_v18 = vpop.f32.mrf.mxu1  ;;  %v4149_v6 = vrot.slane %v4147_v61, 5  ;;  %v4698_v12 = vrot.slane %v9127_v35, 5  ;;  %v4152_v29 = vshrl.u32 %v5881_v17, 16  ;;  %v4155_v33 = vshll.u32 %v5881_v17, 16  ;;  %v1635_v25 = vpop.f32.mrf.mxu0 }
 0x138   : > { %v9186_v7 = vadd.f32 %v6504_v38, %v1188_v54  ;;  %v1180_v3 = vadd.f32 %v1179_v18, %v9895_v57  ;;  %v4145_v59 = vrot.slane %v4144_v9, 4  ;;  %v4697_v37 = vrot.slane %v4695_v40, 4  ;;  %v9896_v38 = vld [vmem:[#allocation17_spill] sm:$0xff] }
 0x139   : > { %v6457_v42 = vpop.f32.mrf.mxu1  ;;  %v9189_v5 = vcombine.low %v4092_v39, %v4102_v49  ;;  %v5988_v58 = vcombine.low %v9140_v63, %v9154_v16  ;;  %v9193_v50 = vcombine.low %v4116_v31, %v4126_v28  ;;  %v4161_v35 = vshll.u32 %v9183_v2, 16  ;;  %v6508_v61 = vpop.f32.mrf.mxu0  ;;  %v5884_v49 = vld [vmem:[%s7066_s28 + $0xc0] sm:$0xf]  ;;  %v9207_v16 = vld [vmem:[%s7066_s28 + $0xc4] sm:$0xf] }
 0x13a   : > { %v9196_v45 = vadd.f32 %v1632_v60, %v1180_v3  ;;  %v1191_v20 = vadd.f32 %v6457_v42, %v9896_v38  ;;  %v9897_v21 = vcombine.low %v8970_v51, %v8991_v55  ;;  %v5989_v39 = vcombine.low %v9172_v46, %v9176_v0  ;;  %v9904_v46 = vld [vmem:[#allocation6_spill] sm:$0xff] }
 0x13b   : > { %v4165_v63 = vshrl.u32 %v9183_v2, 16  ;;  %v1182_v10 = vpop.f32.mrf.mxu1  ;;  %v9898_v60 = vcombine.low %v9020_v13, %v9035_v30  ;;  %v4140_v51 = vsel %vm7097_vm2, %v4135_v62, %v9129_v48  ;;  %v9217_v55 = vsel %vm7408_vm5, %v5958_v44, %v4695_v40  ;;  %v1648_v28 = vpop.f32.mrf.mxu0  ;;  %v9229_v30 = vld [vmem:[%s7066_s28 + $0xbc] sm:$0x1]  ;;  %v5943_v48 = vld [vmem:[%s7066_s28 + $0xb4] sm:$0xe] }
 0x13c   : > { %6795 = vmatmul.mubr.bf16.gmra.mxu0 %v9897_v21  ;;  %v4154_v9 = vrot.slane %v4152_v29, 4  ;;  %v4157_v17 = vrot.slane %v4155_v33, 5  ;;  %v9219_v23 = vadd.f32 %v6505_v11, %v1191_v20  ;;  %v1183_v31 = vadd.f32 %v1182_v10, %v9899_v47  ;;  %v9251_v20 = vld [vmem:[%s7066_s28 + $0xc8] sm:$0x1] }
 0x13d   : > { %6798 = vmatprep.mubr.bf16.mxu0 %v9898_v60  ;;  %v4150_v8 = vsel %vm7097_vm2, %v4145_v59, %v4149_v6  ;;  %v9226_v13 = vsel %vm7408_vm5, %v4697_v37, %v4698_v12  ;;  %v6460_v54 = vpop.f32.mrf.mxu1  ;;  %6747 = vmatmul.mubr.bf16.gmra.mxu1 %v9014_v52  ;;  %v9233_v40 = vrot.slane %v4161_v35, 5  ;;  %v4176_v11 = vshrl.u32 %v5884_v49, 16  ;;  %v6509_v29 = vpop.f32.mrf.mxu0 }
 0x13e   : > { %v4179_v62 = vshll.u32 %v5884_v49, 16  ;;  %v4185_v44 = vshll.u32 %v9207_v16, 16  ;;  %v9236_v18 = vadd.f32 %v1635_v25, %v1183_v31  ;;  %v1204_v6 = vadd.f32 %v6460_v54, %v8954_v43  ;;  %6750 = vmatprep.mubr.bf16.mxu1 %v9070_v22 }
 0x13f   : > { %v4167_v12 = vrot.slane %v4165_v63, 4  ;;  %v4189_v33 = vshrl.u32 %v9207_v16, 16  ;;  %v1195_v57 = vpop.f32.mrf.mxu1  ;;  %v4158_v3 = vor.u32 %v4157_v17, %v4154_v9  ;;  %v4171_v52 = vshll.u32 %v9229_v30, 16  ;;  %v1651_v43 = vpop.f32.mrf.mxu0  ;;  %v5887_v9 = vld [vmem:[%s7066_s28 + $0xcc] sm:$0xf] }
 0x140   : > { %v5959_v59 = vrot.slane %v5943_v48, 9  ;;  %v4702_v37 = vrot.slane %v9183_v2, 5  ;;  %v9243_v42 = vadd.f32 %v6508_v61, %v1204_v6  ;;  %v1196_v25 = vadd.f32 %v1195_v57, %v8973_v1  ;;  %v5944_v48 = vld [vmem:[%s7066_s28 + $0xc0] sm:$0xe] }
 0x141   : > { %v9246_v35 = vcombine.low %v4140_v51, %v4150_v8  ;;  %v5990_v22 = vcombine.low %v9217_v55, %v9226_v13  ;;  %v6461_v38 = vpop.f32.mrf.mxu1  ;;  %v4178_v21 = vrot.slane %v4176_v11, 4  ;;  %v4181_v63 = vrot.slane %v4179_v62, 5  ;;  %v6512_v10 = vpop.f32.mrf.mxu0  ;;  %v9273_v8 = vld [vmem:[%s7066_s28 + $0xd0] sm:$0xf] }
 0x142   : > { %v9253_v49 = vrot.slane %v4185_v44, 5  ;;  %v4191_v2 = vrot.slane %v4189_v33, 4  ;;  %v9255_v61 = vadd.f32 %v1648_v28, %v1196_v25  ;;  %v1207_v1 = vadd.f32 %v6461_v38, %v8993_v26 }
 0x143   : > { %v9900_v60 = vcombine.low %v9049_v19, %v9059_v36  ;;  %v4168_v51 = vor.u32 %v4167_v12, %v9233_v40  ;;  %v4705_v55 = vrot.slane %v9229_v30, 5  ;;  %v1198_v17 = vpop.f32.mrf.mxu1  ;;  %v9264_v47 = vrot.slane %v4158_v3, 4  ;;  %v1664_v13 = vpop.f32.mrf.mxu0 }
 0x144   : > { %v9266_v31 = vrot.slane %v4171_v52, 5  ;;  %v9270_v26 = vsel %vm7408_vm5, %v5959_v59, %v4702_v37  ;;  %v4704_v28 = vrot.slane %v4702_v37, 4  ;;  %v9275_v19 = vadd.f32 %v6509_v29, %v1207_v1  ;;  %v9901_v29 = vld [vmem:[#allocation2_spill] sm:$0xff] }
 0x145   : > { %6799 = vmatmul.mubr.bf16.gmra.mxu0 %v9900_v60  ;;  %v1199_v36 = vadd.f32 %v1198_v17, %v9002_v34  ;;  %v4195_v30 = vshll.u32 %v9251_v20, 16  ;;  %v6464_v54 = vpop.f32.mrf.mxu1  ;;  %6751 = vmatmul.mubr.bf16.gmra.mxu1 %v9076_v4  ;;  %v4182_v11 = vor.u32 %v4181_v63, %v4178_v21  ;;  %v4192_v62 = vor.u32 %v4191_v2, %v9253_v49  ;;  %v6513_v57 = vpop.f32.mrf.mxu0 }
 0x146   : > { %6802 = vmatprep.mubr.bf16.mxu0 %v5988_v58  ;;  %v4709_v58 = vrot.slane %v9207_v16, 5  ;;  %v4200_v44 = vshrl.u32 %v5887_v9, 16  ;;  %v4203_v6 = vshll.u32 %v5887_v9, 16  ;;  %v1220_v33 = vadd.f32 %v6464_v54, %v9901_v29  ;;  %6754 = vmatprep.mubr.bf16.mxu1 %v9189_v5 }
 0x147   : > { %v9283_v12 = vadd.f32 %v1651_v43, %v1199_v36  ;;  %v4209_v34 = vshll.u32 %v9273_v8, 16  ;;  %v4213_v3 = vshrl.u32 %v9273_v8, 16  ;;  %v1211_v16 = vpop.f32.mrf.mxu1  ;;  %v4169_v52 = vrot.slane %v4168_v51, 4  ;;  %v9902_v43 = vld [vmem:[#allocation5_spill] sm:$0xff]  ;;  %v1667_v21 = vpop.f32.mrf.mxu0  ;;  %v9903_v36 = vld [vmem:[#allocation4_spill] sm:$0xff] }
 0x148   : > { %v4706_v4 = vsel %vm7408_vm5, %v4704_v28, %v4705_v55  ;;  %v5960_v59 = vrot.slane %v5944_v48, 9  ;;  %v4712_v37 = vrot.slane %v9251_v20, 5  ;;  %v9292_v25 = vadd.f32 %v6512_v10, %v1220_v33  ;;  %v5889_v20 = vld [vmem:[%s7066_s28 + $0xd4] sm:$0x1] }
 0x149   : > { %v1212_v38 = vadd.f32 %v1211_v16, %v9902_v43  ;;  %v4197_v63 = vrot.slane %v4195_v30, 5  ;;  %v4711_v5 = vrot.slane %v4709_v58, 4  ;;  %v6465_v2 = vpop.f32.mrf.mxu1  ;;  %v4183_v1 = vrot.slane %v4182_v11, 4 }
 0x14a   : > { %v4193_v60 = vrot.slane %v4192_v62, 4  ;;  %v4202_v9 = vrot.slane %v4200_v44, 4  ;;  %v4205_v17 = vrot.slane %v4203_v6, 5  ;;  %v1223_v55 = vadd.f32 %v6465_v2, %v9903_v36  ;;  %v6516_v28 = vpop.f32.mrf.mxu0  ;;  %v5945_v6 = vld [vmem:[%s7066_s28 + $0xcc] sm:$0xe] }
 0x14b   : > { %v9295_v51 = vadd.f32 %v1664_v13, %v1212_v38  ;;  %v9302_v10 = vrot.slane %v4209_v34, 5  ;;  %v4215_v30 = vrot.slane %v4213_v3, 4  ;;  %v1214_v48 = vpop.f32.mrf.mxu1  ;;  %v4164_v13 = vsel %vm7097_vm2, %v9264_v47, %v9233_v40 }
 0x14c   : > { %v4174_v54 = vsel %vm7097_vm2, %v4169_v52, %v9266_v31  ;;  %v4716_v11 = vrot.slane %v9273_v8, 5  ;;  %v9312_v62 = vadd.f32 %v6513_v57, %v1223_v55  ;;  %v1215_v0 = vadd.f32 %v1214_v48, %v9904_v46  ;;  %v9905_v57 = vld [vmem:[#allocation8_spill] sm:$0xff] }
 0x14d   : > { %6803 = vmatmul.mubr.bf16.gmra.mxu0 %v5989_v39  ;;  %v1680_v39 = vpop.f32.mrf.mxu0  ;;  %v4710_v44 = vsel %vm7408_vm5, %v5960_v59, %v4709_v58  ;;  %v6468_v29 = vpop.f32.mrf.mxu1  ;;  %6755 = vmatmul.mubr.bf16.gmra.mxu1 %v9193_v50  ;;  %v5991_v40 = vcombine.low %v9270_v26, %v4706_v4  ;;  %v4188_v47 = vsel %vm7097_vm2, %v4183_v1, %v9253_v49  ;;  %v4219_v8 = vshll.u32 %v5889_v20, 16  ;;  %v9908_v48 = vld [vmem:[#allocation12_spill] sm:$0xff] }
 0x14e   : > { %6806 = vmatprep.mubr.bf16.mxu0 %v5990_v22  ;;  %v4713_v22 = vsel %vm7408_vm5, %v4711_v5, %v4712_v37  ;;  %v4206_v31 = vor.u32 %v4205_v17, %v4202_v9  ;;  %v9325_v33 = vadd.f32 %v1667_v21, %v1215_v0  ;;  %v1236_v34 = vadd.f32 %v6468_v29, %v9905_v57  ;;  %v9906_v37 = vld [vmem:[#allocation10_spill] sm:$0xff]  ;;  %v9907_v9 = vld [vmem:[#allocation11_spill] sm:$0xff] }
 0x14f   : > { %v6517_v58 = vpop.f32.mrf.mxu0  ;;  %6758 = vmatprep.mubr.bf16.mxu1 %v9246_v35  ;;  %v4198_v3 = vsel %vm7097_vm2, %v4193_v60, %v4197_v63  ;;  %v4216_v50 = vor.u32 %v4215_v30, %v9302_v10  ;;  %v1227_v16 = vpop.f32.mrf.mxu1  ;;  %v5992_v26 = vcombine.low %v4710_v44, %v4713_v22  ;;  %v5961_v52 = vrot.slane %v5945_v6, 9  ;;  %v9909_v44 = vld [vmem:[#allocation14_spill] sm:$0xff] }
 0x150   : > { %v4718_v4 = vrot.slane %v4716_v11, 4  ;;  %v4719_v59 = vrot.slane %v5889_v20, 5  ;;  %v9332_v49 = vadd.f32 %v6516_v28, %v1236_v34  ;;  %v1228_v43 = vadd.f32 %v1227_v16, %v9906_v37  ;;  %v9912_v37 = vld [vmem:[#allocation21_spill] sm:$0xff] }
 0x151   : > { %v1683_v38 = vpop.f32.mrf.mxu0  ;;  %v6469_v21 = vpop.f32.mrf.mxu1  ;;  %v5919_v5 = vcombine.low %v4164_v13, %v4174_v54  ;;  %v5920_v2 = vcombine.low %v4188_v47, %v4198_v3  ;;  %v4207_v1 = vrot.slane %v4206_v31, 4  ;;  %v4217_v17 = vrot.slane %v4216_v50, 4  ;;  %v9910_v47 = vld [vmem:[#allocation16_spill] sm:$0xff] }
 0x152   : > { %v9335_v35 = vadd.f32 %v1680_v39, %v1228_v43  ;;  %v1239_v63 = vadd.f32 %v6469_v21, %v9907_v9  ;;  %v4221_v36 = vrot.slane %v4219_v8, 5  ;;  %v4717_v28 = vsel %vm7408_vm5, %v5961_v52, %v4716_v11 }
 0x153   : > { %v6520_v60 = vpop.f32.mrf.mxu0  ;;  %v1230_v55 = vpop.f32.mrf.mxu1  ;;  %v4720_v20 = vsel %vm7408_vm5, %v4718_v4, %v4719_v59  ;;  %v4212_v0 = vsel %vm7097_vm2, %v4207_v1, %v9302_v10  ;;  %v9911_v10 = vld [vmem:[#allocation19_spill] sm:$0xff] }
 0x154   : > { %v9342_v30 = vadd.f32 %v6517_v58, %v1239_v63  ;;  %v1231_v13 = vadd.f32 %v1230_v55, %v9908_v48  ;;  %v4222_v56 = vsel %vm7097_vm2, %v4217_v17, %v4221_v36  ;;  %v5993_v11 = vcombine.low %v4717_v28, %v4720_v20  ;;  %v9914_v17 = vld [vmem:[#allocation23_spill] sm:$0xff]  ;;  %v9915_v20 = vld [vmem:[#allocation24_spill] sm:$0xff] }
 0x155   : > { %6807 = vmatmul.mubr.bf16.gmra.mxu0 %v5991_v40  ;;  %v1696_v54 = vpop.f32.mrf.mxu0  ;;  %v6472_v46 = vpop.f32.mrf.mxu1  ;;  %6759 = vmatmul.mubr.bf16.gmra.mxu1 %v5919_v5  ;;  %v5921_v34 = vcombine.low %v4212_v0, %v4222_v56  ;;  %v9916_v0 = vld [vmem:[#allocation25_spill] sm:$0xff] }
 0x156   : > { %6810 = vmatprep.mubr.bf16.mxu0 %v5992_v26  ;;  %v9348_v39 = vadd.f32 %v1683_v38, %v1231_v13  ;;  %v1252_v22 = vadd.f32 %v6472_v46, %v9909_v44  ;;  %6762 = vmatprep.mubr.bf16.mxu1 %v5920_v2  ;;  %v9913_v2 = vld [vmem:[#allocation22_spill] sm:$0xff] }
 0x157   : > { %v6521_v6 = vpop.f32.mrf.mxu0  ;;  %v1243_v29 = vpop.f32.mrf.mxu1 }
 0x158   : > { %v9353_v40 = vadd.f32 %v6520_v60, %v1252_v22  ;;  %v1244_v31 = vadd.f32 %v1243_v29, %v9910_v47 }
 0x159   : > { %v1699_v8 = vpop.f32.mrf.mxu0  ;;  %v6473_v57 = vpop.f32.mrf.mxu1 }
 0x15a   : > { %v9356_v58 = vadd.f32 %v1696_v54, %v1244_v31  ;;  %v1255_v3 = vadd.f32 %v6473_v57, %v9911_v10  ;;  %v9918_v57 = vld [vmem:[#allocation27_spill] sm:$0xff] }
 0x15b   : > { %v6524_v50 = vpop.f32.mrf.mxu0  ;;  %v1246_v16 = vpop.f32.mrf.mxu1 }
 0x15c   : > { %v9359_v26 = vadd.f32 %v6521_v6, %v1255_v3  ;;  %v1247_v27 = vadd.f32 %v1246_v16, %v8949_v32 }
 0x15d   : > { %6811 = vmatmul.mubr.bf16.gmra.mxu0 %v5993_v11  ;;  %v1712_v52 = vpop.f32.mrf.mxu0  ;;  %v6476_v4 = vpop.f32.mrf.mxu1  ;;  %6763 = vmatmul.mubr.bf16.gmra.mxu1 %v5921_v34  ;;  %v9917_v11 = vld [vmem:[#allocation26_spill] sm:$0xff] }
 0x15e   : > { %v9362_v59 = vadd.f32 %v1699_v8, %v1247_v27  ;;  %v1268_v43 = vadd.f32 %v6476_v4, %v9912_v37 }
 0x15f   : > { %v6525_v38 = vpop.f32.mrf.mxu0  ;;  %v1259_v21 = vpop.f32.mrf.mxu1 }
 0x160   : > { %v9365_v5 = vadd.f32 %v6524_v50, %v1268_v43  ;;  %v1260_v1 = vadd.f32 %v1259_v21, %v9913_v2 }
 0x161   : > { %v1715_v9 = vpop.f32.mrf.mxu0  ;;  %v6477_v63 = vpop.f32.mrf.mxu1 }
 0x162   : > { %v9368_v60 = vadd.f32 %v1712_v52, %v1260_v1  ;;  %v1271_v36 = vadd.f32 %v6477_v63, %v9914_v17 }
 0x163   : > { %v6592_v32 = vpop.f32.mrf.mxu0  ;;  %v1262_v55 = vpop.f32.mrf.mxu1 }
 0x164   : > { %v9371_v28 = vadd.f32 %v6525_v38, %v1271_v36  ;;  %v1263_v48 = vadd.f32 %v1262_v55, %v9915_v20 }
 0x165   : > { %v2744_v13 = vpop.f32.mrf.mxu0  ;;  %v6544_v54 = vpop.f32.mrf.mxu1 }
 0x166   : > { %v9374_v46 = vadd.f32 %v1715_v9, %v1263_v48  ;;  %v2119_v44 = vadd.f32 %v6544_v54, %v9916_v0 }
 0x167   : > { %v6593_v22 = vpop.f32.mrf.mxu0  ;;  %v1990_v6 = vpop.f32.mrf.mxu1 }
 0x168   : > { %v9377_v56 = vadd.f32 %v6592_v32, %v2119_v44  ;;  %v2117_v29 = vadd.f32 %v1990_v6, %v9917_v11 }
 0x169   : > { %v2747_v47 = vpop.f32.mrf.mxu0  ;;  %v6545_v31 = vpop.f32.mrf.mxu1 }
 0x16a   : > { %v9380_v8 = vadd.f32 %v2744_v13, %v2117_v29  ;;  %v2120_v34 = vadd.f32 %v6545_v31, %v9918_v57 }
 0x16b   : > { %v6596_v10 = vpop.f32.mrf.mxu0  ;;  %v1993_v3 = vpop.f32.mrf.mxu1 }
 0x16c   : > { %v9383_v50 = vadd.f32 %v6593_v22, %v2120_v34  ;;  %v2118_v16 = vadd.f32 %v1993_v3, %v9119_v24 }
 0x16d   : > { %v2760_v27 = vpop.f32.mrf.mxu0  ;;  %v6548_v52 = vpop.f32.mrf.mxu1 }
 0x16e   : > { %v9386_v4 = vadd.f32 %v2747_v47, %v2118_v16  ;;  %v2123_v37 = vadd.f32 %v6548_v52, %v9123_v41 }
 0x16f   : > { %v6597_v43 = vpop.f32.mrf.mxu0  ;;  %v2006_v38 = vpop.f32.mrf.mxu1 }
 0x170   : > { %v9389_v21 = vadd.f32 %v6596_v10, %v2123_v37  ;;  %v2121_v2 = vadd.f32 %v2006_v38, %v9132_v15 }
 0x171   : > { %v2763_v1 = vpop.f32.mrf.mxu0  ;;  %v6549_v9 = vpop.f32.mrf.mxu1 }
 0x172   : > { %v9392_v63 = vadd.f32 %v2760_v27, %v2121_v2  ;;  %v2124_v17 = vadd.f32 %v6549_v9, %v9158_v53 }
 0x173   : > { %v6600_v36 = vpop.f32.mrf.mxu0  ;;  %v2009_v24 = vpop.f32.mrf.mxu1 }
 0x174   : > { %v9395_v32 = vadd.f32 %v6597_v43, %v2124_v17  ;;  %v2122_v55 = vadd.f32 %v2009_v24, %v9178_v14 }
 0x175   : > { %v2776_v20 = vpop.f32.mrf.mxu0  ;;  %v6552_v41 = vpop.f32.mrf.mxu1 }
 0x176   : > { %v9398_v48 = vadd.f32 %v2763_v1, %v2122_v55  ;;  %v2127_v13 = vadd.f32 %v6552_v41, %v9186_v7 }
 0x177   : > { %v6601_v54 = vpop.f32.mrf.mxu0  ;;  %v2022_v15 = vpop.f32.mrf.mxu1 }
 0x178   : > { %v9401_v0 = vadd.f32 %v6600_v36, %v2127_v13  ;;  %v2125_v44 = vadd.f32 %v2022_v15, %v9196_v45 }
 0x179   : > { %v2779_v22 = vpop.f32.mrf.mxu0  ;;  %v6553_v53 = vpop.f32.mrf.mxu1 }
 0x17a   : > { %v9404_v6 = vadd.f32 %v2776_v20, %v2125_v44  ;;  %v2128_v11 = vadd.f32 %v6553_v53, %v9219_v23 }
 0x17b   : > { %v6604_v29 = vpop.f32.mrf.mxu0  ;;  %v2025_v14 = vpop.f32.mrf.mxu1 }
 0x17c   : > { %v9407_v47 = vadd.f32 %v6601_v54, %v2128_v11  ;;  %v2126_v31 = vadd.f32 %v2025_v14, %v9236_v18 }
 0x17d   : > { %v2792_v57 = vpop.f32.mrf.mxu0  ;;  %v6556_v7 = vpop.f32.mrf.mxu1 }
 0x17e   : > { %v9410_v34 = vadd.f32 %v2779_v22, %v2126_v31  ;;  %v2131_v10 = vadd.f32 %v6556_v7, %v9243_v42 }
 0x17f   : > { %v6605_v3 = vpop.f32.mrf.mxu0  ;;  %v2038_v45 = vpop.f32.mrf.mxu1 }
 0x180   : > { %v9413_v16 = vadd.f32 %v6604_v29, %v2131_v10  ;;  %v2129_v27 = vadd.f32 %v2038_v45, %v9255_v61 }
 0x181   : > { %v2795_v52 = vpop.f32.mrf.mxu0  ;;  %v6557_v23 = vpop.f32.mrf.mxu1 }
 0x182   : > { %v9416_v37 = vadd.f32 %v2792_v57, %v2129_v27  ;;  %v2132_v43 = vadd.f32 %v6557_v23, %v9275_v19 }
 0x183   : > { %v6608_v38 = vpop.f32.mrf.mxu0  ;;  %v2041_v18 = vpop.f32.mrf.mxu1 }
 0x184   : > { %v9419_v2 = vadd.f32 %v6605_v3, %v2132_v43  ;;  %v2130_v1 = vadd.f32 %v2041_v18, %v9283_v12 }
 0x185   : > { %v2808_v9 = vpop.f32.mrf.mxu0  ;;  %v6560_v42 = vpop.f32.mrf.mxu1 }
 0x186   : > { %v9422_v17 = vadd.f32 %v2795_v52, %v2130_v1  ;;  %v2135_v36 = vadd.f32 %v6560_v42, %v9292_v25 }
 0x187   : > { %v6609_v24 = vpop.f32.mrf.mxu0  ;;  %v2054_v61 = vpop.f32.mrf.mxu1 }
 0x188   : > { %v9425_v55 = vadd.f32 %v6608_v38, %v2135_v36  ;;  %v2133_v20 = vadd.f32 %v2054_v61, %v9295_v51 }
 0x189   : > { %v2811_v41 = vpop.f32.mrf.mxu0  ;;  %v6561_v19 = vpop.f32.mrf.mxu1 }
 0x18a   : > { %v9428_v13 = vadd.f32 %v2808_v9, %v2133_v20  ;;  %v2136_v54 = vadd.f32 %v6561_v19, %v9312_v62 }
 0x18b   : > { %v6612_v15 = vpop.f32.mrf.mxu0  ;;  %v2057_v12 = vpop.f32.mrf.mxu1 }
 0x18c   : > { %v9431_v44 = vadd.f32 %v6609_v24, %v2136_v54  ;;  %v2134_v22 = vadd.f32 %v2057_v12, %v9325_v33 }
 0x18d   : > { %v2824_v53 = vpop.f32.mrf.mxu0  ;;  %v6564_v25 = vpop.f32.mrf.mxu1 }
 0x18e   : > { %v9434_v11 = vadd.f32 %v2811_v41, %v2134_v22  ;;  %v2139_v29 = vadd.f32 %v6564_v25, %v9332_v49 }
 0x18f   : > { %v6613_v14 = vpop.f32.mrf.mxu0  ;;  %v2070_v51 = vpop.f32.mrf.mxu1 }
 0x190   : > { %v9437_v31 = vadd.f32 %v6612_v15, %v2139_v29  ;;  %v2137_v57 = vadd.f32 %v2070_v51, %v9335_v35 }
 0x191   : > { %v2827_v7 = vpop.f32.mrf.mxu0  ;;  %v6565_v62 = vpop.f32.mrf.mxu1 }
 0x192   : > { %v9440_v10 = vadd.f32 %v2824_v53, %v2137_v57  ;;  %v2140_v3 = vadd.f32 %v6565_v62, %v9342_v30 }
 0x193   : > { %v6616_v45 = vpop.f32.mrf.mxu0  ;;  %v2073_v33 = vpop.f32.mrf.mxu1 }
 0x194   : > { %v9443_v27 = vadd.f32 %v6613_v14, %v2140_v3  ;;  %v2138_v52 = vadd.f32 %v2073_v33, %v9348_v39 }
 0x195   : > { %v2840_v23 = vpop.f32.mrf.mxu0  ;;  %v6568_v49 = vpop.f32.mrf.mxu1 }
 0x196   : > { %v9446_v43 = vadd.f32 %v2827_v7, %v2138_v52  ;;  %v2143_v38 = vadd.f32 %v6568_v49, %v9353_v40 }
 0x197   : > { %v6617_v18 = vpop.f32.mrf.mxu0  ;;  %v2086_v35 = vpop.f32.mrf.mxu1 }
 0x198   : > { %v9449_v1 = vadd.f32 %v6616_v45, %v2143_v38  ;;  %v2141_v9 = vadd.f32 %v2086_v35, %v9356_v58 }
 0x199   : > { %v2843_v42 = vpop.f32.mrf.mxu0  ;;  %v6569_v30 = vpop.f32.mrf.mxu1 }
 0x19a   : > { %v9452_v36 = vadd.f32 %v2840_v23, %v2141_v9  ;;  %v2144_v24 = vadd.f32 %v6569_v30, %v9359_v26 }
 0x19b   : > { %v6620_v61 = vpop.f32.mrf.mxu0  ;;  %v2089_v39 = vpop.f32.mrf.mxu1 }
 0x19c   : > { %v9455_v20 = vadd.f32 %v6617_v18, %v2144_v24  ;;  %v2142_v41 = vadd.f32 %v2089_v39, %v9362_v59 }
 0x19d   : > { %v2856_v19 = vpop.f32.mrf.mxu0  ;;  %v6572_v40 = vpop.f32.mrf.mxu1 }
 0x19e   : > { %9919 = vst [vmem:[#allocation3_spill] sm:$0xff] %v9455_v20  ;;  %v9458_v54 = vadd.f32 %v2843_v42, %v2142_v41  ;;  %v2147_v15 = vadd.f32 %v6572_v40, %v9365_v5 }
 0x19f   : > { %v6621_v12 = vpop.f32.mrf.mxu0  ;;  %v2102_v58 = vpop.f32.mrf.mxu1 }
 0x1a0   : > { %9920 = vst [vmem:[#allocation7_spill] sm:$0xff] %v9458_v54  ;;  %v9461_v22 = vadd.f32 %v6620_v61, %v2147_v15  ;;  %v2145_v53 = vadd.f32 %v2102_v58, %v9368_v60 }
 0x1a1   : > { %v2859_v25 = vpop.f32.mrf.mxu0  ;;  %v6573_v26 = vpop.f32.mrf.mxu1 }
 0x1a2   : > { %v9464_v29 = vadd.f32 %v2856_v19, %v2145_v53  ;;  %v2148_v14 = vadd.f32 %v6573_v26, %v9371_v28 }
 0x1a3   : > { %v6688_v51 = vpop.f32.mrf.mxu0  ;;  %v2105_v59 = vpop.f32.mrf.mxu1 }
 0x1a4   : > { %v9467_v57 = vadd.f32 %v6621_v12, %v2148_v14  ;;  %v2146_v7 = vadd.f32 %v2105_v59, %v9374_v46 }
 0x1a5   : > { %v3632_v62 = vpop.f32.mrf.mxu0  ;;  %v6640_v5 = vpop.f32.mrf.mxu1 }
 0x1a6   : > { %9921 = vst [vmem:[#allocation9_spill] sm:$0xff] %v9467_v57  ;;  %v9470_v3 = vadd.f32 %v2859_v25, %v2146_v7  ;;  %v3371_v45 = vadd.f32 %v6640_v5, %v9377_v56 }
 0x1a7   : > { %v9473_v33 = vpop.f32.mrf.mxu0  ;;  %v3242_v60 = vpop.f32.mrf.mxu1 }
 0x1a8   : > { %9922 = vst [vmem:[#allocation18_spill] sm:$0xff] %v9470_v3  ;;  %v9475_v52 = vadd.f32 %v6688_v51, %v3371_v45  ;;  %v3369_v23 = vadd.f32 %v3242_v60, %v9380_v8 }
 0x1a9   : > { %v9478_v28 = vpop.f32.mrf.mxu0  ;;  %v9480_v49 = vpop.f32.mrf.mxu1 }
 0x1aa   : > { %v9482_v38 = vadd.f32 %v3632_v62, %v3369_v23 }
 0x1ab   : > { %v6692_v46 = vpop.f32.mrf.mxu0  ;;  %v9484_v18 = vpop.f32.mrf.mxu1 }
 0x1ad   : > { %v3648_v35 = vpop.f32.mrf.mxu0  ;;  %v6644_v9 = vpop.f32.mrf.mxu1 }
 0x1ae   : > { %v3375_v56 = vadd.f32 %v6644_v9, %v9389_v21 }
 0x1af   : > { %v9487_v42 = vpop.f32.mrf.mxu0  ;;  %v3258_v30 = vpop.f32.mrf.mxu1 }
 0x1b0   : > { %v9489_v24 = vadd.f32 %v6692_v46, %v3375_v56  ;;  %v3373_v8 = vadd.f32 %v3258_v30, %v9392_v63 }
 0x1b1   : > { %v9492_v61 = vpop.f32.mrf.mxu0  ;;  %v9494_v39 = vpop.f32.mrf.mxu1 }
 0x1b2   : > { %v9496_v41 = vadd.f32 %v3648_v35, %v3373_v8 }
 0x1b3   : > { %v6696_v19 = vpop.f32.mrf.mxu0  ;;  %v9498_v40 = vpop.f32.mrf.mxu1 }
 0x1b5   : > { %v3664_v15 = vpop.f32.mrf.mxu0  ;;  %v6648_v12 = vpop.f32.mrf.mxu1 }
 0x1b6   : > { %v3379_v21 = vadd.f32 %v6648_v12, %v9401_v0 }
 0x1b7   : > { %v9501_v58 = vpop.f32.mrf.mxu0  ;;  %v3274_v53 = vpop.f32.mrf.mxu1 }
 0x1b8   : > { %v9503_v25 = vadd.f32 %v6696_v19, %v3379_v21  ;;  %v3377_v63 = vadd.f32 %v3274_v53, %v9404_v6 }
 0x1b9   : > { %v9506_v26 = vpop.f32.mrf.mxu0  ;;  %v9508_v14 = vpop.f32.mrf.mxu1 }
 0x1ba   : > { %v9510_v51 = vadd.f32 %v3664_v15, %v3377_v63 }
 0x1bb   : > { %v6700_v59 = vpop.f32.mrf.mxu0  ;;  %v9512_v7 = vpop.f32.mrf.mxu1 }
 0x1bd   : > { %v3680_v62 = vpop.f32.mrf.mxu0  ;;  %v6652_v5 = vpop.f32.mrf.mxu1 }
 0x1be   : > { %v3383_v0 = vadd.f32 %v6652_v5, %v9413_v16 }
 0x1bf   : > { %v9515_v45 = vpop.f32.mrf.mxu0  ;;  %v3290_v60 = vpop.f32.mrf.mxu1 }
 0x1c0   : > { %v9517_v23 = vadd.f32 %v6700_v59, %v3383_v0  ;;  %v3381_v6 = vadd.f32 %v3290_v60, %v9416_v37 }
 0x1c1   : > { %v9520_v46 = vpop.f32.mrf.mxu0  ;;  %v9522_v35 = vpop.f32.mrf.mxu1 }
 0x1c2   : > { %v9524_v9 = vadd.f32 %v3680_v62, %v3381_v6 }
 0x1c3   : > { %v6704_v56 = vpop.f32.mrf.mxu0  ;;  %v9526_v30 = vpop.f32.mrf.mxu1 }
 0x1c5   : > { %v3696_v8 = vpop.f32.mrf.mxu0  ;;  %v6656_v19 = vpop.f32.mrf.mxu1 }
 0x1c6   : > { %v3387_v16 = vadd.f32 %v6656_v19, %v9425_v55 }
 0x1c7   : > { %v9529_v15 = vpop.f32.mrf.mxu0  ;;  %v3306_v12 = vpop.f32.mrf.mxu1 }
 0x1c8   : > { %v9531_v21 = vadd.f32 %v6704_v56, %v3387_v16  ;;  %v3385_v37 = vadd.f32 %v3306_v12, %v9428_v13 }
 0x1c9   : > { %v9534_v53 = vpop.f32.mrf.mxu0  ;;  %v9536_v63 = vpop.f32.mrf.mxu1 }
 0x1ca   : > { %v9538_v59 = vadd.f32 %v3696_v8, %v3385_v37 }
 0x1cb   : > { %v6708_v62 = vpop.f32.mrf.mxu0  ;;  %v9540_v5 = vpop.f32.mrf.mxu1 }
 0x1cd   : > { %v3712_v0 = vpop.f32.mrf.mxu0  ;;  %v6660_v60 = vpop.f32.mrf.mxu1 }
 0x1ce   : > { %v3391_v55 = vadd.f32 %v6660_v60, %v9437_v31 }
 0x1cf   : > { %v9543_v6 = vpop.f32.mrf.mxu0  ;;  %v3322_v19 = vpop.f32.mrf.mxu1 }
 0x1d0   : > { %9923 = vst [vmem:[#allocation13_spill] sm:$0xff] %v9543_v6  ;;  %v9545_v56 = vadd.f32 %v6708_v62, %v3391_v55  ;;  %v3389_v13 = vadd.f32 %v3322_v19, %v9440_v10 }
 0x1d1   : > { %v9548_v16 = vpop.f32.mrf.mxu0  ;;  %v9550_v12 = vpop.f32.mrf.mxu1 }
 0x1d2   : > { %9924 = vst [vmem:[#allocation15_spill] sm:$0xff] %v9548_v16  ;;  %v9552_v8 = vadd.f32 %v3712_v0, %v3389_v13 }
 0x1d3   : > { %v6712_v37 = vpop.f32.mrf.mxu0  ;;  %v9554_v3 = vpop.f32.mrf.mxu1 }
 0x1d4   : > { %9925 = vst [vmem:[#allocation17_spill] sm:$0xff] %v9552_v8 }
 0x1d5   : > { %v3728_v57 = vpop.f32.mrf.mxu0  ;;  %v6664_v54 = vpop.f32.mrf.mxu1 }
 0x1d6   : > { %v3395_v31 = vadd.f32 %v6664_v54, %v9449_v1 }
 0x1d7   : > { %v9557_v60 = vpop.f32.mrf.mxu0  ;;  %v3338_v20 = vpop.f32.mrf.mxu1 }
 0x1d8   : > { %9926 = vst [vmem:[#allocation20_spill] sm:$0xff] %v9557_v60  ;;  %v9559_v62 = vadd.f32 %v6712_v37, %v3395_v31  ;;  %v3393_v10 = vadd.f32 %v3338_v20, %v9452_v36 }
 0x1d9   : > { %v9562_v55 = vpop.f32.mrf.mxu0  ;;  %v9564_v19 = vpop.f32.mrf.mxu1 }
 0x1da   : > { %9927 = vst [vmem:[#allocation2_spill] sm:$0xff] %v9562_v55  ;;  %v9566_v0 = vadd.f32 %v3728_v57, %v3393_v10 }
 0x1db   : > { %v6716_v13 = vpop.f32.mrf.mxu0  ;;  %v9568_v16 = vpop.f32.mrf.mxu1 }
 0x1dc   : > { %9928 = vst [vmem:[#allocation5_spill] sm:$0xff] %v9566_v0  ;;  %v3372_v0 = vadd.f32 %v9480_v49, %v9383_v50 }
 0x1dd   : > { %v3744_v8 = vpop.f32.mrf.mxu0  ;;  %v6668_v6 = vpop.f32.mrf.mxu1 }
 0x1de   : > { %v3399_v1 = vadd.f32 %v6668_v6, %v9461_v22 }
 0x1df   : > { %v9571_v54 = vpop.f32.mrf.mxu0  ;;  %v3354_v60 = vpop.f32.mrf.mxu1 }
 0x1e0   : > { %9929 = vst [vmem:[#allocation4_spill] sm:$0xff] %v9571_v54  ;;  %v9573_v37 = vadd.f32 %v6716_v13, %v3399_v1  ;;  %v3397_v36 = vadd.f32 %v3354_v60, %v9464_v29  ;;  %v3370_v13 = vadd.f32 %v9484_v18, %v9386_v4  ;;  %v9592_v60 = vld [vmem:[%s9755_s2] ss:$0 sm:$0xff] }
 0x1e1   : > { %v9576_v20 = vpop.f32.mrf.mxu0  ;;  %v9578_v31 = vpop.f32.mrf.mxu1 }
 0x1e2   : > { %9930 = vst [vmem:[#allocation6_spill] sm:$0xff] %v9573_v37  ;;  %9931 = vst [vmem:[#allocation8_spill] sm:$0xff] %v9576_v20  ;;  %v9580_v57 = vadd.f32 %v3744_v8, %v3397_v36  ;;  %v3762_v36 = vadd.f32 %v9473_v33, %v3372_v0  ;;  %v3760_v54 = vadd.f32 %v9478_v28, %v3370_v13 }
 0x1e3   : > { %9932 = vst [vmem:[#allocation10_spill] sm:$0xff] %v9578_v31  ;;  %v9582_v55 = vpop.f32.mrf.mxu1  ;;  %v3376_v33 = vadd.f32 %v9494_v39, %v9395_v32 }
 0x1e4   : > { %9933 = vst [vmem:[#allocation11_spill] sm:$0xff] %v9580_v57  ;;  %v6784_v10 = vpop.f32.mrf.mxu0  ;;  %9934 = vst [vmem:[#allocation12_spill] sm:$0xff] %v9582_v55 }
 0x1e5   : > { %v6736_v6 = vpop.f32.mrf.mxu1  ;;  %v3766_v39 = vadd.f32 %v9487_v42, %v3376_v33  ;;  %v3380_v42 = vadd.f32 %v9508_v14, %v9407_v47 }
 0x1e6   : > { %v4884_v22 = vpop.f32.mrf.mxu0  ;;  %v4515_v1 = vadd.f32 %v6736_v6, %v9475_v52  ;;  %v9601_v52 = vld [vmem:[%s9756_s3] ss:$0 sm:$0xff] }
 0x1e7   : > { %v4386_v8 = vpop.f32.mrf.mxu1 }
 0x1e8   : > { %v6785_v29 = vpop.f32.mrf.mxu0  ;;  %v5013_v20 = vadd.f32 %v6784_v10, %v4515_v1  ;;  %v4513_v57 = vadd.f32 %v4386_v8, %v9482_v38 }
 0x1e9   : > { %v6737_v49 = vpop.f32.mrf.mxu1 }
 0x1ea   : > { %v4887_v50 = vpop.f32.mrf.mxu0  ;;  %v5052_v4 = vmul.f32 %v9592_v60, %v5013_v20  ;;  %v5011_v18 = vadd.f32 %v4884_v22, %v4513_v57  ;;  %v4516_v6 = vadd.f32 %v6737_v49, %v3762_v36  ;;  %v3374_v57 = vadd.f32 %v9498_v40, %v9398_v48 }
 0x1eb   : > { %v4389_v37 = vpop.f32.mrf.mxu1 }
 0x1ec   : > { %v6788_v55 = vpop.f32.mrf.mxu0  ;;  %v5050_v38 = vmul.f32 %v9592_v60, %v5011_v18  ;;  %v5014_v0 = vadd.f32 %v6785_v29, %v4516_v6  ;;  %v4514_v10 = vadd.f32 %v4389_v37, %v3760_v54  ;;  %v5091_v20 = vadd.f32 %v9601_v52, %v5052_v4 }
 0x1ed   : > { %v6740_v13 = vpop.f32.mrf.mxu1 }
 0x1ee   : > { %v4900_v28 = vpop.f32.mrf.mxu0  ;;  %v5053_v1 = vmul.f32 %v9592_v60, %v5014_v0  ;;  %v5012_v8 = vadd.f32 %v4887_v50, %v4514_v10  ;;  %v5089_v22 = vadd.f32 %v9601_v52, %v5050_v38  ;;  %v4519_v36 = vadd.f32 %v6740_v13, %v9489_v24 }
 0x1ef   : > { %v4402_v32 = vpop.f32.mrf.mxu1  ;;  %v5123_v50 = vmax.f32 %v5091_v20, 0.0  ;;  %v3764_v0 = vadd.f32 %v9492_v61, %v3374_v57 }
 0x1f0   : > { %v6789_v31 = vpop.f32.mrf.mxu0  ;;  %v5092_v54 = vadd.f32 %v9601_v52, %v5053_v1  ;;  %v5051_v37 = vmul.f32 %v9592_v60, %v5012_v8  ;;  %v4517_v29 = vadd.f32 %v4402_v32, %v9496_v41  ;;  %v5017_v4 = vadd.f32 %v6788_v55, %v4519_v36 }
 0x1f1   : > { %v6741_v18 = vpop.f32.mrf.mxu1  ;;  %v5121_v33 = vmax.f32 %v5089_v22, 0.0  ;;  %v3770_v32 = vadd.f32 %v9501_v58, %v3380_v42 }
 0x1f2   : > { %v4903_v49 = vpop.f32.mrf.mxu0  ;;  %v5124_v6 = vmax.f32 %v5092_v54, 0.0  ;;  %v5090_v48 = vadd.f32 %v9601_v52, %v5051_v37  ;;  %v5015_v40 = vadd.f32 %v4900_v28, %v4517_v29  ;;  %v4520_v38 = vadd.f32 %v6741_v18, %v3766_v39 }
 0x1f3   : > { %v5056_v41 = vmul.f32 %v9592_v60, %v5017_v4  ;;  %v4405_v55 = vpop.f32.mrf.mxu1  ;;  %v3378_v39 = vadd.f32 %v9512_v7, %v9410_v34 }
 0x1f4   : > { %v6792_v24 = vpop.f32.mrf.mxu0  ;;  %v6079_v10 = vpack.c.bf16 %v5124_v6, %v5123_v50  ;;  %v5122_v20 = vmax.f32 %v5090_v48, 0.0  ;;  %v5054_v28 = vmul.f32 %v9592_v60, %v5015_v40  ;;  %v5018_v13 = vadd.f32 %v6789_v31, %v4520_v38 }
 0x1f5   : > { %v5095_v1 = vadd.f32 %v9601_v52, %v5056_v41  ;;  %v4518_v47 = vadd.f32 %v4405_v55, %v3764_v0  ;;  %v6744_v14 = vpop.f32.mrf.mxu1 }
 0x1f6   : > { %v4916_v61 = vpop.f32.mrf.mxu0  ;;  %6151 = vst [vmem:[%s9624_s24 + $0x8] sm:$0xff] %v6079_v10   ;;  %v6074_v8 = vpack.c.bf16 %v5122_v20, %v5121_v33  ;;  %v5057_v57 = vmul.f32 %v9592_v60, %v5018_v13  ;;  %v4523_v22 = vadd.f32 %v6744_v14, %v9503_v25  ;;  %v5093_v31 = vadd.f32 %v9601_v52, %v5054_v28 }
 0x1f7   : > { %v5016_v54 = vadd.f32 %v4903_v49, %v4518_v47  ;;  %v4418_v37 = vpop.f32.mrf.mxu1  ;;  %v5127_v6 = vmax.f32 %v5095_v1, 0.0  ;;  %v3768_v49 = vadd.f32 %v9506_v26, %v3378_v39 }
 0x1f8   : > { %v6793_v36 = vpop.f32.mrf.mxu0  ;;  %6075 = vst [vmem:[%s9624_s24] sm:$0xff] %v6074_v8   ;;  %v5096_v29 = vadd.f32 %v9601_v52, %v5057_v57  ;;  %v5021_v50 = vadd.f32 %v6792_v24, %v4523_v22  ;;  %v4521_v4 = vadd.f32 %v4418_v37, %v9510_v51  ;;  %v3384_v51 = vadd.f32 %v9522_v35, %v9419_v2 }
 0x1f9   : > { %v5055_v25 = vmul.f32 %v9592_v60, %v5016_v54  ;;  %v6745_v48 = vpop.f32.mrf.mxu1  ;;  %v5125_v24 = vmax.f32 %v5093_v31, 0.0  ;;  %v3382_v2 = vadd.f32 %v9526_v30, %v9422_v17 }
 0x1fa   : > { %v4919_v18 = vpop.f32.mrf.mxu0  ;;  %v5128_v40 = vmax.f32 %v5096_v29, 0.0  ;;  %v5060_v58 = vmul.f32 %v9592_v60, %v5021_v50  ;;  %v5019_v38 = vadd.f32 %v4916_v61, %v4521_v4  ;;  %v4524_v34 = vadd.f32 %v6745_v48, %v3770_v32 }
 0x1fb   : > { %v5094_v0 = vadd.f32 %v9601_v52, %v5055_v25  ;;  %v4421_v42 = vpop.f32.mrf.mxu1  ;;  %v3774_v57 = vadd.f32 %v9515_v45, %v3384_v51  ;;  %v3772_v4 = vadd.f32 %v9520_v46, %v3382_v2  ;;  %v3386_v51 = vadd.f32 %v9540_v5, %v9434_v11 }
 0x1fc   : > { %v6796_v7 = vpop.f32.mrf.mxu0  ;;  %v6089_v33 = vpack.c.bf16 %v5128_v40, %v5127_v6  ;;  %v5022_v41 = vadd.f32 %v6793_v36, %v4524_v34  ;;  %v5099_v20 = vadd.f32 %v9601_v52, %v5060_v58  ;;  %v5058_v28 = vmul.f32 %v9592_v60, %v5019_v38 }
 0x1fd   : > { %v5126_v10 = vmax.f32 %v5094_v0, 0.0  ;;  %v4522_v13 = vadd.f32 %v4421_v42, %v3768_v49  ;;  %v6748_v61 = vpop.f32.mrf.mxu1  ;;  %v3776_v2 = vadd.f32 %v9534_v53, %v3386_v51 }
 0x1fe   : > { %v4932_v55 = vpop.f32.mrf.mxu0  ;;  %6153 = vst [vmem:[%s9624_s24 + $0x18] sm:$0xff] %v6089_v33   ;;  %v5061_v26 = vmul.f32 %v9592_v60, %v5022_v41  ;;  %v4527_v1 = vadd.f32 %v6748_v61, %v9517_v23  ;;  %v5131_v54 = vmax.f32 %v5099_v20, 0.0  ;;  %v5097_v37 = vadd.f32 %v9601_v52, %v5058_v28 }
 0x1ff   : > { %v6084_v35 = vpack.c.bf16 %v5126_v10, %v5125_v24  ;;  %v5020_v14 = vadd.f32 %v4919_v18, %v4522_v13  ;;  %v4434_v8 = vpop.f32.mrf.mxu1 }
 0x200   : > { %v6797_v47 = vpop.f32.mrf.mxu0  ;;  %v5100_v22 = vadd.f32 %v9601_v52, %v5061_v26  ;;  %v5025_v36 = vadd.f32 %v6796_v7, %v4527_v1  ;;  %v4525_v32 = vadd.f32 %v4434_v8, %v9524_v9  ;;  %v3388_v9 = vadd.f32 %v9536_v63, %v9431_v44 }
 0x201   : > { %6152 = vst [vmem:[%s9624_s24 + $0x10] sm:$0xff] %v6084_v35   ;;  %v5059_v23 = vmul.f32 %v9592_v60, %v5020_v14  ;;  %v6749_v31 = vpop.f32.mrf.mxu1  ;;  %v5129_v38 = vmax.f32 %v5097_v37, 0.0 }
 0x202   : > { %v4935_v39 = vpop.f32.mrf.mxu0  ;;  %v5132_v29 = vmax.f32 %v5100_v22, 0.0  ;;  %v5064_v17 = vmul.f32 %v9592_v60, %v5025_v36  ;;  %v5023_v30 = vadd.f32 %v4932_v55, %v4525_v32  ;;  %v4528_v50 = vadd.f32 %v6749_v31, %v3774_v57 }
 0x203   : > { %v5098_v18 = vadd.f32 %v9601_v52, %v5059_v23  ;;  %v4437_v6 = vpop.f32.mrf.mxu1  ;;  %v3778_v42 = vadd.f32 %v9529_v15, %v3388_v9 }
 0x204   : > { %v6099_v25 = vpack.c.bf16 %v5132_v29, %v5131_v54  ;;  %v5062_v48 = vmul.f32 %v9592_v60, %v5023_v30  ;;  %v5026_v40 = vadd.f32 %v6797_v47, %v4528_v50  ;;  %v5103_v7 = vadd.f32 %v9601_v52, %v5064_v17  ;;  %v9935_v50 = vld [vmem:[#allocation13_spill] sm:$0xff] }
 0x205   : > { %v6800_v45 = vpop.f32.mrf.mxu0  ;;  %v5130_v34 = vmax.f32 %v5098_v18, 0.0  ;;  %v4526_v49 = vadd.f32 %v4437_v6, %v3772_v4  ;;  %v6752_v0 = vpop.f32.mrf.mxu1  ;;  %v9936_v18 = vld [vmem:[#allocation17_spill] sm:$0xff] }
 0x206   : > { %6155 = vst [vmem:[%s9624_s24 + $0x28] sm:$0xff] %v6099_v25   ;;  %v5065_v46 = vmul.f32 %v9592_v60, %v5026_v40  ;;  %v4531_v44 = vadd.f32 %v6752_v0, %v9531_v21  ;;  %v5101_v55 = vadd.f32 %v9601_v52, %v5062_v48  ;;  %v5135_v61 = vmax.f32 %v5103_v7, 0.0 }
 0x207   : > { %v4948_v58 = vpop.f32.mrf.mxu0  ;;  %v6094_v24 = vpack.c.bf16 %v5130_v34, %v5129_v38  ;;  %v5024_v33 = vadd.f32 %v4935_v39, %v4526_v49  ;;  %v4450_v41 = vpop.f32.mrf.mxu1  ;;  %v9937_v49 = vld [vmem:[#allocation15_spill] sm:$0xff] }
 0x208   : > { %v5104_v10 = vadd.f32 %v9601_v52, %v5065_v46  ;;  %v5029_v20 = vadd.f32 %v6800_v45, %v4531_v44  ;;  %v4529_v28 = vadd.f32 %v4450_v41, %v9538_v59  ;;  %v3392_v59 = vadd.f32 %v9550_v12, %v9443_v27  ;;  %v9938_v46 = vld [vmem:[#allocation3_spill] sm:$0xff] }
 0x209   : > { %v6801_v63 = vpop.f32.mrf.mxu0  ;;  %6154 = vst [vmem:[%s9624_s24 + $0x20] sm:$0xff] %v6094_v24   ;;  %v5063_v21 = vmul.f32 %v9592_v60, %v5024_v33  ;;  %v6753_v26 = vpop.f32.mrf.mxu1  ;;  %v5133_v8 = vmax.f32 %v5101_v55, 0.0  ;;  %v3390_v27 = vadd.f32 %v9554_v3, %v9446_v43  ;;  %v3396_v44 = vadd.f32 %v9564_v19, %v9938_v46  ;;  %v9948_v46 = vld [vmem:[#allocation4_spill] sm:$0xff] }
 0x20a   : > { %v5136_v15 = vmax.f32 %v5104_v10, 0.0  ;;  %v5068_v1 = vmul.f32 %v9592_v60, %v5029_v20  ;;  %v5027_v11 = vadd.f32 %v4948_v58, %v4529_v28  ;;  %v4532_v5 = vadd.f32 %v6753_v26, %v3778_v42  ;;  %v9939_v26 = vld [vmem:[#allocation20_spill] sm:$0xff] }
 0x20b   : > { %v4951_v13 = vpop.f32.mrf.mxu0  ;;  %v5102_v35 = vadd.f32 %v9601_v52, %v5063_v21  ;;  %v4453_v14 = vpop.f32.mrf.mxu1  ;;  %v3782_v45 = vadd.f32 %v9935_v50, %v3392_v59  ;;  %v3780_v0 = vadd.f32 %v9937_v49, %v3390_v27 }
 0x20c   : > { %v6109_v57 = vpack.c.bf16 %v5136_v15, %v5135_v61  ;;  %v5030_v22 = vadd.f32 %v6801_v63, %v4532_v5  ;;  %v5107_v39 = vadd.f32 %v9601_v52, %v5068_v1  ;;  %v5066_v54 = vmul.f32 %v9592_v60, %v5027_v11  ;;  %v9940_v1 = vld [vmem:[#allocation7_spill] sm:$0xff] }
 0x20d   : > { %v6804_v47 = vpop.f32.mrf.mxu0  ;;  %v5134_v32 = vmax.f32 %v5102_v35, 0.0  ;;  %v4530_v37 = vadd.f32 %v4453_v14, %v3776_v2  ;;  %v6756_v23 = vpop.f32.mrf.mxu1  ;;  %v3786_v15 = vadd.f32 %v9939_v26, %v3396_v44  ;;  %v3394_v11 = vadd.f32 %v9568_v16, %v9940_v1 }
 0x20e   : > { %6157 = vst [vmem:[%s9624_s24 + $0x38] sm:$0xff] %v6109_v57   ;;  %v5069_v53 = vmul.f32 %v9592_v60, %v5030_v22  ;;  %v4535_v31 = vadd.f32 %v6756_v23, %v9545_v56  ;;  %v5139_v48 = vmax.f32 %v5107_v39, 0.0  ;;  %v5105_v40 = vadd.f32 %v9601_v52, %v5066_v54 }
 0x20f   : > { %v4964_v36 = vpop.f32.mrf.mxu0  ;;  %v6104_v12 = vpack.c.bf16 %v5134_v32, %v5133_v8  ;;  %v5028_v17 = vadd.f32 %v4951_v13, %v4530_v37  ;;  %v4466_v30 = vpop.f32.mrf.mxu1  ;;  %v9941_v8 = vld [vmem:[#allocation5_spill] sm:$0xff] }
 0x210   : > { %v5108_v4 = vadd.f32 %v9601_v52, %v5069_v53  ;;  %v5033_v9 = vadd.f32 %v6804_v47, %v4535_v31  ;;  %v4533_v6 = vadd.f32 %v4466_v30, %v9936_v18  ;;  %v5137_v55 = vmax.f32 %v5105_v40, 0.0  ;;  %v9942_v53 = vld [vmem:[#allocation2_spill] sm:$0xff] }
 0x211   : > { %v6805_v29 = vpop.f32.mrf.mxu0  ;;  %6156 = vst [vmem:[%s9624_s24 + $0x30] sm:$0xff] %v6104_v12   ;;  %v5067_v56 = vmul.f32 %v9592_v60, %v5028_v17  ;;  %v6757_v58 = vpop.f32.mrf.mxu1  ;;  %v3784_v31 = vadd.f32 %v9942_v53, %v3394_v11  ;;  %v9943_v12 = vld [vmem:[#allocation9_spill] sm:$0xff]  ;;  %v9944_v17 = vld [vmem:[#allocation10_spill] sm:$0xff] }
 0x212   : > { %v5140_v38 = vmax.f32 %v5108_v4, 0.0  ;;  %v5072_v43 = vmul.f32 %v9592_v60, %v5033_v9  ;;  %v5031_v3 = vadd.f32 %v4964_v36, %v4533_v6  ;;  %v4536_v34 = vadd.f32 %v6757_v58, %v3782_v45 }
 0x213   : > { %v4967_v25 = vpop.f32.mrf.mxu0  ;;  %v5106_v63 = vadd.f32 %v9601_v52, %v5067_v56  ;;  %v4469_v42 = vpop.f32.mrf.mxu1  ;;  %v3400_v30 = vadd.f32 %v9944_v17, %v9943_v12  ;;  %v9945_v56 = vld [vmem:[#allocation6_spill] sm:$0xff] }
 0x214   : > { %v6119_v51 = vpack.c.bf16 %v5140_v38, %v5139_v48  ;;  %v5070_v24 = vmul.f32 %v9592_v60, %v5031_v3  ;;  %v5034_v33 = vadd.f32 %v6805_v29, %v4536_v34  ;;  %v5111_v20 = vadd.f32 %v9601_v52, %v5072_v43  ;;  %v9946_v43 = vld [vmem:[#allocation18_spill] sm:$0xff]  ;;  %v9947_v3 = vld [vmem:[#allocation12_spill] sm:$0xff] }
 0x215   : > { %v6808_v7 = vpop.f32.mrf.mxu0  ;;  %v5138_v10 = vmax.f32 %v5106_v63, 0.0  ;;  %v4534_v28 = vadd.f32 %v4469_v42, %v3780_v0  ;;  %v6760_v13 = vpop.f32.mrf.mxu1  ;;  %v3398_v34 = vadd.f32 %v9947_v3, %v9946_v43  ;;  %v3790_v44 = vadd.f32 %v9948_v46, %v3400_v30 }
 0x216   : > { %6159 = vst [vmem:[%s9624_s24 + $0x48] sm:$0xff] %v6119_v51   ;;  %v5073_v61 = vmul.f32 %v9592_v60, %v5034_v33  ;;  %v4539_v19 = vadd.f32 %v6760_v13, %v9559_v62  ;;  %v5109_v35 = vadd.f32 %v9601_v52, %v5070_v24  ;;  %v5143_v36 = vmax.f32 %v5111_v20, 0.0  ;;  %v9949_v51 = vld [vmem:[#allocation11_spill] sm:$0xff] }
 0x217   : > { %v4980_v41 = vpop.f32.mrf.mxu0  ;;  %v6114_v5 = vpack.c.bf16 %v5138_v10, %v5137_v55  ;;  %v5032_v47 = vadd.f32 %v4967_v25, %v4534_v28  ;;  %v4482_v2 = vpop.f32.mrf.mxu1 }
 0x218   : > { %v5112_v14 = vadd.f32 %v9601_v52, %v5073_v61  ;;  %v5037_v59 = vadd.f32 %v6808_v7, %v4539_v19  ;;  %v4537_v57 = vadd.f32 %v4482_v2, %v9941_v8  ;;  %v5141_v50 = vmax.f32 %v5109_v35, 0.0 }
 0x219   : > { %v6809_v21 = vpop.f32.mrf.mxu0  ;;  %6158 = vst [vmem:[%s9624_s24 + $0x40] sm:$0xff] %v6114_v5   ;;  %v5071_v62 = vmul.f32 %v9592_v60, %v5032_v47  ;;  %v6761_v32 = vpop.f32.mrf.mxu1 }
 0x21a   : > { %v5144_v39 = vmax.f32 %v5112_v14, 0.0  ;;  %v5076_v54 = vmul.f32 %v9592_v60, %v5037_v59  ;;  %v5035_v16 = vadd.f32 %v4980_v41, %v4537_v57  ;;  %v4540_v37 = vadd.f32 %v6761_v32, %v3786_v15 }
 0x21b   : > { %v4983_v22 = vpop.f32.mrf.mxu0  ;;  %v5110_v29 = vadd.f32 %v9601_v52, %v5071_v62  ;;  %v4485_v27 = vpop.f32.mrf.mxu1 }
 0x21c   : > { %v6129_v45 = vpack.c.bf16 %v5144_v39, %v5143_v36  ;;  %v5038_v4 = vadd.f32 %v6809_v21, %v4540_v37  ;;  %v5115_v18 = vadd.f32 %v9601_v52, %v5076_v54  ;;  %v5074_v6 = vmul.f32 %v9592_v60, %v5035_v16  ;;  %v9950_v21 = vld [vmem:[#allocation8_spill] sm:$0xff] }
 0x21d   : > { %v6812_v23 = vpop.f32.mrf.mxu0  ;;  %v5142_v9 = vmax.f32 %v5110_v29, 0.0  ;;  %v4538_v25 = vadd.f32 %v4485_v27, %v3784_v31  ;;  %v6764_v48 = vpop.f32.mrf.mxu1  ;;  %v3788_v26 = vadd.f32 %v9950_v21, %v3398_v34 }
 0x21e   : > { %6161 = vst [vmem:[%s9624_s24 + $0x58] sm:$0xff] %v6129_v45   ;;  %v5077_v40 = vmul.f32 %v9592_v60, %v5038_v4  ;;  %v4543_v58 = vadd.f32 %v6764_v48, %v9945_v56  ;;  %v5147_v33 = vmax.f32 %v5115_v18, 0.0  ;;  %v5113_v41 = vadd.f32 %v9601_v52, %v5074_v6 }
 0x21f   : > { %v4996_v38 = vpop.f32.mrf.mxu0  ;;  %v6124_v7 = vpack.c.bf16 %v5142_v9, %v5141_v50  ;;  %v5036_v49 = vadd.f32 %v4983_v22, %v4538_v25  ;;  %v4498_v0 = vpop.f32.mrf.mxu1 }
 0x220   : > { %v5116_v63 = vadd.f32 %v9601_v52, %v5077_v40  ;;  %v5041_v42 = vadd.f32 %v6812_v23, %v4543_v58  ;;  %v4541_v24 = vadd.f32 %v4498_v0, %v9949_v51  ;;  %v5145_v47 = vmax.f32 %v5113_v41, 0.0 }
 0x221   : > { %6160 = vst [vmem:[%s9624_s24 + $0x50] sm:$0xff] %v6124_v7   ;;  %v5075_v55 = vmul.f32 %v9592_v60, %v5036_v49  ;;  %v6765_v10 = vpop.f32.mrf.mxu1  ;;  %v6813_v19 = vpop.f32.mrf.mxu0 }
 0x222   : > { %v5148_v20 = vmax.f32 %v5116_v63, 0.0  ;;  %v5080_v28 = vmul.f32 %v9592_v60, %v5041_v42  ;;  %v5039_v13 = vadd.f32 %v4996_v38, %v4541_v24  ;;  %v4544_v61 = vadd.f32 %v6765_v10, %v3790_v44 }
 0x223   : > { %v5114_v15 = vadd.f32 %v9601_v52, %v5075_v55  ;;  %v4501_v1 = vpop.f32.mrf.mxu1  ;;  %v4999_v57 = vpop.f32.mrf.mxu0 }
 0x224   : > { %v6139_v11 = vpack.c.bf16 %v5148_v20, %v5147_v33  ;;  %v5042_v5 = vadd.f32 %v6813_v19, %v4544_v61  ;;  %v5078_v35 = vmul.f32 %v9592_v60, %v5039_v13  ;;  %v4542_v14 = vadd.f32 %v4501_v1, %v3788_v26 }
 0x225   : > { %v5146_v2 = vmax.f32 %v5114_v15, 0.0  ;;  %v5119_v59 = vadd.f32 %v9601_v52, %v5080_v28 }
 0x226   : > { %6163 = vst [vmem:[%s9624_s24 + $0x68] sm:$0xff] %v6139_v11   ;;  %v5081_v8 = vmul.f32 %v9592_v60, %v5042_v5  ;;  %v5040_v36 = vadd.f32 %v4999_v57, %v4542_v14  ;;  %v5117_v32 = vadd.f32 %v9601_v52, %v5078_v35 }
 0x227   : > { %v6134_v22 = vpack.c.bf16 %v5146_v2, %v5145_v47  ;;  %v5151_v54 = vmax.f32 %v5119_v59, 0.0 }
 0x228   : > { %v5120_v62 = vadd.f32 %v9601_v52, %v5081_v8  ;;  %v5079_v39 = vmul.f32 %v9592_v60, %v5040_v36  ;;  %v5149_v53 = vmax.f32 %v5117_v32, 0.0 }
 0x229   : > { %6162 = vst [vmem:[%s9624_s24 + $0x60] sm:$0xff] %v6134_v22  }
 0x22a   : > { %v5152_v16 = vmax.f32 %v5120_v62, 0.0  ;;  %v5118_v37 = vadd.f32 %v9601_v52, %v5079_v39 }
 0x22c   : > { %v6149_v23 = vpack.c.bf16 %v5152_v16, %v5151_v54  ;;  %v5150_v31 = vmax.f32 %v5118_v37, 0.0 }
 0x22e   : > { %6165 = vst [vmem:[%s9624_s24 + $0x78] sm:$0xff] %v6149_v23   ;;  %v6144_v29 = vpack.c.bf16 %v5150_v31, %v5149_v53 }
 0x230   : > { %6164 = vst [vmem:[%s9624_s24 + $0x70] sm:$0xff] %v6144_v29  }
 0x231 PF: > { %s14_s17 = sadd.s32 1, %s7006_s17   ;;  %s9951_s15 = smov %s7002_s16 }
 0x232   : > { %p11_p5 = scmp.ge.s32.totalorder %s14_s17, 4   ;;  %s9952_s16 = smov %s9954_s18 }
 0x234   :  { %13 = sbr.rel (!%p11_p5) target bundleno = 2 (0x2), region = 77 }

</bundles_post_ra>
